<compile_context>
chip_gen: v7x
topology: tpu7x:2x2x1
jax: 0.10.0
libtpu: 0.0.40
codegen_flags: <defaults>
</compile_context>

<pallas_src>
import functools
import math

import jax
import jax.numpy as jnp
from jax import lax
from jax.experimental import pallas as pl
from jax.experimental.pallas import tpu as pltpu


# Row indices of the packed (9, D) LayerNorm/bias parameter slab.
_G1, _BE1, _G2, _BE2, _BQ, _BK, _BV, _BO, _B2 = range(9)


def _layernorm(v, gamma, beta, eps=1e-5):
    mu = jnp.mean(v, axis=-1, keepdims=True)
    var = jnp.mean((v - mu) ** 2, axis=-1, keepdims=True)
    return (v - mu) * lax.rsqrt(var + eps) * gamma + beta


def _gelu_exact(v):
    # exact GELU (erf formulation), matching torch.nn.GELU default
    return 0.5 * v * (1.0 + lax.erf(v * (1.0 / math.sqrt(2.0))))


def encoder_block_kernel(
    x_ref,                      # (1, S, D) full sequence (resident across q tiles)
    wq_ref, wkv_ref, wo_ref,    # (D,D) scaled-Q proj, (D,2D) fused K/V proj, (D,D) out proj
    w1_ref, w2_ref, b1_ref,     # (nF, D, fc), (nF, fc, D), (nF, 1, fc)  pre-chunked FFN
    pvec_ref,                   # (9, D) packed LN params + biases
    o_ref,                      # (1, tq, D)
    acc_ref, m_ref, l_ref,      # VMEM scratch: (tq, D), (tq, H), (tq, H)
    *, num_heads, head_dim, tq, tk,
):
    D = num_heads * head_dim
    S = x_ref.shape[1]
    n_kv = S // tk
    n_f = w1_ref.shape[0]

    g1 = pvec_ref[_G1:_G1 + 1, :]
    be1 = pvec_ref[_BE1:_BE1 + 1, :]

    # ---- query tile: pre-norm 1 + (scale-folded) Q projection --------------
    q0 = pl.multiple_of(pl.program_id(1) * tq, tq)
    x_q = x_ref[0, pl.ds(q0, tq), :].astype(jnp.float32)               # (tq, D)
    q = jnp.dot(_layernorm(x_q, g1, be1).astype(jnp.bfloat16), wq_ref[...],
                preferred_element_type=jnp.float32) + pvec_ref[_BQ:_BQ + 1, :]
    q = q.astype(jnp.bfloat16)                                         # (tq, D)

    # ---- flash-style attention: online softmax over KV chunks --------------
    m_ref[...] = jnp.full(m_ref.shape, -jnp.inf, dtype=jnp.float32)
    l_ref[...] = jnp.zeros(l_ref.shape, dtype=jnp.float32)
    acc_ref[...] = jnp.zeros(acc_ref.shape, dtype=jnp.float32)
    bk = pvec_ref[_BK:_BK + 1, :]
    bv = pvec_ref[_BV:_BV + 1, :]

    def kv_step(kv_i, carry):
        k0 = pl.multiple_of(kv_i * tk, tk)
        xc = x_ref[0, pl.ds(k0, tk), :].astype(jnp.float32)            # (tk, D)
        kv = jnp.dot(_layernorm(xc, g1, be1).astype(jnp.bfloat16), wkv_ref[...],
                     preferred_element_type=jnp.float32)               # (tk, 2D)
        k = (kv[:, :D] + bk).astype(jnp.bfloat16)
        v = (kv[:, D:] + bv).astype(jnp.bfloat16)
        for h in range(num_heads):                                     # static unroll (small H)
            sl = slice(h * head_dim, (h + 1) * head_dim)
            # q.k^T as an NT contraction: no explicit transpose through the XLU.
            s = lax.dot_general(q[:, sl], k[:, sl], (((1,), (1,)), ((), ())),
                                preferred_element_type=jnp.float32)    # (tq, tk)
            m_prev = m_ref[:, h:h + 1]
            m_new = jnp.maximum(m_prev, jnp.max(s, axis=-1, keepdims=True))
            alpha = jnp.exp(m_prev - m_new)
            p = jnp.exp(s - m_new)
            l_ref[:, h:h + 1] = alpha * l_ref[:, h:h + 1] + jnp.sum(
                p, axis=-1, keepdims=True)
            # per-head output accumulated at its column offset in the (tq, D) slab
            acc_ref[:, sl] = alpha * acc_ref[:, sl] + jnp.dot(
                p.astype(jnp.bfloat16), v[:, sl],
                preferred_element_type=jnp.float32)
            m_ref[:, h:h + 1] = m_new
        return carry

    lax.fori_loop(0, n_kv, kv_step, 0)

    # ---- per-head softmax normalization, then ONE full-K output projection --
    for h in range(num_heads):
        sl = slice(h * head_dim, (h + 1) * head_dim)
        inv = pl.reciprocal(l_ref[:, h:h + 1], approx=True)   # EUP; ~1e-4 rel err
        acc_ref[:, sl] = acc_ref[:, sl] * inv
    attn = jnp.dot(acc_ref[...].astype(jnp.bfloat16), wo_ref[...],
                   preferred_element_type=jnp.float32) + pvec_ref[_BO:_BO + 1, :]

    x1 = x_q + attn                                                    # residual 1

    # ---- pre-norm 2 + F-chunked feed-forward --------------------------------
    g2 = pvec_ref[_G2:_G2 + 1, :]
    be2 = pvec_ref[_BE2:_BE2 + 1, :]
    xn = _layernorm(x1, g2, be2).astype(jnp.bfloat16)                  # (tq, D)

    acc_ref[...] = jnp.zeros(acc_ref.shape, dtype=jnp.float32)         # reuse as FFN acc

    def ffn_step(fi, carry):
        hc = jnp.dot(xn, w1_ref[fi],
                     preferred_element_type=jnp.float32) + b1_ref[fi]  # (tq, fc)
        hc = _gelu_exact(hc)
        acc_ref[...] += jnp.dot(hc.astype(jnp.bfloat16), w2_ref[fi],
                                preferred_element_type=jnp.float32)    # (tq, D)
        return carry

    lax.fori_loop(0, n_f, ffn_step, 0)

    out = x1 + acc_ref[...] + pvec_ref[_B2:_B2 + 1, :]                 # residual 2 (dropout=0)
    o_ref[0] = out.astype(o_ref.dtype)


def _pick_tile(n, pref, align):
    """Largest `align`-aligned divisor of n that is <= pref (or n itself)."""
    if n <= pref:
        return n
    for t in range(pref, align - 1, -1):
        if n % t == 0 and t % align == 0:
            return t
    return n


def _preferred_seq_tile():
    # 128-wide q/kv tiles on v5e (4x128^2 MXU), 256 on v6e/v7x (2x256^2 MXU).
    try:
        kind = jax.devices()[0].device_kind.lower()
    except Exception:
        return 256
    if "v5" in kind and ("lite" in kind or "v5e" in kind):
        return 128
    return 256


def _vmem_limit_bytes(resident_bytes):
    cap = 128 * 1024 * 1024
    try:
        cap = int(pltpu.get_tpu_info().vmem_capacity_bytes)
    except Exception:
        pass
    want = int(resident_bytes) + (24 << 20)   # headroom for pipeline + Mosaic scratch
    return max(32 << 20, min(want, int(cap * 0.78), 100 << 20))


def encoder_block(x, params, num_heads):
    B, S, D = x.shape
    head_dim = D // num_heads
    F = params["w1"].shape[1]
    scale = 1.0 / math.sqrt(head_dim)

    pref = _preferred_seq_tile()
    tq = _pick_tile(S, pref, 8)
    tk = _pick_tile(S, pref, 8)
    fc = _pick_tile(F, 512, 128)
    n_q = S // tq
    n_f = F // fc

    # Host-side weight prep (one-time):
    #  * attention scale folded into the Q projection (weights + bias),
    #  * K/V fused into a single (D, 2D) projection,
    #  * w1/w2/b1 pre-split into F-chunks so the FFN is streamed,
    #  * all MXU weight operands cast to bf16 once,
    #  * the nine (1, D) LN/bias vectors packed into ONE (9, D) slab.
    wq = (params["wq"] * scale).astype(jnp.bfloat16)                     # (D, D)
    wkv = jnp.concatenate([params["wk"], params["wv"]],
                          axis=1).astype(jnp.bfloat16)                   # (D, 2D)
    wo = params["wo"].astype(jnp.bfloat16)                               # (D, D)
    w1 = (params["w1"].reshape(D, n_f, fc).transpose(1, 0, 2)
          .astype(jnp.bfloat16))                                         # (n_f, D, fc)
    w2 = params["w2"].reshape(n_f, fc, D).astype(jnp.bfloat16)           # (n_f, fc, D)
    b1 = params["b1"].reshape(n_f, 1, fc).astype(jnp.float32)            # (n_f, 1, fc)
    pvec = jnp.concatenate(
        [params["g1"], params["be1"], params["g2"], params["be2"],
         params["bq"] * scale, params["bk"], params["bv"],
         params["bo"], params["b2"]], axis=0).astype(jnp.float32)        # (9, D)

    plist = [wq, wkv, wo, w1, w2, b1, pvec]
    weight_bytes = sum(int(p.size) * p.dtype.itemsize for p in plist)

    kernel = functools.partial(encoder_block_kernel, num_heads=num_heads,
                               head_dim=head_dim, tq=tq, tk=tk)

    # Rough resident-VMEM footprint (worst case: double-buffered weights).
    resident = (2 * S * D * x.dtype.itemsize           # x block (double-buffered)
                + 2 * weight_bytes
                + (tq * D + 2 * tq * 128) * 4          # scratch (m/l pad to a lane tile)
                + 2 * tq * D * x.dtype.itemsize)       # out block (double-buffered)
    vmem_limit = _vmem_limit_bytes(resident)

    # Advisory cost estimate (guides XLA scheduling around the custom call).
    attn_flops = 4 * S * S * D                         # QK^T + PV
    proj_flops = 4 * S * D * D                         # Q proj + output proj
    kv_flops = n_q * 4 * S * D * D                     # K/V proj recomputed per q tile
    ffn_flops = 4 * S * D * F
    cost = pl.CostEstimate(
        flops=int(B * (attn_flops + proj_flops + kv_flops + ffn_flops)),
        transcendentals=int(B * (num_heads * S * S + S * F)),
        bytes_accessed=int(2 * B * S * D * 4 + weight_bytes))

    def build(single_buffer):
        def resident_spec(shape):
            idx = lambda b, qi: (0,) * len(shape)
            if single_buffer:
                # Grid-invariant blocks: double-buffering them only wastes VMEM
                # (matters most inside v7x's 64 MiB budget).
                return pl.BlockSpec(shape, idx, pipeline_mode=pl.Buffered(1))
            return pl.BlockSpec(shape, idx)

        return pl.pallas_call(
            kernel,
            out_shape=jax.ShapeDtypeStruct((B, S, D), x.dtype),
            grid=(B, n_q),
            in_specs=[pl.BlockSpec((1, S, D), lambda b, qi: (b, 0, 0))]
                     + [resident_spec(p.shape) for p in plist],
            out_specs=pl.BlockSpec((1, tq, D), lambda b, qi: (b, qi, 0)),
            scratch_shapes=[
                pltpu.VMEM((tq, D), jnp.float32),           # attn slab / FFN accumulator
                pltpu.VMEM((tq, num_heads), jnp.float32),   # running max per head
                pltpu.VMEM((tq, num_heads), jnp.float32),   # running sum per head
            ],
            compiler_params=pltpu.CompilerParams(
                # Both grid axes are independent: lets v7x shard (B, q-tiles)
                # across its two TensorCores even at B=1-2; neutral on v5e/v6e.
                dimension_semantics=("parallel", "parallel"),
                vmem_limit_bytes=vmem_limit,
            ),
            cost_estimate=cost,
        )

    try:
        return build(single_buffer=True)(x, *plist)
    except Exception:
        # Graceful degradation for JAX builds where pipeline_mode=pl.Buffered(1)
        # is not supported on pallas_call inputs: identical numerics, default
        # (double-buffered) resident weights.
        return build(single_buffer=False)(x, *plist)


def make_params(key, input_dim, num_heads, dim_feedforward):
    # Deterministic synthetic init (weights stored as (in, out): y = x @ W + b).
    ks = jax.random.split(key, 12)
    D, F = input_dim, dim_feedforward
    nrm = lambda k, shape, s=0.05: (s * jax.random.normal(k, shape)).astype(jnp.float32)
    params = {
        "wq": nrm(ks[0], (D, D)), "bq": nrm(ks[1], (1, D), 0.01),
        "wk": nrm(ks[2], (D, D)), "bk": nrm(ks[3], (1, D), 0.01),
        "wv": nrm(ks[4], (D, D)), "bv": nrm(ks[5], (1, D), 0.01),
        "wo": nrm(ks[6], (D, D)), "bo": nrm(ks[7], (1, D), 0.01),
        "g1": jnp.ones((1, D), jnp.float32), "be1": jnp.zeros((1, D), jnp.float32),
        "g2": jnp.ones((1, D), jnp.float32), "be2": jnp.zeros((1, D), jnp.float32),
        "w1": nrm(ks[8], (D, F)), "b1": nrm(ks[9], (1, F), 0.01),
        "w2": nrm(ks[10], (F, D)), "b2": nrm(ks[11], (1, D), 0.01),
    }
    return params


if __name__ == "__main__":
    B, S, D = 2, 8, 32          # batch, seq, input_dim
    num_heads = 4
    dim_feedforward = 4 * D     # default: 4 * input_dim

    key = jax.random.PRNGKey(0)
    kx, kp = jax.random.split(key)
    x = jax.random.normal(kx, (B, S, D), dtype=jnp.float32)
    params = make_params(kp, D, num_heads, dim_feedforward)

    out = encoder_block(x, params, num_heads)
    out = jax.block_until_ready(out)
    assert out.shape == (B, S, D) and out.dtype == jnp.float32
    assert bool(jnp.all(jnp.isfinite(out)))
    print("KERNEL_OK")
</pallas_src>

<mosaic_0001>
module attributes {stable_mosaic.version = 11 : i64} {
  func.func @encoder_block_kernel(%arg0: i32, %arg1: i32, %arg2: memref<1x8x32xf32, #tpu.memory_space<vmem>>, %arg3: memref<32x32xbf16, #tpu.memory_space<vmem>>, %arg4: memref<32x64xbf16, #tpu.memory_space<vmem>>, %arg5: memref<32x32xbf16, #tpu.memory_space<vmem>>, %arg6: memref<1x32x128xbf16, #tpu.memory_space<vmem>>, %arg7: memref<1x128x32xbf16, #tpu.memory_space<vmem>>, %arg8: memref<1x1x128xf32, #tpu.memory_space<vmem>>, %arg9: memref<9x32xf32, #tpu.memory_space<vmem>>, %arg10: memref<1x8x32xf32, #tpu.memory_space<vmem>>, %arg11: memref<8x32xf32, #tpu.memory_space<vmem>>, %arg12: memref<8x4xf32, #tpu.memory_space<vmem>>, %arg13: memref<8x4xf32, #tpu.memory_space<vmem>>) attributes {dimension_semantics = [#tpu.dimension_semantics<parallel>, #tpu.dimension_semantics<parallel>], iteration_bounds = array<i64: 2, 1>, scalar_prefetch = 0 : i64, scratch_operands = 3 : i64, tpu.core_type = #tpu.core_type<tc>, window_params = [{transform_indices = @transform_0, window_bounds = array<i64: 1, 8, 32>}, {pipeline_mode = #tpu.pipeline_mode<synchronous>, transform_indices = @transform_1, window_bounds = array<i64: 32, 32>}, {pipeline_mode = #tpu.pipeline_mode<synchronous>, transform_indices = @transform_2, window_bounds = array<i64: 32, 64>}, {pipeline_mode = #tpu.pipeline_mode<synchronous>, transform_indices = @transform_3, window_bounds = array<i64: 32, 32>}, {pipeline_mode = #tpu.pipeline_mode<synchronous>, transform_indices = @transform_4, window_bounds = array<i64: 1, 32, 128>}, {pipeline_mode = #tpu.pipeline_mode<synchronous>, transform_indices = @transform_5, window_bounds = array<i64: 1, 128, 32>}, {pipeline_mode = #tpu.pipeline_mode<synchronous>, transform_indices = @transform_6, window_bounds = array<i64: 1, 1, 128>}, {pipeline_mode = #tpu.pipeline_mode<synchronous>, transform_indices = @transform_7, window_bounds = array<i64: 9, 32>}, {transform_indices = @transform_8, window_bounds = array<i64: 1, 8, 32>}]} {
    %c0 = arith.constant 0 : index
    %c0_0 = arith.constant 0 : index
    %0 = vector.load %arg9[%c0, %c0_0] : memref<9x32xf32, #tpu.memory_space<vmem>>, vector<1x32xf32>
    %c1 = arith.constant 1 : index
    %c0_1 = arith.constant 0 : index
    %1 = vector.load %arg9[%c1, %c0_1] : memref<9x32xf32, #tpu.memory_space<vmem>>, vector<1x32xf32>
    %c8_i32 = arith.constant 8 : i32
    %2 = arith.muli %arg1, %c8_i32 : i32
    %3 = tpu.assume_multiple %2, 8 : i32
    %c0_2 = arith.constant 0 : index
    %4 = arith.index_cast %3 : i32 to index
    %c0_3 = arith.constant 0 : index
    %5 = vector.load %arg2[%c0_2, %4, %c0_3] : memref<1x8x32xf32, #tpu.memory_space<vmem>>, vector<1x8x32xf32>
    %6 = vector.shape_cast %5 : vector<1x8x32xf32> to vector<8x32xf32>
    %cst = arith.constant dense<0.000000e+00> : vector<8xf32>
    %7 = vector.multi_reduction <add>, %6, %cst [1] : vector<8x32xf32> to vector<8xf32>
    %8 = vector.shape_cast %7 : vector<8xf32> to vector<8x1xf32>
    %cst_4 = arith.constant 3.200000e+01 : f32
    %9 = vector.broadcast %cst_4 : f32 to vector<8x1xf32>
    %10 = arith.divf %8, %9 : vector<8x1xf32>
    %11 = vector.broadcast %10 : vector<8x1xf32> to vector<8x32xf32>
    %12 = arith.subf %6, %11 : vector<8x32xf32>
    %13 = arith.mulf %12, %12 : vector<8x32xf32>
    %cst_5 = arith.constant dense<0.000000e+00> : vector<8xf32>
    %14 = vector.multi_reduction <add>, %13, %cst_5 [1] : vector<8x32xf32> to vector<8xf32>
    %15 = vector.shape_cast %14 : vector<8xf32> to vector<8x1xf32>
    %cst_6 = arith.constant 3.200000e+01 : f32
    %16 = vector.broadcast %cst_6 : f32 to vector<8x1xf32>
    %17 = arith.divf %15, %16 : vector<8x1xf32>
    %18 = vector.broadcast %10 : vector<8x1xf32> to vector<8x32xf32>
    %19 = arith.subf %6, %18 : vector<8x32xf32>
    %cst_7 = arith.constant 9.99999974E-6 : f32
    %20 = vector.broadcast %cst_7 : f32 to vector<8x1xf32>
    %21 = arith.addf %17, %20 : vector<8x1xf32>
    %22 = math.rsqrt %21 : vector<8x1xf32>
    %23 = vector.broadcast %22 : vector<8x1xf32> to vector<8x32xf32>
    %24 = arith.mulf %19, %23 : vector<8x32xf32>
    %25 = vector.broadcast %0 : vector<1x32xf32> to vector<8x32xf32>
    %26 = arith.mulf %24, %25 : vector<8x32xf32>
    %27 = vector.broadcast %1 : vector<1x32xf32> to vector<8x32xf32>
    %28 = arith.addf %26, %27 : vector<8x32xf32>
    %29 = arith.truncf %28 : vector<8x32xf32> to vector<8x32xbf16>
    %c0_8 = arith.constant 0 : index
    %c0_9 = arith.constant 0 : index
    %30 = vector.load %arg3[%c0_8, %c0_9] : memref<32x32xbf16, #tpu.memory_space<vmem>>, vector<32x32xbf16>
    %cst_10 = arith.constant dense<0.000000e+00> : vector<8x32xf32>
    %31 = tpu.matmul %29, %30, %cst_10 {dimension_numbers = #tpu.dot_dimension_numbers<[1], [0], [0], [1], [0, 0, 1, 1], [], []>} : vector<8x32xbf16>, vector<32x32xbf16>, vector<8x32xf32> -> vector<8x32xf32>
    %c4 = arith.constant 4 : index
    %c0_11 = arith.constant 0 : index
    %32 = vector.load %arg9[%c4, %c0_11] : memref<9x32xf32, #tpu.memory_space<vmem>>, vector<1x32xf32>
    %33 = vector.broadcast %32 : vector<1x32xf32> to vector<8x32xf32>
    %34 = arith.addf %31, %33 : vector<8x32xf32>
    %35 = arith.truncf %34 : vector<8x32xf32> to vector<8x32xbf16>
    %cst_12 = arith.constant 0xFF800000 : f32
    %36 = vector.broadcast %cst_12 : f32 to vector<8x4xf32>
    %c0_13 = arith.constant 0 : index
    %c0_14 = arith.constant 0 : index
    %37 = vector.load %arg12[%c0_13, %c0_14] : memref<8x4xf32, #tpu.memory_space<vmem>>, vector<8x4xf32>
    tpu.vector_store %arg12[%c0_13, %c0_14], %36 {strides = array<i32>} : memref<8x4xf32, #tpu.memory_space<vmem>>, vector<8x4xf32>,
    %cst_15 = arith.constant 0.000000e+00 : f32
    %38 = vector.broadcast %cst_15 : f32 to vector<8x4xf32>
    %c0_16 = arith.constant 0 : index
    %c0_17 = arith.constant 0 : index
    %39 = vector.load %arg13[%c0_16, %c0_17] : memref<8x4xf32, #tpu.memory_space<vmem>>, vector<8x4xf32>
    tpu.vector_store %arg13[%c0_16, %c0_17], %38 {strides = array<i32>} : memref<8x4xf32, #tpu.memory_space<vmem>>, vector<8x4xf32>,
    %cst_18 = arith.constant 0.000000e+00 : f32
    %40 = vector.broadcast %cst_18 : f32 to vector<8x32xf32>
    %c0_19 = arith.constant 0 : index
    %c0_20 = arith.constant 0 : index
    %41 = vector.load %arg11[%c0_19, %c0_20] : memref<8x32xf32, #tpu.memory_space<vmem>>, vector<8x32xf32>
    tpu.vector_store %arg11[%c0_19, %c0_20], %40 {strides = array<i32>} : memref<8x32xf32, #tpu.memory_space<vmem>>, vector<8x32xf32>,
    %c5 = arith.constant 5 : index
    %c0_21 = arith.constant 0 : index
    %42 = vector.load %arg9[%c5, %c0_21] : memref<9x32xf32, #tpu.memory_space<vmem>>, vector<1x32xf32>
    %c6 = arith.constant 6 : index
    %c0_22 = arith.constant 0 : index
    %43 = vector.load %arg9[%c6, %c0_22] : memref<9x32xf32, #tpu.memory_space<vmem>>, vector<1x32xf32>
    %c0_i32 = arith.constant 0 : i32
    %c8_i32_23 = arith.constant 8 : i32
    %44 = arith.muli %c0_i32, %c8_i32_23 : i32
    %45 = tpu.assume_multiple %44, 8 : i32
    %c0_24 = arith.constant 0 : index
    %46 = arith.index_cast %45 : i32 to index
    %c0_25 = arith.constant 0 : index
    %47 = vector.load %arg2[%c0_24, %46, %c0_25] : memref<1x8x32xf32, #tpu.memory_space<vmem>>, vector<1x8x32xf32>
    %48 = vector.shape_cast %47 : vector<1x8x32xf32> to vector<8x32xf32>
    %cst_26 = arith.constant dense<0.000000e+00> : vector<8xf32>
    %49 = vector.multi_reduction <add>, %48, %cst_26 [1] : vector<8x32xf32> to vector<8xf32>
    %50 = vector.shape_cast %49 : vector<8xf32> to vector<8x1xf32>
    %cst_27 = arith.constant 3.200000e+01 : f32
    %51 = vector.broadcast %cst_27 : f32 to vector<8x1xf32>
    %52 = arith.divf %50, %51 : vector<8x1xf32>
    %53 = vector.broadcast %52 : vector<8x1xf32> to vector<8x32xf32>
    %54 = arith.subf %48, %53 : vector<8x32xf32>
    %55 = arith.mulf %54, %54 : vector<8x32xf32>
    %cst_28 = arith.constant dense<0.000000e+00> : vector<8xf32>
    %56 = vector.multi_reduction <add>, %55, %cst_28 [1] : vector<8x32xf32> to vector<8xf32>
    %57 = vector.shape_cast %56 : vector<8xf32> to vector<8x1xf32>
    %cst_29 = arith.constant 3.200000e+01 : f32
    %58 = vector.broadcast %cst_29 : f32 to vector<8x1xf32>
    %59 = arith.divf %57, %58 : vector<8x1xf32>
    %60 = vector.broadcast %52 : vector<8x1xf32> to vector<8x32xf32>
    %61 = arith.subf %48, %60 : vector<8x32xf32>
    %cst_30 = arith.constant 9.99999974E-6 : f32
    %62 = vector.broadcast %cst_30 : f32 to vector<8x1xf32>
    %63 = arith.addf %59, %62 : vector<8x1xf32>
    %64 = math.rsqrt %63 : vector<8x1xf32>
    %65 = vector.broadcast %64 : vector<8x1xf32> to vector<8x32xf32>
    %66 = arith.mulf %61, %65 : vector<8x32xf32>
    %67 = vector.broadcast %0 : vector<1x32xf32> to vector<8x32xf32>
    %68 = arith.mulf %66, %67 : vector<8x32xf32>
    %69 = vector.broadcast %1 : vector<1x32xf32> to vector<8x32xf32>
    %70 = arith.addf %68, %69 : vector<8x32xf32>
    %71 = arith.truncf %70 : vector<8x32xf32> to vector<8x32xbf16>
    %c0_31 = arith.constant 0 : index
    %c0_32 = arith.constant 0 : index
    %72 = vector.load %arg4[%c0_31, %c0_32] : memref<32x64xbf16, #tpu.memory_space<vmem>>, vector<32x64xbf16>
    %cst_33 = arith.constant dense<0.000000e+00> : vector<8x64xf32>
    %73 = tpu.matmul %71, %72, %cst_33 {dimension_numbers = #tpu.dot_dimension_numbers<[1], [0], [0], [1], [0, 0, 1, 1], [], []>} : vector<8x32xbf16>, vector<32x64xbf16>, vector<8x64xf32> -> vector<8x64xf32>
    %74 = vector.extract_strided_slice %73 {offsets = [0, 0], sizes = [8, 32], strides = [1, 1]} : vector<8x64xf32> to vector<8x32xf32>
    %75 = vector.broadcast %42 : vector<1x32xf32> to vector<8x32xf32>
    %76 = arith.addf %74, %75 : vector<8x32xf32>
    %77 = arith.truncf %76 : vector<8x32xf32> to vector<8x32xbf16>
    %78 = vector.extract_strided_slice %73 {offsets = [0, 32], sizes = [8, 32], strides = [1, 1]} : vector<8x64xf32> to vector<8x32xf32>
    %79 = vector.broadcast %43 : vector<1x32xf32> to vector<8x32xf32>
    %80 = arith.addf %78, %79 : vector<8x32xf32>
    %81 = arith.truncf %80 : vector<8x32xf32> to vector<8x32xbf16>
    %82 = vector.extract_strided_slice %35 {offsets = [0, 0], sizes = [8, 8], strides = [1, 1]} : vector<8x32xbf16> to vector<8x8xbf16>
    %83 = vector.extract_strided_slice %77 {offsets = [0, 0], sizes = [8, 8], strides = [1, 1]} : vector<8x32xbf16> to vector<8x8xbf16>
    %cst_34 = arith.constant dense<0.000000e+00> : vector<8x8xf32>
    %84 = tpu.matmul %82, %83, %cst_34 {dimension_numbers = #tpu.dot_dimension_numbers<[1], [1], [0], [0], [0, 0, 1, 0], [], []>} : vector<8x8xbf16>, vector<8x8xbf16>, vector<8x8xf32> -> vector<8x8xf32>
    %c0_35 = arith.constant 0 : index
    %c0_36 = arith.constant 0 : index
    %85 = vector.load %arg12[%c0_35, %c0_36] : memref<8x4xf32, #tpu.memory_space<vmem>>, vector<8x1xf32>
    %cst_37 = arith.constant dense<0xFF800000> : vector<8xf32>
    %86 = vector.multi_reduction <maximumf>, %84, %cst_37 [1] : vector<8x8xf32> to vector<8xf32>
    %87 = vector.shape_cast %86 : vector<8xf32> to vector<8x1xf32>
    %88 = arith.maximumf %85, %87 : vector<8x1xf32>
    %89 = arith.subf %85, %88 : vector<8x1xf32>
    %90 = math.exp %89 : vector<8x1xf32>
    %91 = vector.broadcast %88 : vector<8x1xf32> to vector<8x8xf32>
    %92 = arith.subf %84, %91 : vector<8x8xf32>
    %93 = math.exp %92 : vector<8x8xf32>
    %c0_38 = arith.constant 0 : index
    %c0_39 = arith.constant 0 : index
    %94 = vector.load %arg13[%c0_38, %c0_39] : memref<8x4xf32, #tpu.memory_space<vmem>>, vector<8x1xf32>
    %95 = arith.mulf %90, %94 : vector<8x1xf32>
    %cst_40 = arith.constant dense<0.000000e+00> : vector<8xf32>
    %96 = vector.multi_reduction <add>, %93, %cst_40 [1] : vector<8x8xf32> to vector<8xf32>
    %97 = vector.shape_cast %96 : vector<8xf32> to vector<8x1xf32>
    %98 = arith.addf %95, %97 : vector<8x1xf32>
    %c0_41 = arith.constant 0 : index
    %c0_42 = arith.constant 0 : index
    %99 = vector.load %arg13[%c0_41, %c0_42] : memref<8x4xf32, #tpu.memory_space<vmem>>, vector<8x1xf32>
    tpu.vector_store %arg13[%c0_41, %c0_42], %98 {strides = array<i32>} : memref<8x4xf32, #tpu.memory_space<vmem>>, vector<8x1xf32>,
    %c0_43 = arith.constant 0 : index
    %c0_44 = arith.constant 0 : index
    %100 = vector.load %arg11[%c0_43, %c0_44] : memref<8x32xf32, #tpu.memory_space<vmem>>, vector<8x8xf32>
    %101 = vector.broadcast %90 : vector<8x1xf32> to vector<8x8xf32>
    %102 = arith.mulf %101, %100 : vector<8x8xf32>
    %103 = arith.truncf %93 : vector<8x8xf32> to vector<8x8xbf16>
    %104 = vector.extract_strided_slice %81 {offsets = [0, 0], sizes = [8, 8], strides = [1, 1]} : vector<8x32xbf16> to vector<8x8xbf16>
    %cst_45 = arith.constant dense<0.000000e+00> : vector<8x8xf32>
    %105 = tpu.matmul %103, %104, %cst_45 {dimension_numbers = #tpu.dot_dimension_numbers<[1], [0], [0], [1], [0, 0, 1, 1], [], []>} : vector<8x8xbf16>, vector<8x8xbf16>, vector<8x8xf32> -> vector<8x8xf32>
    %106 = arith.addf %102, %105 : vector<8x8xf32>
    %c0_46 = arith.constant 0 : index
    %c0_47 = arith.constant 0 : index
    %107 = vector.load %arg11[%c0_46, %c0_47] : memref<8x32xf32, #tpu.memory_space<vmem>>, vector<8x8xf32>
    tpu.vector_store %arg11[%c0_46, %c0_47], %106 {strides = array<i32>} : memref<8x32xf32, #tpu.memory_space<vmem>>, vector<8x8xf32>,
    %c0_48 = arith.constant 0 : index
    %c0_49 = arith.constant 0 : index
    %108 = vector.load %arg12[%c0_48, %c0_49] : memref<8x4xf32, #tpu.memory_space<vmem>>, vector<8x1xf32>
    tpu.vector_store %arg12[%c0_48, %c0_49], %88 {strides = array<i32>} : memref<8x4xf32, #tpu.memory_space<vmem>>, vector<8x1xf32>,
    %109 = vector.extract_strided_slice %35 {offsets = [0, 8], sizes = [8, 8], strides = [1, 1]} : vector<8x32xbf16> to vector<8x8xbf16>
    %110 = vector.extract_strided_slice %77 {offsets = [0, 8], sizes = [8, 8], strides = [1, 1]} : vector<8x32xbf16> to vector<8x8xbf16>
    %cst_50 = arith.constant dense<0.000000e+00> : vector<8x8xf32>
    %111 = tpu.matmul %109, %110, %cst_50 {dimension_numbers = #tpu.dot_dimension_numbers<[1], [1], [0], [0], [0, 0, 1, 0], [], []>} : vector<8x8xbf16>, vector<8x8xbf16>, vector<8x8xf32> -> vector<8x8xf32>
    %c0_51 = arith.constant 0 : index
    %c1_52 = arith.constant 1 : index
    %112 = vector.load %arg12[%c0_51, %c1_52] : memref<8x4xf32, #tpu.memory_space<vmem>>, vector<8x1xf32>
    %cst_53 = arith.constant dense<0xFF800000> : vector<8xf32>
    %113 = vector.multi_reduction <maximumf>, %111, %cst_53 [1] : vector<8x8xf32> to vector<8xf32>
    %114 = vector.shape_cast %113 : vector<8xf32> to vector<8x1xf32>
    %115 = arith.maximumf %112, %114 : vector<8x1xf32>
    %116 = arith.subf %112, %115 : vector<8x1xf32>
    %117 = math.exp %116 : vector<8x1xf32>
    %118 = vector.broadcast %115 : vector<8x1xf32> to vector<8x8xf32>
    %119 = arith.subf %111, %118 : vector<8x8xf32>
    %120 = math.exp %119 : vector<8x8xf32>
    %c0_54 = arith.constant 0 : index
    %c1_55 = arith.constant 1 : index
    %121 = vector.load %arg13[%c0_54, %c1_55] : memref<8x4xf32, #tpu.memory_space<vmem>>, vector<8x1xf32>
    %122 = arith.mulf %117, %121 : vector<8x1xf32>
    %cst_56 = arith.constant dense<0.000000e+00> : vector<8xf32>
    %123 = vector.multi_reduction <add>, %120, %cst_56 [1] : vector<8x8xf32> to vector<8xf32>
    %124 = vector.shape_cast %123 : vector<8xf32> to vector<8x1xf32>
    %125 = arith.addf %122, %124 : vector<8x1xf32>
    %c0_57 = arith.constant 0 : index
    %c1_58 = arith.constant 1 : index
    %126 = vector.load %arg13[%c0_57, %c1_58] : memref<8x4xf32, #tpu.memory_space<vmem>>, vector<8x1xf32>
    tpu.vector_store %arg13[%c0_57, %c1_58], %125 {strides = array<i32>} : memref<8x4xf32, #tpu.memory_space<vmem>>, vector<8x1xf32>,
    %c0_59 = arith.constant 0 : index
    %c8 = arith.constant 8 : index
    %127 = vector.load %arg11[%c0_59, %c8] : memref<8x32xf32, #tpu.memory_space<vmem>>, vector<8x8xf32>
    %128 = vector.broadcast %117 : vector<8x1xf32> to vector<8x8xf32>
    %129 = arith.mulf %128, %127 : vector<8x8xf32>
    %130 = arith.truncf %120 : vector<8x8xf32> to vector<8x8xbf16>
    %131 = vector.extract_strided_slice %81 {offsets = [0, 8], sizes = [8, 8], strides = [1, 1]} : vector<8x32xbf16> to vector<8x8xbf16>
    %cst_60 = arith.constant dense<0.000000e+00> : vector<8x8xf32>
    %132 = tpu.matmul %130, %131, %cst_60 {dimension_numbers = #tpu.dot_dimension_numbers<[1], [0], [0], [1], [0, 0, 1, 1], [], []>} : vector<8x8xbf16>, vector<8x8xbf16>, vector<8x8xf32> -> vector<8x8xf32>
    %133 = arith.addf %129, %132 : vector<8x8xf32>
    %c0_61 = arith.constant 0 : index
    %c8_62 = arith.constant 8 : index
    %134 = vector.load %arg11[%c0_61, %c8_62] : memref<8x32xf32, #tpu.memory_space<vmem>>, vector<8x8xf32>
    tpu.vector_store %arg11[%c0_61, %c8_62], %133 {strides = array<i32>} : memref<8x32xf32, #tpu.memory_space<vmem>>, vector<8x8xf32>,
    %c0_63 = arith.constant 0 : index
    %c1_64 = arith.constant 1 : index
    %135 = vector.load %arg12[%c0_63, %c1_64] : memref<8x4xf32, #tpu.memory_space<vmem>>, vector<8x1xf32>
    tpu.vector_store %arg12[%c0_63, %c1_64], %115 {strides = array<i32>} : memref<8x4xf32, #tpu.memory_space<vmem>>, vector<8x1xf32>,
    %136 = vector.extract_strided_slice %35 {offsets = [0, 16], sizes = [8, 8], strides = [1, 1]} : vector<8x32xbf16> to vector<8x8xbf16>
    %137 = vector.extract_strided_slice %77 {offsets = [0, 16], sizes = [8, 8], strides = [1, 1]} : vector<8x32xbf16> to vector<8x8xbf16>
    %cst_65 = arith.constant dense<0.000000e+00> : vector<8x8xf32>
    %138 = tpu.matmul %136, %137, %cst_65 {dimension_numbers = #tpu.dot_dimension_numbers<[1], [1], [0], [0], [0, 0, 1, 0], [], []>} : vector<8x8xbf16>, vector<8x8xbf16>, vector<8x8xf32> -> vector<8x8xf32>
    %c0_66 = arith.constant 0 : index
    %c2 = arith.constant 2 : index
    %139 = vector.load %arg12[%c0_66, %c2] : memref<8x4xf32, #tpu.memory_space<vmem>>, vector<8x1xf32>
    %cst_67 = arith.constant dense<0xFF800000> : vector<8xf32>
    %140 = vector.multi_reduction <maximumf>, %138, %cst_67 [1] : vector<8x8xf32> to vector<8xf32>
    %141 = vector.shape_cast %140 : vector<8xf32> to vector<8x1xf32>
    %142 = arith.maximumf %139, %141 : vector<8x1xf32>
    %143 = arith.subf %139, %142 : vector<8x1xf32>
    %144 = math.exp %143 : vector<8x1xf32>
    %145 = vector.broadcast %142 : vector<8x1xf32> to vector<8x8xf32>
    %146 = arith.subf %138, %145 : vector<8x8xf32>
    %147 = math.exp %146 : vector<8x8xf32>
    %c0_68 = arith.constant 0 : index
    %c2_69 = arith.constant 2 : index
    %148 = vector.load %arg13[%c0_68, %c2_69] : memref<8x4xf32, #tpu.memory_space<vmem>>, vector<8x1xf32>
    %149 = arith.mulf %144, %148 : vector<8x1xf32>
    %cst_70 = arith.constant dense<0.000000e+00> : vector<8xf32>
    %150 = vector.multi_reduction <add>, %147, %cst_70 [1] : vector<8x8xf32> to vector<8xf32>
    %151 = vector.shape_cast %150 : vector<8xf32> to vector<8x1xf32>
    %152 = arith.addf %149, %151 : vector<8x1xf32>
    %c0_71 = arith.constant 0 : index
    %c2_72 = arith.constant 2 : index
    %153 = vector.load %arg13[%c0_71, %c2_72] : memref<8x4xf32, #tpu.memory_space<vmem>>, vector<8x1xf32>
    tpu.vector_store %arg13[%c0_71, %c2_72], %152 {strides = array<i32>} : memref<8x4xf32, #tpu.memory_space<vmem>>, vector<8x1xf32>,
    %c0_73 = arith.constant 0 : index
    %c16 = arith.constant 16 : index
    %154 = vector.load %arg11[%c0_73, %c16] : memref<8x32xf32, #tpu.memory_space<vmem>>, vector<8x8xf32>
    %155 = vector.broadcast %144 : vector<8x1xf32> to vector<8x8xf32>
    %156 = arith.mulf %155, %154 : vector<8x8xf32>
    %157 = arith.truncf %147 : vector<8x8xf32> to vector<8x8xbf16>
    %158 = vector.extract_strided_slice %81 {offsets = [0, 16], sizes = [8, 8], strides = [1, 1]} : vector<8x32xbf16> to vector<8x8xbf16>
    %cst_74 = arith.constant dense<0.000000e+00> : vector<8x8xf32>
    %159 = tpu.matmul %157, %158, %cst_74 {dimension_numbers = #tpu.dot_dimension_numbers<[1], [0], [0], [1], [0, 0, 1, 1], [], []>} : vector<8x8xbf16>, vector<8x8xbf16>, vector<8x8xf32> -> vector<8x8xf32>
    %160 = arith.addf %156, %159 : vector<8x8xf32>
    %c0_75 = arith.constant 0 : index
    %c16_76 = arith.constant 16 : index
    %161 = vector.load %arg11[%c0_75, %c16_76] : memref<8x32xf32, #tpu.memory_space<vmem>>, vector<8x8xf32>
    tpu.vector_store %arg11[%c0_75, %c16_76], %160 {strides = array<i32>} : memref<8x32xf32, #tpu.memory_space<vmem>>, vector<8x8xf32>,
    %c0_77 = arith.constant 0 : index
    %c2_78 = arith.constant 2 : index
    %162 = vector.load %arg12[%c0_77, %c2_78] : memref<8x4xf32, #tpu.memory_space<vmem>>, vector<8x1xf32>
    tpu.vector_store %arg12[%c0_77, %c2_78], %142 {strides = array<i32>} : memref<8x4xf32, #tpu.memory_space<vmem>>, vector<8x1xf32>,
    %163 = vector.extract_strided_slice %35 {offsets = [0, 24], sizes = [8, 8], strides = [1, 1]} : vector<8x32xbf16> to vector<8x8xbf16>
    %164 = vector.extract_strided_slice %77 {offsets = [0, 24], sizes = [8, 8], strides = [1, 1]} : vector<8x32xbf16> to vector<8x8xbf16>
    %cst_79 = arith.constant dense<0.000000e+00> : vector<8x8xf32>
    %165 = tpu.matmul %163, %164, %cst_79 {dimension_numbers = #tpu.dot_dimension_numbers<[1], [1], [0], [0], [0, 0, 1, 0], [], []>} : vector<8x8xbf16>, vector<8x8xbf16>, vector<8x8xf32> -> vector<8x8xf32>
    %c0_80 = arith.constant 0 : index
    %c3 = arith.constant 3 : index
    %166 = vector.load %arg12[%c0_80, %c3] : memref<8x4xf32, #tpu.memory_space<vmem>>, vector<8x1xf32>
    %cst_81 = arith.constant dense<0xFF800000> : vector<8xf32>
    %167 = vector.multi_reduction <maximumf>, %165, %cst_81 [1] : vector<8x8xf32> to vector<8xf32>
    %168 = vector.shape_cast %167 : vector<8xf32> to vector<8x1xf32>
    %169 = arith.maximumf %166, %168 : vector<8x1xf32>
    %170 = arith.subf %166, %169 : vector<8x1xf32>
    %171 = math.exp %170 : vector<8x1xf32>
    %172 = vector.broadcast %169 : vector<8x1xf32> to vector<8x8xf32>
    %173 = arith.subf %165, %172 : vector<8x8xf32>
    %174 = math.exp %173 : vector<8x8xf32>
    %c0_82 = arith.constant 0 : index
    %c3_83 = arith.constant 3 : index
    %175 = vector.load %arg13[%c0_82, %c3_83] : memref<8x4xf32, #tpu.memory_space<vmem>>, vector<8x1xf32>
    %176 = arith.mulf %171, %175 : vector<8x1xf32>
    %cst_84 = arith.constant dense<0.000000e+00> : vector<8xf32>
    %177 = vector.multi_reduction <add>, %174, %cst_84 [1] : vector<8x8xf32> to vector<8xf32>
    %178 = vector.shape_cast %177 : vector<8xf32> to vector<8x1xf32>
    %179 = arith.addf %176, %178 : vector<8x1xf32>
    %c0_85 = arith.constant 0 : index
    %c3_86 = arith.constant 3 : index
    %180 = vector.load %arg13[%c0_85, %c3_86] : memref<8x4xf32, #tpu.memory_space<vmem>>, vector<8x1xf32>
    tpu.vector_store %arg13[%c0_85, %c3_86], %179 {strides = array<i32>} : memref<8x4xf32, #tpu.memory_space<vmem>>, vector<8x1xf32>,
    %c0_87 = arith.constant 0 : index
    %c24 = arith.constant 24 : index
    %181 = vector.load %arg11[%c0_87, %c24] : memref<8x32xf32, #tpu.memory_space<vmem>>, vector<8x8xf32>
    %182 = vector.broadcast %171 : vector<8x1xf32> to vector<8x8xf32>
    %183 = arith.mulf %182, %181 : vector<8x8xf32>
    %184 = arith.truncf %174 : vector<8x8xf32> to vector<8x8xbf16>
    %185 = vector.extract_strided_slice %81 {offsets = [0, 24], sizes = [8, 8], strides = [1, 1]} : vector<8x32xbf16> to vector<8x8xbf16>
    %cst_88 = arith.constant dense<0.000000e+00> : vector<8x8xf32>
    %186 = tpu.matmul %184, %185, %cst_88 {dimension_numbers = #tpu.dot_dimension_numbers<[1], [0], [0], [1], [0, 0, 1, 1], [], []>} : vector<8x8xbf16>, vector<8x8xbf16>, vector<8x8xf32> -> vector<8x8xf32>
    %187 = arith.addf %183, %186 : vector<8x8xf32>
    %c0_89 = arith.constant 0 : index
    %c24_90 = arith.constant 24 : index
    %188 = vector.load %arg11[%c0_89, %c24_90] : memref<8x32xf32, #tpu.memory_space<vmem>>, vector<8x8xf32>
    tpu.vector_store %arg11[%c0_89, %c24_90], %187 {strides = array<i32>} : memref<8x32xf32, #tpu.memory_space<vmem>>, vector<8x8xf32>,
    %c0_91 = arith.constant 0 : index
    %c3_92 = arith.constant 3 : index
    %189 = vector.load %arg12[%c0_91, %c3_92] : memref<8x4xf32, #tpu.memory_space<vmem>>, vector<8x1xf32>
    tpu.vector_store %arg12[%c0_91, %c3_92], %169 {strides = array<i32>} : memref<8x4xf32, #tpu.memory_space<vmem>>, vector<8x1xf32>,
    %c1_i32 = arith.constant 1 : i32
    %c0_93 = arith.constant 0 : index
    %c0_94 = arith.constant 0 : index
    %190 = vector.load %arg13[%c0_93, %c0_94] : memref<8x4xf32, #tpu.memory_space<vmem>>, vector<8x1xf32>
    %191 = tpu.reciprocal %190 {approx = true} : vector<8x1xf32> -> vector<8x1xf32>
    %c0_95 = arith.constant 0 : index
    %c0_96 = arith.constant 0 : index
    %192 = vector.load %arg11[%c0_95, %c0_96] : memref<8x32xf32, #tpu.memory_space<vmem>>, vector<8x8xf32>
    %193 = vector.broadcast %191 : vector<8x1xf32> to vector<8x8xf32>
    %194 = arith.mulf %192, %193 : vector<8x8xf32>
    %c0_97 = arith.constant 0 : index
    %c0_98 = arith.constant 0 : index
    %195 = vector.load %arg11[%c0_97, %c0_98] : memref<8x32xf32, #tpu.memory_space<vmem>>, vector<8x8xf32>
    tpu.vector_store %arg11[%c0_97, %c0_98], %194 {strides = array<i32>} : memref<8x32xf32, #tpu.memory_space<vmem>>, vector<8x8xf32>,
    %c0_99 = arith.constant 0 : index
    %c1_100 = arith.constant 1 : index
    %196 = vector.load %arg13[%c0_99, %c1_100] : memref<8x4xf32, #tpu.memory_space<vmem>>, vector<8x1xf32>
    %197 = tpu.reciprocal %196 {approx = true} : vector<8x1xf32> -> vector<8x1xf32>
    %c0_101 = arith.constant 0 : index
    %c8_102 = arith.constant 8 : index
    %198 = vector.load %arg11[%c0_101, %c8_102] : memref<8x32xf32, #tpu.memory_space<vmem>>, vector<8x8xf32>
    %199 = vector.broadcast %197 : vector<8x1xf32> to vector<8x8xf32>
    %200 = arith.mulf %198, %199 : vector<8x8xf32>
    %c0_103 = arith.constant 0 : index
    %c8_104 = arith.constant 8 : index
    %201 = vector.load %arg11[%c0_103, %c8_104] : memref<8x32xf32, #tpu.memory_space<vmem>>, vector<8x8xf32>
    tpu.vector_store %arg11[%c0_103, %c8_104], %200 {strides = array<i32>} : memref<8x32xf32, #tpu.memory_space<vmem>>, vector<8x8xf32>,
    %c0_105 = arith.constant 0 : index
    %c2_106 = arith.constant 2 : index
    %202 = vector.load %arg13[%c0_105, %c2_106] : memref<8x4xf32, #tpu.memory_space<vmem>>, vector<8x1xf32>
    %203 = tpu.reciprocal %202 {approx = true} : vector<8x1xf32> -> vector<8x1xf32>
    %c0_107 = arith.constant 0 : index
    %c16_108 = arith.constant 16 : index
    %204 = vector.load %arg11[%c0_107, %c16_108] : memref<8x32xf32, #tpu.memory_space<vmem>>, vector<8x8xf32>
    %205 = vector.broadcast %203 : vector<8x1xf32> to vector<8x8xf32>
    %206 = arith.mulf %204, %205 : vector<8x8xf32>
    %c0_109 = arith.constant 0 : index
    %c16_110 = arith.constant 16 : index
    %207 = vector.load %arg11[%c0_109, %c16_110] : memref<8x32xf32, #tpu.memory_space<vmem>>, vector<8x8xf32>
    tpu.vector_store %arg11[%c0_109, %c16_110], %206 {strides = array<i32>} : memref<8x32xf32, #tpu.memory_space<vmem>>, vector<8x8xf32>,
    %c0_111 = arith.constant 0 : index
    %c3_112 = arith.constant 3 : index
    %208 = vector.load %arg13[%c0_111, %c3_112] : memref<8x4xf32, #tpu.memory_space<vmem>>, vector<8x1xf32>
    %209 = tpu.reciprocal %208 {approx = true} : vector<8x1xf32> -> vector<8x1xf32>
    %c0_113 = arith.constant 0 : index
    %c24_114 = arith.constant 24 : index
    %210 = vector.load %arg11[%c0_113, %c24_114] : memref<8x32xf32, #tpu.memory_space<vmem>>, vector<8x8xf32>
    %211 = vector.broadcast %209 : vector<8x1xf32> to vector<8x8xf32>
    %212 = arith.mulf %210, %211 : vector<8x8xf32>
    %c0_115 = arith.constant 0 : index
    %c24_116 = arith.constant 24 : index
    %213 = vector.load %arg11[%c0_115, %c24_116] : memref<8x32xf32, #tpu.memory_space<vmem>>, vector<8x8xf32>
    tpu.vector_store %arg11[%c0_115, %c24_116], %212 {strides = array<i32>} : memref<8x32xf32, #tpu.memory_space<vmem>>, vector<8x8xf32>,
    %c0_117 = arith.constant 0 : index
    %c0_118 = arith.constant 0 : index
    %214 = vector.load %arg11[%c0_117, %c0_118] : memref<8x32xf32, #tpu.memory_space<vmem>>, vector<8x32xf32>
    %215 = arith.truncf %214 : vector<8x32xf32> to vector<8x32xbf16>
    %c0_119 = arith.constant 0 : index
    %c0_120 = arith.constant 0 : index
    %216 = vector.load %arg5[%c0_119, %c0_120] : memref<32x32xbf16, #tpu.memory_space<vmem>>, vector<32x32xbf16>
    %cst_121 = arith.constant dense<0.000000e+00> : vector<8x32xf32>
    %217 = tpu.matmul %215, %216, %cst_121 {dimension_numbers = #tpu.dot_dimension_numbers<[1], [0], [0], [1], [0, 0, 1, 1], [], []>} : vector<8x32xbf16>, vector<32x32xbf16>, vector<8x32xf32> -> vector<8x32xf32>
    %c7 = arith.constant 7 : index
    %c0_122 = arith.constant 0 : index
    %218 = vector.load %arg9[%c7, %c0_122] : memref<9x32xf32, #tpu.memory_space<vmem>>, vector<1x32xf32>
    %219 = vector.broadcast %218 : vector<1x32xf32> to vector<8x32xf32>
    %220 = arith.addf %217, %219 : vector<8x32xf32>
    %221 = arith.addf %6, %220 : vector<8x32xf32>
    %c2_123 = arith.constant 2 : index
    %c0_124 = arith.constant 0 : index
    %222 = vector.load %arg9[%c2_123, %c0_124] : memref<9x32xf32, #tpu.memory_space<vmem>>, vector<1x32xf32>
    %c3_125 = arith.constant 3 : index
    %c0_126 = arith.constant 0 : index
    %223 = vector.load %arg9[%c3_125, %c0_126] : memref<9x32xf32, #tpu.memory_space<vmem>>, vector<1x32xf32>
    %cst_127 = arith.constant dense<0.000000e+00> : vector<8xf32>
    %224 = vector.multi_reduction <add>, %221, %cst_127 [1] : vector<8x32xf32> to vector<8xf32>
    %225 = vector.shape_cast %224 : vector<8xf32> to vector<8x1xf32>
    %cst_128 = arith.constant 3.200000e+01 : f32
    %226 = vector.broadcast %cst_128 : f32 to vector<8x1xf32>
    %227 = arith.divf %225, %226 : vector<8x1xf32>
    %228 = vector.broadcast %227 : vector<8x1xf32> to vector<8x32xf32>
    %229 = arith.subf %221, %228 : vector<8x32xf32>
    %230 = arith.mulf %229, %229 : vector<8x32xf32>
    %cst_129 = arith.constant dense<0.000000e+00> : vector<8xf32>
    %231 = vector.multi_reduction <add>, %230, %cst_129 [1] : vector<8x32xf32> to vector<8xf32>
    %232 = vector.shape_cast %231 : vector<8xf32> to vector<8x1xf32>
    %cst_130 = arith.constant 3.200000e+01 : f32
    %233 = vector.broadcast %cst_130 : f32 to vector<8x1xf32>
    %234 = arith.divf %232, %233 : vector<8x1xf32>
    %235 = vector.broadcast %227 : vector<8x1xf32> to vector<8x32xf32>
    %236 = arith.subf %221, %235 : vector<8x32xf32>
    %cst_131 = arith.constant 9.99999974E-6 : f32
    %237 = vector.broadcast %cst_131 : f32 to vector<8x1xf32>
    %238 = arith.addf %234, %237 : vector<8x1xf32>
    %239 = math.rsqrt %238 : vector<8x1xf32>
    %240 = vector.broadcast %239 : vector<8x1xf32> to vector<8x32xf32>
    %241 = arith.mulf %236, %240 : vector<8x32xf32>
    %242 = vector.broadcast %222 : vector<1x32xf32> to vector<8x32xf32>
    %243 = arith.mulf %241, %242 : vector<8x32xf32>
    %244 = vector.broadcast %223 : vector<1x32xf32> to vector<8x32xf32>
    %245 = arith.addf %243, %244 : vector<8x32xf32>
    %246 = arith.truncf %245 : vector<8x32xf32> to vector<8x32xbf16>
    %cst_132 = arith.constant 0.000000e+00 : f32
    %247 = vector.broadcast %cst_132 : f32 to vector<8x32xf32>
    %c0_133 = arith.constant 0 : index
    %c0_134 = arith.constant 0 : index
    %248 = vector.load %arg11[%c0_133, %c0_134] : memref<8x32xf32, #tpu.memory_space<vmem>>, vector<8x32xf32>
    tpu.vector_store %arg11[%c0_133, %c0_134], %247 {strides = array<i32>} : memref<8x32xf32, #tpu.memory_space<vmem>>, vector<8x32xf32>,
    %c0_i32_135 = arith.constant 0 : i32
    %249 = arith.index_cast %c0_i32_135 : i32 to index
    %c0_136 = arith.constant 0 : index
    %c0_137 = arith.constant 0 : index
    %250 = vector.load %arg6[%249, %c0_136, %c0_137] : memref<1x32x128xbf16, #tpu.memory_space<vmem>>, vector<1x32x128xbf16>
    %251 = vector.shape_cast %250 : vector<1x32x128xbf16> to vector<32x128xbf16>
    %cst_138 = arith.constant dense<0.000000e+00> : vector<8x128xf32>
    %252 = tpu.matmul %246, %251, %cst_138 {dimension_numbers = #tpu.dot_dimension_numbers<[1], [0], [0], [1], [0, 0, 1, 1], [], []>} : vector<8x32xbf16>, vector<32x128xbf16>, vector<8x128xf32> -> vector<8x128xf32>
    %253 = arith.index_cast %c0_i32_135 : i32 to index
    %c0_139 = arith.constant 0 : index
    %c0_140 = arith.constant 0 : index
    %254 = vector.load %arg8[%253, %c0_139, %c0_140] : memref<1x1x128xf32, #tpu.memory_space<vmem>>, vector<1x1x128xf32>
    %255 = vector.shape_cast %254 : vector<1x1x128xf32> to vector<1x128xf32>
    %256 = vector.broadcast %255 : vector<1x128xf32> to vector<8x128xf32>
    %257 = arith.addf %252, %256 : vector<8x128xf32>
    %cst_141 = arith.constant 5.000000e-01 : f32
    %258 = vector.broadcast %cst_141 : f32 to vector<8x128xf32>
    %259 = arith.mulf %258, %257 : vector<8x128xf32>
    %cst_142 = arith.constant 0.707106769 : f32
    %260 = vector.broadcast %cst_142 : f32 to vector<8x128xf32>
    %261 = arith.mulf %257, %260 : vector<8x128xf32>
    %262 = math.erf %261 : vector<8x128xf32>
    %cst_143 = arith.constant 1.000000e+00 : f32
    %263 = vector.broadcast %cst_143 : f32 to vector<8x128xf32>
    %264 = arith.addf %263, %262 : vector<8x128xf32>
    %265 = arith.mulf %259, %264 : vector<8x128xf32>
    %c0_144 = arith.constant 0 : index
    %c0_145 = arith.constant 0 : index
    %266 = vector.load %arg11[%c0_144, %c0_145] : memref<8x32xf32, #tpu.memory_space<vmem>>, vector<8x32xf32>
    %267 = arith.truncf %265 : vector<8x128xf32> to vector<8x128xbf16>
    %268 = arith.index_cast %c0_i32_135 : i32 to index
    %c0_146 = arith.constant 0 : index
    %c0_147 = arith.constant 0 : index
    %269 = vector.load %arg7[%268, %c0_146, %c0_147] : memref<1x128x32xbf16, #tpu.memory_space<vmem>>, vector<1x128x32xbf16>
    %270 = vector.shape_cast %269 : vector<1x128x32xbf16> to vector<128x32xbf16>
    %cst_148 = arith.constant dense<0.000000e+00> : vector<8x32xf32>
    %271 = tpu.matmul %267, %270, %cst_148 {dimension_numbers = #tpu.dot_dimension_numbers<[1], [0], [0], [1], [0, 0, 1, 1], [], []>} : vector<8x128xbf16>, vector<128x32xbf16>, vector<8x32xf32> -> vector<8x32xf32>
    %272 = arith.addf %266, %271 : vector<8x32xf32>
    %c0_149 = arith.constant 0 : index
    %c0_150 = arith.constant 0 : index
    %273 = vector.load %arg11[%c0_149, %c0_150] : memref<8x32xf32, #tpu.memory_space<vmem>>, vector<8x32xf32>
    tpu.vector_store %arg11[%c0_149, %c0_150], %272 {strides = array<i32>} : memref<8x32xf32, #tpu.memory_space<vmem>>, vector<8x32xf32>,
    %c1_i32_151 = arith.constant 1 : i32
    %c0_152 = arith.constant 0 : index
    %c0_153 = arith.constant 0 : index
    %274 = vector.load %arg11[%c0_152, %c0_153] : memref<8x32xf32, #tpu.memory_space<vmem>>, vector<8x32xf32>
    %275 = arith.addf %221, %274 : vector<8x32xf32>
    %c8_154 = arith.constant 8 : index
    %c0_155 = arith.constant 0 : index
    %276 = vector.load %arg9[%c8_154, %c0_155] : memref<9x32xf32, #tpu.memory_space<vmem>>, vector<1x32xf32>
    %277 = vector.broadcast %276 : vector<1x32xf32> to vector<8x32xf32>
    %278 = arith.addf %275, %277 : vector<8x32xf32>
    %c0_156 = arith.constant 0 : index
    %c0_157 = arith.constant 0 : index
    %c0_158 = arith.constant 0 : index
    %279 = vector.load %arg10[%c0_156, %c0_157, %c0_158] : memref<1x8x32xf32, #tpu.memory_space<vmem>>, vector<1x8x32xf32>
    %280 = vector.shape_cast %279 : vector<1x8x32xf32> to vector<8x32xf32>
    %281 = vector.shape_cast %278 : vector<8x32xf32> to vector<1x8x32xf32>
    tpu.vector_store %arg10[%c0_156, %c0_157, %c0_158], %281 {strides = array<i32>} : memref<1x8x32xf32, #tpu.memory_space<vmem>>, vector<1x8x32xf32>,
    return
  }
  func.func @transform_0(%arg0: i32, %arg1: i32) -> (i32, i32, i32) {
    %c0_i32 = arith.constant 0 : i32
    %c0_i32_0 = arith.constant 0 : i32
    %c0_i32_1 = arith.constant 0 : i32
    return %arg0, %c0_i32, %c0_i32_0 : i32, i32, i32
  }
  func.func @transform_1(%arg0: i32, %arg1: i32) -> (i32, i32) {
    %c0_i32 = arith.constant 0 : i32
    %c0_i32_0 = arith.constant 0 : i32
    %c0_i32_1 = arith.constant 0 : i32
    return %c0_i32, %c0_i32_0 : i32, i32
  }
  func.func @transform_2(%arg0: i32, %arg1: i32) -> (i32, i32) {
    %c0_i32 = arith.constant 0 : i32
    %c0_i32_0 = arith.constant 0 : i32
    %c0_i32_1 = arith.constant 0 : i32
    return %c0_i32, %c0_i32_0 : i32, i32
  }
  func.func @transform_3(%arg0: i32, %arg1: i32) -> (i32, i32) {
    %c0_i32 = arith.constant 0 : i32
    %c0_i32_0 = arith.constant 0 : i32
    %c0_i32_1 = arith.constant 0 : i32
    return %c0_i32, %c0_i32_0 : i32, i32
  }
  func.func @transform_4(%arg0: i32, %arg1: i32) -> (i32, i32, i32) {
    %c0_i32 = arith.constant 0 : i32
    %c0_i32_0 = arith.constant 0 : i32
    %c0_i32_1 = arith.constant 0 : i32
    %c0_i32_2 = arith.constant 0 : i32
    return %c0_i32, %c0_i32_0, %c0_i32_1 : i32, i32, i32
  }
  func.func @transform_5(%arg0: i32, %arg1: i32) -> (i32, i32, i32) {
    %c0_i32 = arith.constant 0 : i32
    %c0_i32_0 = arith.constant 0 : i32
    %c0_i32_1 = arith.constant 0 : i32
    %c0_i32_2 = arith.constant 0 : i32
    return %c0_i32, %c0_i32_0, %c0_i32_1 : i32, i32, i32
  }
  func.func @transform_6(%arg0: i32, %arg1: i32) -> (i32, i32, i32) {
    %c0_i32 = arith.constant 0 : i32
    %c0_i32_0 = arith.constant 0 : i32
    %c0_i32_1 = arith.constant 0 : i32
    %c0_i32_2 = arith.constant 0 : i32
    return %c0_i32, %c0_i32_0, %c0_i32_1 : i32, i32, i32
  }
  func.func @transform_7(%arg0: i32, %arg1: i32) -> (i32, i32) {
    %c0_i32 = arith.constant 0 : i32
    %c0_i32_0 = arith.constant 0 : i32
    %c0_i32_1 = arith.constant 0 : i32
    return %c0_i32, %c0_i32_0 : i32, i32
  }
  func.func @transform_8(%arg0: i32, %arg1: i32) -> (i32, i32, i32) {
    %c0_i32 = arith.constant 0 : i32
    %c0_i32_0 = arith.constant 0 : i32
    return %arg0, %arg1, %c0_i32 : i32, i32, i32
  }
}

module attributes {stable_mosaic.version = 11 : i64} {
  func.func @encoder_block_kernel(%arg0: i32, %arg1: i32, %arg2: memref<1x8x32xf32, #tpu.memory_space<vmem>>, %arg3: memref<32x32xbf16, #tpu.memory_space<vmem>>, %arg4: memref<32x64xbf16, #tpu.memory_space<vmem>>, %arg5: memref<32x32xbf16, #tpu.memory_space<vmem>>, %arg6: memref<1x32x128xbf16, #tpu.memory_space<vmem>>, %arg7: memref<1x128x32xbf16, #tpu.memory_space<vmem>>, %arg8: memref<1x1x128xf32, #tpu.memory_space<vmem>>, %arg9: memref<9x32xf32, #tpu.memory_space<vmem>>, %arg10: memref<1x8x32xf32, #tpu.memory_space<vmem>>, %arg11: memref<8x32xf32, #tpu.memory_space<vmem>>, %arg12: memref<8x4xf32, #tpu.memory_space<vmem>>, %arg13: memref<8x4xf32, #tpu.memory_space<vmem>>) attributes {dimension_semantics = [#tpu.dimension_semantics<parallel>, #tpu.dimension_semantics<parallel>], iteration_bounds = array<i64: 2, 1>, scalar_prefetch = 0 : i64, scratch_operands = 3 : i64, tpu.core_type = #tpu.core_type<tc>, window_params = [{transform_indices = @transform_0, window_bounds = array<i64: 1, 8, 32>}, {pipeline_mode = #tpu.pipeline_mode<synchronous>, transform_indices = @transform_1, window_bounds = array<i64: 32, 32>}, {pipeline_mode = #tpu.pipeline_mode<synchronous>, transform_indices = @transform_2, window_bounds = array<i64: 32, 64>}, {pipeline_mode = #tpu.pipeline_mode<synchronous>, transform_indices = @transform_3, window_bounds = array<i64: 32, 32>}, {pipeline_mode = #tpu.pipeline_mode<synchronous>, transform_indices = @transform_4, window_bounds = array<i64: 1, 32, 128>}, {pipeline_mode = #tpu.pipeline_mode<synchronous>, transform_indices = @transform_5, window_bounds = array<i64: 1, 128, 32>}, {pipeline_mode = #tpu.pipeline_mode<synchronous>, transform_indices = @transform_6, window_bounds = array<i64: 1, 1, 128>}, {pipeline_mode = #tpu.pipeline_mode<synchronous>, transform_indices = @transform_7, window_bounds = array<i64: 9, 32>}, {transform_indices = @transform_8, window_bounds = array<i64: 1, 8, 32>}]} {
    %c0 = arith.constant 0 : index
    %c0_0 = arith.constant 0 : index
    %0 = vector.load %arg9[%c0, %c0_0] : memref<9x32xf32, #tpu.memory_space<vmem>>, vector<1x32xf32>
    %c1 = arith.constant 1 : index
    %c0_1 = arith.constant 0 : index
    %1 = vector.load %arg9[%c1, %c0_1] : memref<9x32xf32, #tpu.memory_space<vmem>>, vector<1x32xf32>
    %c8_i32 = arith.constant 8 : i32
    %2 = arith.muli %arg1, %c8_i32 : i32
    %3 = tpu.assume_multiple %2, 8 : i32
    %c0_2 = arith.constant 0 : index
    %4 = arith.index_cast %3 : i32 to index
    %c0_3 = arith.constant 0 : index
    %5 = vector.load %arg2[%c0_2, %4, %c0_3] : memref<1x8x32xf32, #tpu.memory_space<vmem>>, vector<1x8x32xf32>
    %6 = vector.shape_cast %5 : vector<1x8x32xf32> to vector<8x32xf32>
    %cst = arith.constant dense<0.000000e+00> : vector<8xf32>
    %7 = vector.multi_reduction <add>, %6, %cst [1] : vector<8x32xf32> to vector<8xf32>
    %8 = vector.shape_cast %7 : vector<8xf32> to vector<8x1xf32>
    %cst_4 = arith.constant 3.200000e+01 : f32
    %9 = vector.broadcast %cst_4 : f32 to vector<8x1xf32>
    %10 = arith.divf %8, %9 : vector<8x1xf32>
    %11 = vector.broadcast %10 : vector<8x1xf32> to vector<8x32xf32>
    %12 = arith.subf %6, %11 : vector<8x32xf32>
    %13 = arith.mulf %12, %12 : vector<8x32xf32>
    %cst_5 = arith.constant dense<0.000000e+00> : vector<8xf32>
    %14 = vector.multi_reduction <add>, %13, %cst_5 [1] : vector<8x32xf32> to vector<8xf32>
    %15 = vector.shape_cast %14 : vector<8xf32> to vector<8x1xf32>
    %cst_6 = arith.constant 3.200000e+01 : f32
    %16 = vector.broadcast %cst_6 : f32 to vector<8x1xf32>
    %17 = arith.divf %15, %16 : vector<8x1xf32>
    %18 = vector.broadcast %10 : vector<8x1xf32> to vector<8x32xf32>
    %19 = arith.subf %6, %18 : vector<8x32xf32>
    %cst_7 = arith.constant 9.99999974E-6 : f32
    %20 = vector.broadcast %cst_7 : f32 to vector<8x1xf32>
    %21 = arith.addf %17, %20 : vector<8x1xf32>
    %22 = math.rsqrt %21 : vector<8x1xf32>
    %23 = vector.broadcast %22 : vector<8x1xf32> to vector<8x32xf32>
    %24 = arith.mulf %19, %23 : vector<8x32xf32>
    %25 = vector.broadcast %0 : vector<1x32xf32> to vector<8x32xf32>
    %26 = arith.mulf %24, %25 : vector<8x32xf32>
    %27 = vector.broadcast %1 : vector<1x32xf32> to vector<8x32xf32>
    %28 = arith.addf %26, %27 : vector<8x32xf32>
    %29 = arith.truncf %28 : vector<8x32xf32> to vector<8x32xbf16>
    %c0_8 = arith.constant 0 : index
    %c0_9 = arith.constant 0 : index
    %30 = vector.load %arg3[%c0_8, %c0_9] : memref<32x32xbf16, #tpu.memory_space<vmem>>, vector<32x32xbf16>
    %cst_10 = arith.constant dense<0.000000e+00> : vector<8x32xf32>
    %31 = tpu.matmul %29, %30, %cst_10 {dimension_numbers = #tpu.dot_dimension_numbers<[1], [0], [0], [1], [0, 0, 1, 1], [], []>} : vector<8x32xbf16>, vector<32x32xbf16>, vector<8x32xf32> -> vector<8x32xf32>
    %c4 = arith.constant 4 : index
    %c0_11 = arith.constant 0 : index
    %32 = vector.load %arg9[%c4, %c0_11] : memref<9x32xf32, #tpu.memory_space<vmem>>, vector<1x32xf32>
    %33 = vector.broadcast %32 : vector<1x32xf32> to vector<8x32xf32>
    %34 = arith.addf %31, %33 : vector<8x32xf32>
    %35 = arith.truncf %34 : vector<8x32xf32> to vector<8x32xbf16>
    %cst_12 = arith.constant 0xFF800000 : f32
    %36 = vector.broadcast %cst_12 : f32 to vector<8x4xf32>
    %c0_13 = arith.constant 0 : index
    %c0_14 = arith.constant 0 : index
    %37 = vector.load %arg12[%c0_13, %c0_14] : memref<8x4xf32, #tpu.memory_space<vmem>>, vector<8x4xf32>
    tpu.vector_store %arg12[%c0_13, %c0_14], %36 {strides = array<i32>} : memref<8x4xf32, #tpu.memory_space<vmem>>, vector<8x4xf32>,
    %cst_15 = arith.constant 0.000000e+00 : f32
    %38 = vector.broadcast %cst_15 : f32 to vector<8x4xf32>
    %c0_16 = arith.constant 0 : index
    %c0_17 = arith.constant 0 : index
    %39 = vector.load %arg13[%c0_16, %c0_17] : memref<8x4xf32, #tpu.memory_space<vmem>>, vector<8x4xf32>
    tpu.vector_store %arg13[%c0_16, %c0_17], %38 {strides = array<i32>} : memref<8x4xf32, #tpu.memory_space<vmem>>, vector<8x4xf32>,
    %cst_18 = arith.constant 0.000000e+00 : f32
    %40 = vector.broadcast %cst_18 : f32 to vector<8x32xf32>
    %c0_19 = arith.constant 0 : index
    %c0_20 = arith.constant 0 : index
    %41 = vector.load %arg11[%c0_19, %c0_20] : memref<8x32xf32, #tpu.memory_space<vmem>>, vector<8x32xf32>
    tpu.vector_store %arg11[%c0_19, %c0_20], %40 {strides = array<i32>} : memref<8x32xf32, #tpu.memory_space<vmem>>, vector<8x32xf32>,
    %c5 = arith.constant 5 : index
    %c0_21 = arith.constant 0 : index
    %42 = vector.load %arg9[%c5, %c0_21] : memref<9x32xf32, #tpu.memory_space<vmem>>, vector<1x32xf32>
    %c6 = arith.constant 6 : index
    %c0_22 = arith.constant 0 : index
    %43 = vector.load %arg9[%c6, %c0_22] : memref<9x32xf32, #tpu.memory_space<vmem>>, vector<1x32xf32>
    %c0_i32 = arith.constant 0 : i32
    %c8_i32_23 = arith.constant 8 : i32
    %44 = arith.muli %c0_i32, %c8_i32_23 : i32
    %45 = tpu.assume_multiple %44, 8 : i32
    %c0_24 = arith.constant 0 : index
    %46 = arith.index_cast %45 : i32 to index
    %c0_25 = arith.constant 0 : index
    %47 = vector.load %arg2[%c0_24, %46, %c0_25] : memref<1x8x32xf32, #tpu.memory_space<vmem>>, vector<1x8x32xf32>
    %48 = vector.shape_cast %47 : vector<1x8x32xf32> to vector<8x32xf32>
    %cst_26 = arith.constant dense<0.000000e+00> : vector<8xf32>
    %49 = vector.multi_reduction <add>, %48, %cst_26 [1] : vector<8x32xf32> to vector<8xf32>
    %50 = vector.shape_cast %49 : vector<8xf32> to vector<8x1xf32>
    %cst_27 = arith.constant 3.200000e+01 : f32
    %51 = vector.broadcast %cst_27 : f32 to vector<8x1xf32>
    %52 = arith.divf %50, %51 : vector<8x1xf32>
    %53 = vector.broadcast %52 : vector<8x1xf32> to vector<8x32xf32>
    %54 = arith.subf %48, %53 : vector<8x32xf32>
    %55 = arith.mulf %54, %54 : vector<8x32xf32>
    %cst_28 = arith.constant dense<0.000000e+00> : vector<8xf32>
    %56 = vector.multi_reduction <add>, %55, %cst_28 [1] : vector<8x32xf32> to vector<8xf32>
    %57 = vector.shape_cast %56 : vector<8xf32> to vector<8x1xf32>
    %cst_29 = arith.constant 3.200000e+01 : f32
    %58 = vector.broadcast %cst_29 : f32 to vector<8x1xf32>
    %59 = arith.divf %57, %58 : vector<8x1xf32>
    %60 = vector.broadcast %52 : vector<8x1xf32> to vector<8x32xf32>
    %61 = arith.subf %48, %60 : vector<8x32xf32>
    %cst_30 = arith.constant 9.99999974E-6 : f32
    %62 = vector.broadcast %cst_30 : f32 to vector<8x1xf32>
    %63 = arith.addf %59, %62 : vector<8x1xf32>
    %64 = math.rsqrt %63 : vector<8x1xf32>
    %65 = vector.broadcast %64 : vector<8x1xf32> to vector<8x32xf32>
    %66 = arith.mulf %61, %65 : vector<8x32xf32>
    %67 = vector.broadcast %0 : vector<1x32xf32> to vector<8x32xf32>
    %68 = arith.mulf %66, %67 : vector<8x32xf32>
    %69 = vector.broadcast %1 : vector<1x32xf32> to vector<8x32xf32>
    %70 = arith.addf %68, %69 : vector<8x32xf32>
    %71 = arith.truncf %70 : vector<8x32xf32> to vector<8x32xbf16>
    %c0_31 = arith.constant 0 : index
    %c0_32 = arith.constant 0 : index
    %72 = vector.load %arg4[%c0_31, %c0_32] : memref<32x64xbf16, #tpu.memory_space<vmem>>, vector<32x64xbf16>
    %cst_33 = arith.constant dense<0.000000e+00> : vector<8x64xf32>
    %73 = tpu.matmul %71, %72, %cst_33 {dimension_numbers = #tpu.dot_dimension_numbers<[1], [0], [0], [1], [0, 0, 1, 1], [], []>} : vector<8x32xbf16>, vector<32x64xbf16>, vector<8x64xf32> -> vector<8x64xf32>
    %74 = vector.extract_strided_slice %73 {offsets = [0, 0], sizes = [8, 32], strides = [1, 1]} : vector<8x64xf32> to vector<8x32xf32>
    %75 = vector.broadcast %42 : vector<1x32xf32> to vector<8x32xf32>
    %76 = arith.addf %74, %75 : vector<8x32xf32>
    %77 = arith.truncf %76 : vector<8x32xf32> to vector<8x32xbf16>
    %78 = vector.extract_strided_slice %73 {offsets = [0, 32], sizes = [8, 32], strides = [1, 1]} : vector<8x64xf32> to vector<8x32xf32>
    %79 = vector.broadcast %43 : vector<1x32xf32> to vector<8x32xf32>
    %80 = arith.addf %78, %79 : vector<8x32xf32>
    %81 = arith.truncf %80 : vector<8x32xf32> to vector<8x32xbf16>
    %82 = vector.extract_strided_slice %35 {offsets = [0, 0], sizes = [8, 8], strides = [1, 1]} : vector<8x32xbf16> to vector<8x8xbf16>
    %83 = vector.extract_strided_slice %77 {offsets = [0, 0], sizes = [8, 8], strides = [1, 1]} : vector<8x32xbf16> to vector<8x8xbf16>
    %cst_34 = arith.constant dense<0.000000e+00> : vector<8x8xf32>
    %84 = tpu.matmul %82, %83, %cst_34 {dimension_numbers = #tpu.dot_dimension_numbers<[1], [1], [0], [0], [0, 0, 1, 0], [], []>} : vector<8x8xbf16>, vector<8x8xbf16>, vector<8x8xf32> -> vector<8x8xf32>
    %c0_35 = arith.constant 0 : index
    %c0_36 = arith.constant 0 : index
    %85 = vector.load %arg12[%c0_35, %c0_36] : memref<8x4xf32, #tpu.memory_space<vmem>>, vector<8x1xf32>
    %cst_37 = arith.constant dense<0xFF800000> : vector<8xf32>
    %86 = vector.multi_reduction <maximumf>, %84, %cst_37 [1] : vector<8x8xf32> to vector<8xf32>
    %87 = vector.shape_cast %86 : vector<8xf32> to vector<8x1xf32>
    %88 = arith.maximumf %85, %87 : vector<8x1xf32>
    %89 = arith.subf %85, %88 : vector<8x1xf32>
    %90 = math.exp %89 : vector<8x1xf32>
    %91 = vector.broadcast %88 : vector<8x1xf32> to vector<8x8xf32>
    %92 = arith.subf %84, %91 : vector<8x8xf32>
    %93 = math.exp %92 : vector<8x8xf32>
    %c0_38 = arith.constant 0 : index
    %c0_39 = arith.constant 0 : index
    %94 = vector.load %arg13[%c0_38, %c0_39] : memref<8x4xf32, #tpu.memory_space<vmem>>, vector<8x1xf32>
    %95 = arith.mulf %90, %94 : vector<8x1xf32>
    %cst_40 = arith.constant dense<0.000000e+00> : vector<8xf32>
    %96 = vector.multi_reduction <add>, %93, %cst_40 [1] : vector<8x8xf32> to vector<8xf32>
    %97 = vector.shape_cast %96 : vector<8xf32> to vector<8x1xf32>
    %98 = arith.addf %95, %97 : vector<8x1xf32>
    %c0_41 = arith.constant 0 : index
    %c0_42 = arith.constant 0 : index
    %99 = vector.load %arg13[%c0_41, %c0_42] : memref<8x4xf32, #tpu.memory_space<vmem>>, vector<8x1xf32>
    tpu.vector_store %arg13[%c0_41, %c0_42], %98 {strides = array<i32>} : memref<8x4xf32, #tpu.memory_space<vmem>>, vector<8x1xf32>,
    %c0_43 = arith.constant 0 : index
    %c0_44 = arith.constant 0 : index
    %100 = vector.load %arg11[%c0_43, %c0_44] : memref<8x32xf32, #tpu.memory_space<vmem>>, vector<8x8xf32>
    %101 = vector.broadcast %90 : vector<8x1xf32> to vector<8x8xf32>
    %102 = arith.mulf %101, %100 : vector<8x8xf32>
    %103 = arith.truncf %93 : vector<8x8xf32> to vector<8x8xbf16>
    %104 = vector.extract_strided_slice %81 {offsets = [0, 0], sizes = [8, 8], strides = [1, 1]} : vector<8x32xbf16> to vector<8x8xbf16>
    %cst_45 = arith.constant dense<0.000000e+00> : vector<8x8xf32>
    %105 = tpu.matmul %103, %104, %cst_45 {dimension_numbers = #tpu.dot_dimension_numbers<[1], [0], [0], [1], [0, 0, 1, 1], [], []>} : vector<8x8xbf16>, vector<8x8xbf16>, vector<8x8xf32> -> vector<8x8xf32>
    %106 = arith.addf %102, %105 : vector<8x8xf32>
    %c0_46 = arith.constant 0 : index
    %c0_47 = arith.constant 0 : index
    %107 = vector.load %arg11[%c0_46, %c0_47] : memref<8x32xf32, #tpu.memory_space<vmem>>, vector<8x8xf32>
    tpu.vector_store %arg11[%c0_46, %c0_47], %106 {strides = array<i32>} : memref<8x32xf32, #tpu.memory_space<vmem>>, vector<8x8xf32>,
    %c0_48 = arith.constant 0 : index
    %c0_49 = arith.constant 0 : index
    %108 = vector.load %arg12[%c0_48, %c0_49] : memref<8x4xf32, #tpu.memory_space<vmem>>, vector<8x1xf32>
    tpu.vector_store %arg12[%c0_48, %c0_49], %88 {strides = array<i32>} : memref<8x4xf32, #tpu.memory_space<vmem>>, vector<8x1xf32>,
    %109 = vector.extract_strided_slice %35 {offsets = [0, 8], sizes = [8, 8], strides = [1, 1]} : vector<8x32xbf16> to vector<8x8xbf16>
    %110 = vector.extract_strided_slice %77 {offsets = [0, 8], sizes = [8, 8], strides = [1, 1]} : vector<8x32xbf16> to vector<8x8xbf16>
    %cst_50 = arith.constant dense<0.000000e+00> : vector<8x8xf32>
    %111 = tpu.matmul %109, %110, %cst_50 {dimension_numbers = #tpu.dot_dimension_numbers<[1], [1], [0], [0], [0, 0, 1, 0], [], []>} : vector<8x8xbf16>, vector<8x8xbf16>, vector<8x8xf32> -> vector<8x8xf32>
    %c0_51 = arith.constant 0 : index
    %c1_52 = arith.constant 1 : index
    %112 = vector.load %arg12[%c0_51, %c1_52] : memref<8x4xf32, #tpu.memory_space<vmem>>, vector<8x1xf32>
    %cst_53 = arith.constant dense<0xFF800000> : vector<8xf32>
    %113 = vector.multi_reduction <maximumf>, %111, %cst_53 [1] : vector<8x8xf32> to vector<8xf32>
    %114 = vector.shape_cast %113 : vector<8xf32> to vector<8x1xf32>
    %115 = arith.maximumf %112, %114 : vector<8x1xf32>
    %116 = arith.subf %112, %115 : vector<8x1xf32>
    %117 = math.exp %116 : vector<8x1xf32>
    %118 = vector.broadcast %115 : vector<8x1xf32> to vector<8x8xf32>
    %119 = arith.subf %111, %118 : vector<8x8xf32>
    %120 = math.exp %119 : vector<8x8xf32>
    %c0_54 = arith.constant 0 : index
    %c1_55 = arith.constant 1 : index
    %121 = vector.load %arg13[%c0_54, %c1_55] : memref<8x4xf32, #tpu.memory_space<vmem>>, vector<8x1xf32>
    %122 = arith.mulf %117, %121 : vector<8x1xf32>
    %cst_56 = arith.constant dense<0.000000e+00> : vector<8xf32>
    %123 = vector.multi_reduction <add>, %120, %cst_56 [1] : vector<8x8xf32> to vector<8xf32>
    %124 = vector.shape_cast %123 : vector<8xf32> to vector<8x1xf32>
    %125 = arith.addf %122, %124 : vector<8x1xf32>
    %c0_57 = arith.constant 0 : index
    %c1_58 = arith.constant 1 : index
    %126 = vector.load %arg13[%c0_57, %c1_58] : memref<8x4xf32, #tpu.memory_space<vmem>>, vector<8x1xf32>
    tpu.vector_store %arg13[%c0_57, %c1_58], %125 {strides = array<i32>} : memref<8x4xf32, #tpu.memory_space<vmem>>, vector<8x1xf32>,
    %c0_59 = arith.constant 0 : index
    %c8 = arith.constant 8 : index
    %127 = vector.load %arg11[%c0_59, %c8] : memref<8x32xf32, #tpu.memory_space<vmem>>, vector<8x8xf32>
    %128 = vector.broadcast %117 : vector<8x1xf32> to vector<8x8xf32>
    %129 = arith.mulf %128, %127 : vector<8x8xf32>
    %130 = arith.truncf %120 : vector<8x8xf32> to vector<8x8xbf16>
    %131 = vector.extract_strided_slice %81 {offsets = [0, 8], sizes = [8, 8], strides = [1, 1]} : vector<8x32xbf16> to vector<8x8xbf16>
    %cst_60 = arith.constant dense<0.000000e+00> : vector<8x8xf32>
    %132 = tpu.matmul %130, %131, %cst_60 {dimension_numbers = #tpu.dot_dimension_numbers<[1], [0], [0], [1], [0, 0, 1, 1], [], []>} : vector<8x8xbf16>, vector<8x8xbf16>, vector<8x8xf32> -> vector<8x8xf32>
    %133 = arith.addf %129, %132 : vector<8x8xf32>
    %c0_61 = arith.constant 0 : index
    %c8_62 = arith.constant 8 : index
    %134 = vector.load %arg11[%c0_61, %c8_62] : memref<8x32xf32, #tpu.memory_space<vmem>>, vector<8x8xf32>
    tpu.vector_store %arg11[%c0_61, %c8_62], %133 {strides = array<i32>} : memref<8x32xf32, #tpu.memory_space<vmem>>, vector<8x8xf32>,
    %c0_63 = arith.constant 0 : index
    %c1_64 = arith.constant 1 : index
    %135 = vector.load %arg12[%c0_63, %c1_64] : memref<8x4xf32, #tpu.memory_space<vmem>>, vector<8x1xf32>
    tpu.vector_store %arg12[%c0_63, %c1_64], %115 {strides = array<i32>} : memref<8x4xf32, #tpu.memory_space<vmem>>, vector<8x1xf32>,
    %136 = vector.extract_strided_slice %35 {offsets = [0, 16], sizes = [8, 8], strides = [1, 1]} : vector<8x32xbf16> to vector<8x8xbf16>
    %137 = vector.extract_strided_slice %77 {offsets = [0, 16], sizes = [8, 8], strides = [1, 1]} : vector<8x32xbf16> to vector<8x8xbf16>
    %cst_65 = arith.constant dense<0.000000e+00> : vector<8x8xf32>
    %138 = tpu.matmul %136, %137, %cst_65 {dimension_numbers = #tpu.dot_dimension_numbers<[1], [1], [0], [0], [0, 0, 1, 0], [], []>} : vector<8x8xbf16>, vector<8x8xbf16>, vector<8x8xf32> -> vector<8x8xf32>
    %c0_66 = arith.constant 0 : index
    %c2 = arith.constant 2 : index
    %139 = vector.load %arg12[%c0_66, %c2] : memref<8x4xf32, #tpu.memory_space<vmem>>, vector<8x1xf32>
    %cst_67 = arith.constant dense<0xFF800000> : vector<8xf32>
    %140 = vector.multi_reduction <maximumf>, %138, %cst_67 [1] : vector<8x8xf32> to vector<8xf32>
    %141 = vector.shape_cast %140 : vector<8xf32> to vector<8x1xf32>
    %142 = arith.maximumf %139, %141 : vector<8x1xf32>
    %143 = arith.subf %139, %142 : vector<8x1xf32>
    %144 = math.exp %143 : vector<8x1xf32>
    %145 = vector.broadcast %142 : vector<8x1xf32> to vector<8x8xf32>
    %146 = arith.subf %138, %145 : vector<8x8xf32>
    %147 = math.exp %146 : vector<8x8xf32>
    %c0_68 = arith.constant 0 : index
    %c2_69 = arith.constant 2 : index
    %148 = vector.load %arg13[%c0_68, %c2_69] : memref<8x4xf32, #tpu.memory_space<vmem>>, vector<8x1xf32>
    %149 = arith.mulf %144, %148 : vector<8x1xf32>
    %cst_70 = arith.constant dense<0.000000e+00> : vector<8xf32>
    %150 = vector.multi_reduction <add>, %147, %cst_70 [1] : vector<8x8xf32> to vector<8xf32>
    %151 = vector.shape_cast %150 : vector<8xf32> to vector<8x1xf32>
    %152 = arith.addf %149, %151 : vector<8x1xf32>
    %c0_71 = arith.constant 0 : index
    %c2_72 = arith.constant 2 : index
    %153 = vector.load %arg13[%c0_71, %c2_72] : memref<8x4xf32, #tpu.memory_space<vmem>>, vector<8x1xf32>
    tpu.vector_store %arg13[%c0_71, %c2_72], %152 {strides = array<i32>} : memref<8x4xf32, #tpu.memory_space<vmem>>, vector<8x1xf32>,
    %c0_73 = arith.constant 0 : index
    %c16 = arith.constant 16 : index
    %154 = vector.load %arg11[%c0_73, %c16] : memref<8x32xf32, #tpu.memory_space<vmem>>, vector<8x8xf32>
    %155 = vector.broadcast %144 : vector<8x1xf32> to vector<8x8xf32>
    %156 = arith.mulf %155, %154 : vector<8x8xf32>
    %157 = arith.truncf %147 : vector<8x8xf32> to vector<8x8xbf16>
    %158 = vector.extract_strided_slice %81 {offsets = [0, 16], sizes = [8, 8], strides = [1, 1]} : vector<8x32xbf16> to vector<8x8xbf16>
    %cst_74 = arith.constant dense<0.000000e+00> : vector<8x8xf32>
    %159 = tpu.matmul %157, %158, %cst_74 {dimension_numbers = #tpu.dot_dimension_numbers<[1], [0], [0], [1], [0, 0, 1, 1], [], []>} : vector<8x8xbf16>, vector<8x8xbf16>, vector<8x8xf32> -> vector<8x8xf32>
    %160 = arith.addf %156, %159 : vector<8x8xf32>
    %c0_75 = arith.constant 0 : index
    %c16_76 = arith.constant 16 : index
    %161 = vector.load %arg11[%c0_75, %c16_76] : memref<8x32xf32, #tpu.memory_space<vmem>>, vector<8x8xf32>
    tpu.vector_store %arg11[%c0_75, %c16_76], %160 {strides = array<i32>} : memref<8x32xf32, #tpu.memory_space<vmem>>, vector<8x8xf32>,
    %c0_77 = arith.constant 0 : index
    %c2_78 = arith.constant 2 : index
    %162 = vector.load %arg12[%c0_77, %c2_78] : memref<8x4xf32, #tpu.memory_space<vmem>>, vector<8x1xf32>
    tpu.vector_store %arg12[%c0_77, %c2_78], %142 {strides = array<i32>} : memref<8x4xf32, #tpu.memory_space<vmem>>, vector<8x1xf32>,
    %163 = vector.extract_strided_slice %35 {offsets = [0, 24], sizes = [8, 8], strides = [1, 1]} : vector<8x32xbf16> to vector<8x8xbf16>
    %164 = vector.extract_strided_slice %77 {offsets = [0, 24], sizes = [8, 8], strides = [1, 1]} : vector<8x32xbf16> to vector<8x8xbf16>
    %cst_79 = arith.constant dense<0.000000e+00> : vector<8x8xf32>
    %165 = tpu.matmul %163, %164, %cst_79 {dimension_numbers = #tpu.dot_dimension_numbers<[1], [1], [0], [0], [0, 0, 1, 0], [], []>} : vector<8x8xbf16>, vector<8x8xbf16>, vector<8x8xf32> -> vector<8x8xf32>
    %c0_80 = arith.constant 0 : index
    %c3 = arith.constant 3 : index
    %166 = vector.load %arg12[%c0_80, %c3] : memref<8x4xf32, #tpu.memory_space<vmem>>, vector<8x1xf32>
    %cst_81 = arith.constant dense<0xFF800000> : vector<8xf32>
    %167 = vector.multi_reduction <maximumf>, %165, %cst_81 [1] : vector<8x8xf32> to vector<8xf32>
    %168 = vector.shape_cast %167 : vector<8xf32> to vector<8x1xf32>
    %169 = arith.maximumf %166, %168 : vector<8x1xf32>
    %170 = arith.subf %166, %169 : vector<8x1xf32>
    %171 = math.exp %170 : vector<8x1xf32>
    %172 = vector.broadcast %169 : vector<8x1xf32> to vector<8x8xf32>
    %173 = arith.subf %165, %172 : vector<8x8xf32>
    %174 = math.exp %173 : vector<8x8xf32>
    %c0_82 = arith.constant 0 : index
    %c3_83 = arith.constant 3 : index
    %175 = vector.load %arg13[%c0_82, %c3_83] : memref<8x4xf32, #tpu.memory_space<vmem>>, vector<8x1xf32>
    %176 = arith.mulf %171, %175 : vector<8x1xf32>
    %cst_84 = arith.constant dense<0.000000e+00> : vector<8xf32>
    %177 = vector.multi_reduction <add>, %174, %cst_84 [1] : vector<8x8xf32> to vector<8xf32>
    %178 = vector.shape_cast %177 : vector<8xf32> to vector<8x1xf32>
    %179 = arith.addf %176, %178 : vector<8x1xf32>
    %c0_85 = arith.constant 0 : index
    %c3_86 = arith.constant 3 : index
    %180 = vector.load %arg13[%c0_85, %c3_86] : memref<8x4xf32, #tpu.memory_space<vmem>>, vector<8x1xf32>
    tpu.vector_store %arg13[%c0_85, %c3_86], %179 {strides = array<i32>} : memref<8x4xf32, #tpu.memory_space<vmem>>, vector<8x1xf32>,
    %c0_87 = arith.constant 0 : index
    %c24 = arith.constant 24 : index
    %181 = vector.load %arg11[%c0_87, %c24] : memref<8x32xf32, #tpu.memory_space<vmem>>, vector<8x8xf32>
    %182 = vector.broadcast %171 : vector<8x1xf32> to vector<8x8xf32>
    %183 = arith.mulf %182, %181 : vector<8x8xf32>
    %184 = arith.truncf %174 : vector<8x8xf32> to vector<8x8xbf16>
    %185 = vector.extract_strided_slice %81 {offsets = [0, 24], sizes = [8, 8], strides = [1, 1]} : vector<8x32xbf16> to vector<8x8xbf16>
    %cst_88 = arith.constant dense<0.000000e+00> : vector<8x8xf32>
    %186 = tpu.matmul %184, %185, %cst_88 {dimension_numbers = #tpu.dot_dimension_numbers<[1], [0], [0], [1], [0, 0, 1, 1], [], []>} : vector<8x8xbf16>, vector<8x8xbf16>, vector<8x8xf32> -> vector<8x8xf32>
    %187 = arith.addf %183, %186 : vector<8x8xf32>
    %c0_89 = arith.constant 0 : index
    %c24_90 = arith.constant 24 : index
    %188 = vector.load %arg11[%c0_89, %c24_90] : memref<8x32xf32, #tpu.memory_space<vmem>>, vector<8x8xf32>
    tpu.vector_store %arg11[%c0_89, %c24_90], %187 {strides = array<i32>} : memref<8x32xf32, #tpu.memory_space<vmem>>, vector<8x8xf32>,
    %c0_91 = arith.constant 0 : index
    %c3_92 = arith.constant 3 : index
    %189 = vector.load %arg12[%c0_91, %c3_92] : memref<8x4xf32, #tpu.memory_space<vmem>>, vector<8x1xf32>
    tpu.vector_store %arg12[%c0_91, %c3_92], %169 {strides = array<i32>} : memref<8x4xf32, #tpu.memory_space<vmem>>, vector<8x1xf32>,
    %c1_i32 = arith.constant 1 : i32
    %c0_93 = arith.constant 0 : index
    %c0_94 = arith.constant 0 : index
    %190 = vector.load %arg13[%c0_93, %c0_94] : memref<8x4xf32, #tpu.memory_space<vmem>>, vector<8x1xf32>
    %191 = tpu.reciprocal %190 {approx = true} : vector<8x1xf32> -> vector<8x1xf32>
    %c0_95 = arith.constant 0 : index
    %c0_96 = arith.constant 0 : index
    %192 = vector.load %arg11[%c0_95, %c0_96] : memref<8x32xf32, #tpu.memory_space<vmem>>, vector<8x8xf32>
    %193 = vector.broadcast %191 : vector<8x1xf32> to vector<8x8xf32>
    %194 = arith.mulf %192, %193 : vector<8x8xf32>
    %c0_97 = arith.constant 0 : index
    %c0_98 = arith.constant 0 : index
    %195 = vector.load %arg11[%c0_97, %c0_98] : memref<8x32xf32, #tpu.memory_space<vmem>>, vector<8x8xf32>
    tpu.vector_store %arg11[%c0_97, %c0_98], %194 {strides = array<i32>} : memref<8x32xf32, #tpu.memory_space<vmem>>, vector<8x8xf32>,
    %c0_99 = arith.constant 0 : index
    %c1_100 = arith.constant 1 : index
    %196 = vector.load %arg13[%c0_99, %c1_100] : memref<8x4xf32, #tpu.memory_space<vmem>>, vector<8x1xf32>
    %197 = tpu.reciprocal %196 {approx = true} : vector<8x1xf32> -> vector<8x1xf32>
    %c0_101 = arith.constant 0 : index
    %c8_102 = arith.constant 8 : index
    %198 = vector.load %arg11[%c0_101, %c8_102] : memref<8x32xf32, #tpu.memory_space<vmem>>, vector<8x8xf32>
    %199 = vector.broadcast %197 : vector<8x1xf32> to vector<8x8xf32>
    %200 = arith.mulf %198, %199 : vector<8x8xf32>
    %c0_103 = arith.constant 0 : index
    %c8_104 = arith.constant 8 : index
    %201 = vector.load %arg11[%c0_103, %c8_104] : memref<8x32xf32, #tpu.memory_space<vmem>>, vector<8x8xf32>
    tpu.vector_store %arg11[%c0_103, %c8_104], %200 {strides = array<i32>} : memref<8x32xf32, #tpu.memory_space<vmem>>, vector<8x8xf32>,
    %c0_105 = arith.constant 0 : index
    %c2_106 = arith.constant 2 : index
    %202 = vector.load %arg13[%c0_105, %c2_106] : memref<8x4xf32, #tpu.memory_space<vmem>>, vector<8x1xf32>
    %203 = tpu.reciprocal %202 {approx = true} : vector<8x1xf32> -> vector<8x1xf32>
    %c0_107 = arith.constant 0 : index
    %c16_108 = arith.constant 16 : index
    %204 = vector.load %arg11[%c0_107, %c16_108] : memref<8x32xf32, #tpu.memory_space<vmem>>, vector<8x8xf32>
    %205 = vector.broadcast %203 : vector<8x1xf32> to vector<8x8xf32>
    %206 = arith.mulf %204, %205 : vector<8x8xf32>
    %c0_109 = arith.constant 0 : index
    %c16_110 = arith.constant 16 : index
    %207 = vector.load %arg11[%c0_109, %c16_110] : memref<8x32xf32, #tpu.memory_space<vmem>>, vector<8x8xf32>
    tpu.vector_store %arg11[%c0_109, %c16_110], %206 {strides = array<i32>} : memref<8x32xf32, #tpu.memory_space<vmem>>, vector<8x8xf32>,
    %c0_111 = arith.constant 0 : index
    %c3_112 = arith.constant 3 : index
    %208 = vector.load %arg13[%c0_111, %c3_112] : memref<8x4xf32, #tpu.memory_space<vmem>>, vector<8x1xf32>
    %209 = tpu.reciprocal %208 {approx = true} : vector<8x1xf32> -> vector<8x1xf32>
    %c0_113 = arith.constant 0 : index
    %c24_114 = arith.constant 24 : index
    %210 = vector.load %arg11[%c0_113, %c24_114] : memref<8x32xf32, #tpu.memory_space<vmem>>, vector<8x8xf32>
    %211 = vector.broadcast %209 : vector<8x1xf32> to vector<8x8xf32>
    %212 = arith.mulf %210, %211 : vector<8x8xf32>
    %c0_115 = arith.constant 0 : index
    %c24_116 = arith.constant 24 : index
    %213 = vector.load %arg11[%c0_115, %c24_116] : memref<8x32xf32, #tpu.memory_space<vmem>>, vector<8x8xf32>
    tpu.vector_store %arg11[%c0_115, %c24_116], %212 {strides = array<i32>} : memref<8x32xf32, #tpu.memory_space<vmem>>, vector<8x8xf32>,
    %c0_117 = arith.constant 0 : index
    %c0_118 = arith.constant 0 : index
    %214 = vector.load %arg11[%c0_117, %c0_118] : memref<8x32xf32, #tpu.memory_space<vmem>>, vector<8x32xf32>
    %215 = arith.truncf %214 : vector<8x32xf32> to vector<8x32xbf16>
    %c0_119 = arith.constant 0 : index
    %c0_120 = arith.constant 0 : index
    %216 = vector.load %arg5[%c0_119, %c0_120] : memref<32x32xbf16, #tpu.memory_space<vmem>>, vector<32x32xbf16>
    %cst_121 = arith.constant dense<0.000000e+00> : vector<8x32xf32>
    %217 = tpu.matmul %215, %216, %cst_121 {dimension_numbers = #tpu.dot_dimension_numbers<[1], [0], [0], [1], [0, 0, 1, 1], [], []>} : vector<8x32xbf16>, vector<32x32xbf16>, vector<8x32xf32> -> vector<8x32xf32>
    %c7 = arith.constant 7 : index
    %c0_122 = arith.constant 0 : index
    %218 = vector.load %arg9[%c7, %c0_122] : memref<9x32xf32, #tpu.memory_space<vmem>>, vector<1x32xf32>
    %219 = vector.broadcast %218 : vector<1x32xf32> to vector<8x32xf32>
    %220 = arith.addf %217, %219 : vector<8x32xf32>
    %221 = arith.addf %6, %220 : vector<8x32xf32>
    %c2_123 = arith.constant 2 : index
    %c0_124 = arith.constant 0 : index
    %222 = vector.load %arg9[%c2_123, %c0_124] : memref<9x32xf32, #tpu.memory_space<vmem>>, vector<1x32xf32>
    %c3_125 = arith.constant 3 : index
    %c0_126 = arith.constant 0 : index
    %223 = vector.load %arg9[%c3_125, %c0_126] : memref<9x32xf32, #tpu.memory_space<vmem>>, vector<1x32xf32>
    %cst_127 = arith.constant dense<0.000000e+00> : vector<8xf32>
    %224 = vector.multi_reduction <add>, %221, %cst_127 [1] : vector<8x32xf32> to vector<8xf32>
    %225 = vector.shape_cast %224 : vector<8xf32> to vector<8x1xf32>
    %cst_128 = arith.constant 3.200000e+01 : f32
    %226 = vector.broadcast %cst_128 : f32 to vector<8x1xf32>
    %227 = arith.divf %225, %226 : vector<8x1xf32>
    %228 = vector.broadcast %227 : vector<8x1xf32> to vector<8x32xf32>
    %229 = arith.subf %221, %228 : vector<8x32xf32>
    %230 = arith.mulf %229, %229 : vector<8x32xf32>
    %cst_129 = arith.constant dense<0.000000e+00> : vector<8xf32>
    %231 = vector.multi_reduction <add>, %230, %cst_129 [1] : vector<8x32xf32> to vector<8xf32>
    %232 = vector.shape_cast %231 : vector<8xf32> to vector<8x1xf32>
    %cst_130 = arith.constant 3.200000e+01 : f32
    %233 = vector.broadcast %cst_130 : f32 to vector<8x1xf32>
    %234 = arith.divf %232, %233 : vector<8x1xf32>
    %235 = vector.broadcast %227 : vector<8x1xf32> to vector<8x32xf32>
    %236 = arith.subf %221, %235 : vector<8x32xf32>
    %cst_131 = arith.constant 9.99999974E-6 : f32
    %237 = vector.broadcast %cst_131 : f32 to vector<8x1xf32>
    %238 = arith.addf %234, %237 : vector<8x1xf32>
    %239 = math.rsqrt %238 : vector<8x1xf32>
    %240 = vector.broadcast %239 : vector<8x1xf32> to vector<8x32xf32>
    %241 = arith.mulf %236, %240 : vector<8x32xf32>
    %242 = vector.broadcast %222 : vector<1x32xf32> to vector<8x32xf32>
    %243 = arith.mulf %241, %242 : vector<8x32xf32>
    %244 = vector.broadcast %223 : vector<1x32xf32> to vector<8x32xf32>
    %245 = arith.addf %243, %244 : vector<8x32xf32>
    %246 = arith.truncf %245 : vector<8x32xf32> to vector<8x32xbf16>
    %cst_132 = arith.constant 0.000000e+00 : f32
    %247 = vector.broadcast %cst_132 : f32 to vector<8x32xf32>
    %c0_133 = arith.constant 0 : index
    %c0_134 = arith.constant 0 : index
    %248 = vector.load %arg11[%c0_133, %c0_134] : memref<8x32xf32, #tpu.memory_space<vmem>>, vector<8x32xf32>
    tpu.vector_store %arg11[%c0_133, %c0_134], %247 {strides = array<i32>} : memref<8x32xf32, #tpu.memory_space<vmem>>, vector<8x32xf32>,
    %c0_i32_135 = arith.constant 0 : i32
    %249 = arith.index_cast %c0_i32_135 : i32 to index
    %c0_136 = arith.constant 0 : index
    %c0_137 = arith.constant 0 : index
    %250 = vector.load %arg6[%249, %c0_136, %c0_137] : memref<1x32x128xbf16, #tpu.memory_space<vmem>>, vector<1x32x128xbf16>
    %251 = vector.shape_cast %250 : vector<1x32x128xbf16> to vector<32x128xbf16>
    %cst_138 = arith.constant dense<0.000000e+00> : vector<8x128xf32>
    %252 = tpu.matmul %246, %251, %cst_138 {dimension_numbers = #tpu.dot_dimension_numbers<[1], [0], [0], [1], [0, 0, 1, 1], [], []>} : vector<8x32xbf16>, vector<32x128xbf16>, vector<8x128xf32> -> vector<8x128xf32>
    %253 = arith.index_cast %c0_i32_135 : i32 to index
    %c0_139 = arith.constant 0 : index
    %c0_140 = arith.constant 0 : index
    %254 = vector.load %arg8[%253, %c0_139, %c0_140] : memref<1x1x128xf32, #tpu.memory_space<vmem>>, vector<1x1x128xf32>
    %255 = vector.shape_cast %254 : vector<1x1x128xf32> to vector<1x128xf32>
    %256 = vector.broadcast %255 : vector<1x128xf32> to vector<8x128xf32>
    %257 = arith.addf %252, %256 : vector<8x128xf32>
    %cst_141 = arith.constant 5.000000e-01 : f32
    %258 = vector.broadcast %cst_141 : f32 to vector<8x128xf32>
    %259 = arith.mulf %258, %257 : vector<8x128xf32>
    %cst_142 = arith.constant 0.707106769 : f32
    %260 = vector.broadcast %cst_142 : f32 to vector<8x128xf32>
    %261 = arith.mulf %257, %260 : vector<8x128xf32>
    %262 = math.erf %261 : vector<8x128xf32>
    %cst_143 = arith.constant 1.000000e+00 : f32
    %263 = vector.broadcast %cst_143 : f32 to vector<8x128xf32>
    %264 = arith.addf %263, %262 : vector<8x128xf32>
    %265 = arith.mulf %259, %264 : vector<8x128xf32>
    %c0_144 = arith.constant 0 : index
    %c0_145 = arith.constant 0 : index
    %266 = vector.load %arg11[%c0_144, %c0_145] : memref<8x32xf32, #tpu.memory_space<vmem>>, vector<8x32xf32>
    %267 = arith.truncf %265 : vector<8x128xf32> to vector<8x128xbf16>
    %268 = arith.index_cast %c0_i32_135 : i32 to index
    %c0_146 = arith.constant 0 : index
    %c0_147 = arith.constant 0 : index
    %269 = vector.load %arg7[%268, %c0_146, %c0_147] : memref<1x128x32xbf16, #tpu.memory_space<vmem>>, vector<1x128x32xbf16>
    %270 = vector.shape_cast %269 : vector<1x128x32xbf16> to vector<128x32xbf16>
    %cst_148 = arith.constant dense<0.000000e+00> : vector<8x32xf32>
    %271 = tpu.matmul %267, %270, %cst_148 {dimension_numbers = #tpu.dot_dimension_numbers<[1], [0], [0], [1], [0, 0, 1, 1], [], []>} : vector<8x128xbf16>, vector<128x32xbf16>, vector<8x32xf32> -> vector<8x32xf32>
    %272 = arith.addf %266, %271 : vector<8x32xf32>
    %c0_149 = arith.constant 0 : index
    %c0_150 = arith.constant 0 : index
    %273 = vector.load %arg11[%c0_149, %c0_150] : memref<8x32xf32, #tpu.memory_space<vmem>>, vector<8x32xf32>
    tpu.vector_store %arg11[%c0_149, %c0_150], %272 {strides = array<i32>} : memref<8x32xf32, #tpu.memory_space<vmem>>, vector<8x32xf32>,
    %c1_i32_151 = arith.constant 1 : i32
    %c0_152 = arith.constant 0 : index
    %c0_153 = arith.constant 0 : index
    %274 = vector.load %arg11[%c0_152, %c0_153] : memref<8x32xf32, #tpu.memory_space<vmem>>, vector<8x32xf32>
    %275 = arith.addf %221, %274 : vector<8x32xf32>
    %c8_154 = arith.constant 8 : index
    %c0_155 = arith.constant 0 : index
    %276 = vector.load %arg9[%c8_154, %c0_155] : memref<9x32xf32, #tpu.memory_space<vmem>>, vector<1x32xf32>
    %277 = vector.broadcast %276 : vector<1x32xf32> to vector<8x32xf32>
    %278 = arith.addf %275, %277 : vector<8x32xf32>
    %c0_156 = arith.constant 0 : index
    %c0_157 = arith.constant 0 : index
    %c0_158 = arith.constant 0 : index
    %279 = vector.load %arg10[%c0_156, %c0_157, %c0_158] : memref<1x8x32xf32, #tpu.memory_space<vmem>>, vector<1x8x32xf32>
    %280 = vector.shape_cast %279 : vector<1x8x32xf32> to vector<8x32xf32>
    %281 = vector.shape_cast %278 : vector<8x32xf32> to vector<1x8x32xf32>
    tpu.vector_store %arg10[%c0_156, %c0_157, %c0_158], %281 {strides = array<i32>} : memref<1x8x32xf32, #tpu.memory_space<vmem>>, vector<1x8x32xf32>,
    return
  }
  func.func @transform_0(%arg0: i32, %arg1: i32) -> (i32, i32, i32) {
    %c0_i32 = arith.constant 0 : i32
    %c0_i32_0 = arith.constant 0 : i32
    %c0_i32_1 = arith.constant 0 : i32
    return %arg0, %c0_i32, %c0_i32_0 : i32, i32, i32
  }
  func.func @transform_1(%arg0: i32, %arg1: i32) -> (i32, i32) {
    %c0_i32 = arith.constant 0 : i32
    %c0_i32_0 = arith.constant 0 : i32
    %c0_i32_1 = arith.constant 0 : i32
    return %c0_i32, %c0_i32_0 : i32, i32
  }
  func.func @transform_2(%arg0: i32, %arg1: i32) -> (i32, i32) {
    %c0_i32 = arith.constant 0 : i32
    %c0_i32_0 = arith.constant 0 : i32
    %c0_i32_1 = arith.constant 0 : i32
    return %c0_i32, %c0_i32_0 : i32, i32
  }
  func.func @transform_3(%arg0: i32, %arg1: i32) -> (i32, i32) {
    %c0_i32 = arith.constant 0 : i32
    %c0_i32_0 = arith.constant 0 : i32
    %c0_i32_1 = arith.constant 0 : i32
    return %c0_i32, %c0_i32_0 : i32, i32
  }
  func.func @transform_4(%arg0: i32, %arg1: i32) -> (i32, i32, i32) {
    %c0_i32 = arith.constant 0 : i32
    %c0_i32_0 = arith.constant 0 : i32
    %c0_i32_1 = arith.constant 0 : i32
    %c0_i32_2 = arith.constant 0 : i32
    return %c0_i32, %c0_i32_0, %c0_i32_1 : i32, i32, i32
  }
  func.func @transform_5(%arg0: i32, %arg1: i32) -> (i32, i32, i32) {
    %c0_i32 = arith.constant 0 : i32
    %c0_i32_0 = arith.constant 0 : i32
    %c0_i32_1 = arith.constant 0 : i32
    %c0_i32_2 = arith.constant 0 : i32
    return %c0_i32, %c0_i32_0, %c0_i32_1 : i32, i32, i32
  }
  func.func @transform_6(%arg0: i32, %arg1: i32) -> (i32, i32, i32) {
    %c0_i32 = arith.constant 0 : i32
    %c0_i32_0 = arith.constant 0 : i32
    %c0_i32_1 = arith.constant 0 : i32
    %c0_i32_2 = arith.constant 0 : i32
    return %c0_i32, %c0_i32_0, %c0_i32_1 : i32, i32, i32
  }
  func.func @transform_7(%arg0: i32, %arg1: i32) -> (i32, i32) {
    %c0_i32 = arith.constant 0 : i32
    %c0_i32_0 = arith.constant 0 : i32
    %c0_i32_1 = arith.constant 0 : i32
    return %c0_i32, %c0_i32_0 : i32, i32
  }
  func.func @transform_8(%arg0: i32, %arg1: i32) -> (i32, i32, i32) {
    %c0_i32 = arith.constant 0 : i32
    %c0_i32_0 = arith.constant 0 : i32
    return %arg0, %arg1, %c0_i32 : i32, i32, i32
  }
}

</mosaic_0001>

<bundles_post_ra>
// kernel: tpu_custom_call.1
= control target key start
LH: loop header
LB: loop body
LE: loop exit
PB: predicated region body
PF: predicated region fallthrough
CT: control target
= control target key end

     0   :  { %13 = vsyncpa [#allocation6], 0  ;;  %s2387_s0 = inlined_call_operand.vmem [shape: f32[2,8,32], index: 0, kind: input, shape index: {}]   ;;  %s2388_s1 = inlined_call_operand.vmem [shape: bf16[32,32], index: 1, kind: input, shape index: {}]   ;;  %s2389_s2 = inlined_call_operand.vmem [shape: bf16[32,64], index: 2, kind: input, shape index: {}]   ;;  %s2390_s3 = inlined_call_operand.vmem [shape: bf16[32,32], index: 3, kind: input, shape index: {}]   ;;  %s2391_s4 = inlined_call_operand.vmem [shape: bf16[1,32,128], index: 4, kind: input, shape index: {}]   ;;  %s2392_s5 = inlined_call_operand.vmem [shape: bf16[1,128,32], index: 5, kind: input, shape index: {}]   ;;  %s2393_s6 = inlined_call_operand.vmem [shape: f32[1,1,128], index: 6, kind: input, shape index: {}]   ;;  %s2394_s7 = inlined_call_operand.hbm [shape: f32[9,32], index: 7, kind: input, shape index: {}]   ;;  %s2395_s8 = inlined_call_operand.hbm [shape: f32[2,8,32], index: 8, kind: output, shape index: {}]  }
   0x1   :  { %14 = vsyncpa [#allocation7], 0 }
   0x2   :  { %16 = vsyncpa [#allocation7 + $0x1], 0  ;;  %s2000_s27 = smov 0   ;;  %s2002_s28 = smov 0  }
   0x3   :  { %s2004_s29 = smov 0   ;;  %s2006_s30 = smov 0  }
   0x4   :  { %s2008_s9 = smov 0   ;;  %s2010_s10 = smov 0  }
   0x5 LB: > { %s1492_s11 = sadd.s32 4294967295, %s1931_s10   ;;  %s1493_s12 = sadd.s32 4294967294, %s1931_s10   ;;  %s1931_s10 = sphi %s2010_s10, %s22_s10   ;;  %s1927_s9 = sphi %s2008_s9, %s2413_s9   ;;  %s1923_s30 = sphi %s2006_s30, %s2412_s30   ;;  %s1919_s29 = sphi %s2004_s29, %s2411_s29   ;;  %s1915_s28 = sphi %s2002_s28, %s2410_s28   ;;  %s1911_s27 = sphi %s2000_s27, %s2409_s27  }
   0x6   : > { %s34_s13 = sadd.s32 1, %s1927_s9  ;;  %s216_s14 = sadd.s32 1, %s1919_s29 }
   0x7   : > { %p36_p0 = scmp.ge.s32.totalorder %s34_s13, 2  ;;  %p226_p1 = scmp.ne.s32.totalorder %s1919_s29, %s1915_s28 }
   0x8   : > { %p227_p2 = scmp.eq.s32.totalorder %s1492_s11, 1  ;;  %p232_p3 = scmp.ne.s32.totalorder %s1915_s28, %s1911_s27 }
   0x9   : > { %s2415_s13 = smov (%p36_p0, %s34_s13), 0  ;;  %p233_p5 = scmp.eq.s32.totalorder %s1493_s12, 1 }
   0xa   : > { %p2040_p4 = por %p227_p2, %p226_p1  ;;  %s211_s16 = ssub.s32 %s1927_s9, %s2415_s13 }
   0xb   : > { %p1494_p6 = scmp.ge.s32.totalorder %s1931_s10, 1  ;;  %p214_p7 = scmp.eq.s32.totalorder %s211_s16, 0 }
   0xc   : > { %s2400_s15 = scalar_select %p2040_p4, 1, 0 }
   0xd   : > { %p2047_p8 = por %p233_p5, %p232_p3  ;;  %p240_p9 = scmp.lt.s32.totalorder %s1931_s10, 3 }
   0xe   : > { %s2053_s18 = scalar_select %p214_p7, %s1919_s29, %s216_s14  }
   0xf   : > { %s2401_s17 = scalar_select %p2047_p8, 1, 0 }
  0x10   : > { %p2055_p10 = pnand %p1494_p6, %p240_p9  ;;  %p2059_p11 = scmp.eq.s32.totalorder %s1492_s11, 0 }
  0x11   : > { %s1933_s21 = smov [#allocation5]   ;;  %s1821_s26 = scalar_lea.hbm %s2394_s7, 256 }
  0x12   : > { %s2402_s19 = scalar_select %p2055_p10, 1, 0 }
  0x13   : > { %s2403_s20 = scalar_select %p2059_p11, 1, 0 }
  0x14   : > { %p1686_p12 = pneg %p2055_p10  ;;  %s270_s22 = sshll.u32 %s1933_s21, 4  ;;  %s271_s22 = int_to_ptr.vmem [resolvable:$true] %s270_s22 }
  0x15   : > { %p1822_p0 = scmp.ne.s32.totalorder %s2394_s7, %s1821_s26  ;;  %p1828_p5 = scmp.lt.u32.totalorder %s1821_s26, %s2394_s7 }
  0x16   : > { %p2067_p13 = pnand %p2059_p11, %p1686_p12 }
  0x18   : > { %p1823_p1 = pneg %p2067_p13 }
  0x1a   : > { %p1824_p2 = pnand %p1823_p1, %p1822_p0 }
  0x1c   : > { %p1825_p3 = pneg %p1824_p2 }
  0x1e   : > { %p1830_p6 = pnand %p1828_p5, %p1825_p3 }
  0x20   : > { %1833 = shalt.err (!%p1830_p6)
}
  0x21   : > { %s1834_s21 = scalar_lea.vmem %s271_s22, 256  ;;  %p1842_p8 = scmp.lt.s32.totalorder %s271_s22, %s271_s22 }
  0x22   : > { %p1835_p7 = scmp.ne.s32.totalorder %s271_s22, %s1834_s21  ;;  %p1843_p4 = scmp.lt.s32.totalorder %s1834_s21, %s1834_s21 }
  0x24   : > { %p1837_p9 = pnand %p1835_p7, %p1823_p1  ;;  %p1844_p11 = por %p1843_p4, %p1842_p8 }
  0x26   : > { %p1838_p12 = pneg %p1837_p9 }
  0x28   : > { %p1845_p10 = pnand %p1844_p11, %p1838_p12 }
  0x2a   : > { %1848 = shalt.err (!%p1845_p10)
}
  0x2b   : > { %s1934_s24 = smov 128   ;;  %s1935_s25 = smov 8  }
  0x2c   : > { %1689 = dma.hbm_to_vmem [thread:$0]  (!%p2067_p13), %s2394_s7, 256, %s271_s22, [#allocation6], %s1934_s24, %s1934_s24, %s1935_s25  }
  0x2d   : > { %p2405_p0 = scmp.ne.s32.totalorder %s2402_s19, 0 }
  0x2e   : > { %p2406_p2 = scmp.ne.s32.totalorder (!%p2405_p0), %s2403_s20, 0 }
  0x2f   : > { %293 = sbr.rel (%p2405_p0) target bundleno = 2648 (0xa58), region = 52 }
  0x36   : > { %1902 = dma.done.wait (%p2406_p2), [#allocation6], 256  }
  0x37   : > { %1904 = vsyncadd (%p2406_p2), [#allocation6], 4294967040  ;;  %p326_p4 = scmp.lt.s32.totalorder %s1923_s30, 1  ;;  %vm336_vm0 = vcmask 261120   ;;  %v1779_v12 = vld [vmem:[%s2388_s1] sm:$0xff]   ;;  %v1936_v13 = vmov 0.0  }
  0x38   : > { %1580 = vmatprep.subr.bf16.mxu1 %v1936_v13  ;;  %430 = vst.msk [vmem:[#allocation2] sm:$0xff] %vm336_vm0, %v1936_v13  ;;  %1608 = vmatprep.subr.bf16.mxu0 %v1936_v13  ;;  %v1780_v14 = vld [vmem:[%s2388_s1 + $0x8] sm:$0xff]   ;;  %vm1937_vm1 = vmmov 0   ;;  %v1501_v22 = vld [vmem:[#allocation5] ss:$0 sm:$0xff]  ;;  %v1781_v29 = vld [vmem:[%s2389_s2] sm:$0xff]  }
  0x39   : > { %s327_s26 = scalar_select %p326_p4, %s1923_s30, 1  ;;  %1581 = vmatpush3.bf16.msra.mxu1 %v1779_v12  ;;  %1584 = vmatprep.mubr.msk.bf16.mxu1 %vm1937_vm1, %v1936_v13  ;;  %v1502_v24 = vld [vmem:[#allocation5 + $0x1] ss:$0 sm:$0xff]  ;;  %v1782_v32 = vld [vmem:[%s2389_s2 + $0x8] sm:$0xff]   ;;  %v1503_v35 = vld [vmem:[#allocation5 + $0x4] ss:$0 sm:$0xff] }
  0x3a   : > { %1582 = vmatprep.subr.bf16.mxu1 %v1936_v13  ;;  %1610 = vmatprep.mubr.msk.bf16.mxu0 %vm1937_vm1, %v1936_v13  ;;  %v1510_v42 = vld [vmem:[#allocation5 + $0x5] ss:$0 sm:$0xff]  ;;  %vm525_vm2 = vcmask 64512   ;;  %s1939_s16 = smov 112   ;;  %s1940_s23 = smov 104   ;;  %vm427_vm3 = vcmask 31744  }
  0x3b   : > { %s1500_s14 = sshll.u32 %s327_s26, 3  ;;  %429 = vst.msk [vmem:[#allocation4] sm:$0xff] %vm427_vm3, %v1936_v13  ;;  %vm594_vm4 = vcmask 7168   ;;  %vm731_vm5 = vcmask 15368   ;;  %vm869_vm6 = vcmask 23568   ;;  %s1946_s19 = smov 88  }
  0x3c   : > { %s329_s21 = scalar_lea.vmem %s2387_s0, %s1500_s14  ;;  %s1938_s14 = smov 120   ;;  %vm1007_vm7 = vcmask 31768   ;;  %vm610_vm8 = vcmask 1043456   ;;  %vm794_vm9 = vcmask 130112   ;;  %vm932_vm10 = vcmask 195712  }
  0x3d   : > { %v2098_v0 = vld [vmem:[%s329_s21] sm:$0xff]  ;;  %1583 = vmatpush3.bf16.msra.mxu1 %v1780_v14  ;;  %s1944_s21 = smov 32   ;;  %s1947_s20 = smov 96   ;;  %vm1070_vm11 = vcmask 261312  }
  0x3e   : > { %v337_v1 = vsel %vm336_vm0, %v2098_v0, 0.0  ;;  %1588 = vmatprep.subr.bf16.mxu1 %v1936_v13  ;;  %s1948_s22 = smov 80   ;;  %s1950_s24 = smov 72  }
  0x3f   : > { %338 = vadd.xlane.f32.xlu0 %v337_v1  ;;  %s1951_s25 = smov 8   ;;  %s1952_s11 = smov 16  }
  0x40   : > { %s1953_s12 = smov 24   ;;  %p2407_p10 = scmp.ne.s32.totalorder %s2400_s15, 0 }
  0x43   : > { %435 = vadd.xlane.f32.xlu0 %v337_v1  ;;  %v1941_v1 = vmov -inf  }
  0x44   : > { %428 = vst.msk [vmem:[#allocation3] sm:$0xff] %vm427_vm3, %v1941_v1 }
  0xcc   : > { %v339_v2 = vpop.xlane.xlu0 %338 }
  0xcd   : > { %v341_v3 = vmul.f32 0.03125, %v339_v2  ;;  %v1942_v2 = vmov 0  }
  0xce   : > { %1766 = vset.pattern.permute.xlu1 %v1942_v2 }
  0xcf   : > { %v342_v4 = vsub.f32 %v2098_v0, %v341_v3 }
  0xd0   : > { %v436_v5 = vpop.xlane.xlu0 %435 }
  0xd1   : > { %v437_v6 = vmul.f32 0.03125, %v436_v5  ;;  %v343_v7 = vmul.f32 %v342_v4, %v342_v4 }
  0xd3   : > { %v438_v8 = vsub.f32 %v2098_v0, %v437_v6  ;;  %v344_v9 = vsel %vm336_vm0, %v343_v7, 0.0 }
  0xd4   : > { %345 = vadd.xlane.f32.xlu1 %v344_v9 }
  0xd5   : > { %v439_v10 = vmul.f32 %v438_v8, %v438_v8 }
  0xd7   : > { %v440_v11 = vsel %vm336_vm0, %v439_v10, 0.0 }
  0xd8   : > { %441 = vadd.xlane.f32.xlu1 %v440_v11 }
 0x161   : > { %v346_v15 = vpop.xlane.xlu1 %345 }
 0x162   : > { %v347_v16 = vmul.f32 0.03125, %v346_v15 }
 0x164   : > { %v348_v17 = vadd.f32 1e-05, %v347_v16 }
 0x165   : > { %v442_v18 = vpop.xlane.xlu1 %441 }
 0x166   : > { %1795 = vrsqrt.f32 %v348_v17  ;;  %v443_v19 = vmul.f32 0.03125, %v442_v18  ;;  %v1943_v17 = vmov 1  }
 0x167   : > { %1767 = vset.pattern.permute.xlu0 %v1943_v17 }
 0x168   : > { %v444_v20 = vadd.f32 1e-05, %v443_v19 }
 0x16a   : > { %1797 = vrsqrt.f32 %v444_v20  ;;  %v2178_v20 = vld [vmem:[#allocation3] sm:$0xff] }
 0x170   : > { %v1796_v21 = vpop.eup %1795 }
 0x171   : > { %v350_v23 = vmul.f32 %v1796_v21, %v342_v4 }
 0x173   : > { %v355_v25 = vmul.f32 %v1501_v22, %v350_v23  ;;  %v1511_v23 = vld [vmem:[#allocation5 + $0x6] ss:$0 sm:$0xff] }
 0x174   : > { %v1798_v26 = vpop.eup %1797 }
 0x175   : > { %v446_v27 = vmul.f32 %v1798_v26, %v438_v8  ;;  %v360_v28 = vadd.f32 %v1502_v24, %v355_v25  ;;  %v1945_v25 = vmov 2  }
 0x177   : > { %v361_v30 = vpack.c.bf16 %v360_v28, %v360_v28  ;;  %v447_v31 = vmul.f32 %v1501_v22, %v446_v27 }
 0x179   : > { %1585 = vmatmul.mubr.msk.bf16.vlgmr.msra.gmra.mrb[0].mxu1 %vm336_vm0, %v361_v30  ;;  %v448_v33 = vadd.f32 %v1502_v24, %v447_v31 }
 0x17a   : > { %1589 = vmatpush3.bf16.msra.mxu1 %v1781_v29  ;;  %1592 = vmatprep.mubr.msk.bf16.mxu1 %vm1937_vm1, %v1936_v13 }
 0x17b   : > { %1590 = vmatprep.subr.bf16.mxu1 %v1936_v13  ;;  %v449_v34 = vpack.c.bf16 %v448_v33, %v448_v33 }
 0x17e   : > { %1591 = vmatpush3.bf16.msra.mxu1 %v1782_v32 }
 0x17f   : > { %1596 = vmatprep.subr.bf16.mxu1 %v1936_v13 }
 0x181   : > { %1593 = vmatmul.mubr.msk.bf16.vlgmr.msra.gmra.mrb[4].mxu1 %vm336_vm0, %v449_v34 }
 0x182   : > { %1598 = vmatprep.mubr.msk.bf16.mxu1 %vm1937_vm1, %v1936_v13 }
 0x24c   : > { %v420_v36 = vpop.f32.mrb[0].mxu1 }
 0x24d   : > { %v421_v37 = vadd.f32 %v1503_v35, %v420_v36  ;;  %v1586_v38 = vpop.f32.mrb[1].mxu1 }
 0x24e   : > { %v423_v39 = vpop.f32.mrb[2].mxu1 }
 0x24f   : > { %v426_v40 = vpack.c.bf16 %v421_v37, %v421_v37  ;;  %v1587_v41 = vpop.f32.mrb[3].mxu1 }
 0x250   : > { %v1949_v41 = vmov 3  }
 0x251   : > { %658 = vrot.lane.b32.xlu1 %v426_v40, %s1938_s14 }
 0x254   : > { %v2136_v43 = vpop.f32.mrb[4].mxu1 }
 0x255   : > { %v513_v44 = vadd.f32 %v1510_v42, %v2136_v43  ;;  %v1594_v45 = vpop.f32.mrb[5].mxu1 }
 0x256   : > { %v506_v46 = vpop.f32.mrb[6].mxu1 }
 0x257   : > { %v514_v47 = vpack.c.bf16 %v513_v44, %v513_v44  ;;  %v1595_v48 = vpop.f32.mrb[7].mxu1 }
 0x259   : > { %799 = vrot.lane.b32.xlu1 %v514_v47, %s1939_s16  ;;  %661 = vrot.lane.b32.xlu0 %v514_v47, %s1938_s14  ;;  %v530_v49 = vsel %vm525_vm2, %v514_v47, 0 }
 0x25a   : > { %1597 = vmatpush3.bf16.xpose.msra.mxu1 %v530_v49 }
 0x25b   : > { %1602 = vmatprep.subr.bf16.mxu1 %v1936_v13 }
 0x25d   : > { %797 = vrot.lane.b32.xlu1 %v426_v40, %s1939_s16  ;;  %937 = vrot.lane.b32.xlu0 %v514_v47, %s1940_s23  ;;  %s323_s16 = sand.u32 1, %s1915_s28  }
 0x261   : > { %935 = vrot.lane.b32.xlu1 %v426_v40, %s1940_s23  ;;  %1599 = vmatmul.mubr.msk.bf16.vlgmr.msra.gmra.mrb[8].mxu1 %vm525_vm2, %v426_v40  ;;  %s1499_s23 = sshll.u32 %s323_s16, 3 }
 0x262   : > { %1604 = vmatprep.mubr.msk.bf16.mxu1 %vm1937_vm1, %v1936_v13 }
 0x2c3   : > { %v659_v52 = vpop.permute.xlu1 %658 }
 0x2cb   : > { %v662_v50 = vpop.permute.xlu0 %661  ;;  %v800_v53 = vpop.permute.xlu1 %799 }
 0x2cc   : > { %v667_v51 = vsel %vm525_vm2, %v662_v50, 0  ;;  %v805_v54 = vsel %vm525_vm2, %v800_v53, 0 }
 0x2cd   : > { %1609 = vmatpush3.bf16.xpose.msra.mxu0 %v667_v51 }
 0x2ce   : > { %1620 = vmatprep.subr.bf16.mxu0 %v1936_v13 }
 0x2cf   : > { %v938_v55 = vpop.permute.xlu0 %937  ;;  %v798_v56 = vpop.permute.xlu1 %797 }
 0x2d0   : > { %v943_v57 = vsel %vm525_vm2, %v938_v55, 0 }
 0x2d3   : > { %v936_v58 = vpop.permute.xlu1 %935 }
 0x2d4   : > { %1611 = vmatmul.mubr.msk.bf16.vlgmr.msra.gmra.mrb[0].mxu0 %vm525_vm2, %v659_v52 }
 0x2d5   : > { %1621 = vmatpush3.bf16.xpose.msra.mxu0 %v805_v54  ;;  %1622 = vmatprep.mubr.msk.bf16.mxu0 %vm1937_vm1, %v1936_v13 }
 0x2d6   : > { %1632 = vmatprep.subr.bf16.mxu0 %v1936_v13 }
 0x2dc   : > { %1623 = vmatmul.mubr.msk.bf16.vlgmr.msra.gmra.mrb[4].mxu0 %vm525_vm2, %v798_v56 }
 0x2dd   : > { %1633 = vmatpush3.bf16.xpose.msra.mxu0 %v943_v57  ;;  %1634 = vmatprep.mubr.msk.bf16.mxu0 %vm1937_vm1, %v1936_v13 }
 0x2de   : > { %1644 = vmatprep.subr.bf16.mxu0 %v1936_v13 }
 0x2e4   : > { %1635 = vmatmul.mubr.msk.bf16.vlgmr.msra.gmra.mrb[8].mxu0 %vm525_vm2, %v936_v58 }
 0x2e5   : > { %1648 = vmatprep.mubr.msk.bf16.mxu0 %vm1937_vm1, %v1936_v13 }
 0x334   : > { %v2159_v59 = vpop.f32.mrb[8].mxu1 }
 0x335   : > { %v1600_v60 = vpop.f32.mrb[9].mxu1  ;;  %v573_v61 = vsel %vm525_vm2, %v2159_v59, -inf }
 0x336   : > { %574 = vmax.xlane.f32.xlu0 %v573_v61  ;;  %v569_v62 = vpop.f32.mrb[10].mxu1 }
 0x337   : > { %v1601_v63 = vpop.f32.mrb[11].mxu1 }
 0x3a7   : > { %v2165_v3 = vpop.f32.mrb[0].mxu0 }
 0x3a8   : > { %v1612_v4 = vpop.f32.mrb[1].mxu0  ;;  %v710_v5 = vsel %vm525_vm2, %v2165_v3, -inf }
 0x3a9   : > { %711 = vmax.xlane.f32.xlu1 %v710_v5  ;;  %v706_v6 = vpop.f32.mrb[2].mxu0 }
 0x3aa   : > { %v1613_v7 = vpop.f32.mrb[3].mxu0 }
 0x3af   : > { %v2169_v8 = vpop.f32.mrb[4].mxu0 }
 0x3b0   : > { %v1624_v9 = vpop.f32.mrb[5].mxu0  ;;  %v848_v10 = vsel %vm525_vm2, %v2169_v8, -inf }
 0x3b1   : > { %v844_v11 = vpop.f32.mrb[6].mxu0  ;;  %849 = vmax.xlane.f32.xlu0 %v848_v10 }
 0x3b2   : > { %v1625_v12 = vpop.f32.mrb[7].mxu0 }
 0x3b7   : > { %v2173_v14 = vpop.f32.mrb[8].mxu0 }
 0x3b8   : > { %v1636_v15 = vpop.f32.mrb[9].mxu0  ;;  %v986_v16 = vsel %vm525_vm2, %v2173_v14, -inf }
 0x3b9   : > { %987 = vmax.xlane.f32.xlu1 %v986_v16  ;;  %v982_v18 = vpop.f32.mrb[10].mxu0 }
 0x3ba   : > { %v1637_v19 = vpop.f32.mrb[11].mxu0  ;;  %v588_v18 = vld [vmem:[#allocation4] sm:$0xff] }
 0x3c3   : > { %v575_v21 = vpop.xlane.xlu0 %574 }
 0x3c4   : > { %v2181_v22 = vmax.f32 %v2178_v20, %v575_v21 }
 0x3c6   : > { %v577_v24 = vsub.f32 %v2178_v20, %v2181_v22  ;;  %656 = vst.msk [vmem:[#allocation3] sm:$0xff] %vm594_vm4, %v2181_v22 }
 0x3c7   : > { %520 = vrot.lane.b32.xlu0 %v1511_v23, %s1944_s21  ;;  %s1540_s21 = sshll.u32 %s1923_s30, 7  ;;  %s1954_s30 = smov [#allocation8]  }
 0x3c8   : > { %v578_v15 = vmul.f32 1.442695, %v577_v24  ;;  %s1853_s26 = sshll.u32 %s1954_s30, 4  ;;  %s1854_s26 = int_to_ptr.vmem [resolvable:$false] %s1853_s26 }
 0x3c9   : > { %s1855_s14 = scalar_lea.vmem %s1854_s26, 256 }
 0x3ca   : > { %582 = vperm.xlu1 %1766, %v2181_v22  }
 0x3cd   : > { %v709_v27 = vld [vmem:[#allocation3] sm:$0xff] }
 0x3ce   : > { %1768 = vset.pattern.permute.xlu1 %v1945_v25 }
 0x436   : > { %v712_v26 = vpop.xlane.xlu1 %711 }
 0x437   : > { %v713_v28 = vmax.f32 %v709_v27, %v712_v26 }
 0x439   : > { %v714_v29 = vsub.f32 %v709_v27, %v713_v28  ;;  %796 = vst.msk [vmem:[#allocation3] sm:$0xff] %vm731_vm5, %v713_v28  ;;  %719 = vperm.xlu0 %1767, %v713_v28  }
 0x43d   : > { %1770 = vset.pattern.permute.xlu0 %v1942_v2 }
 0x43e   : > { %v850_v30 = vpop.xlane.xlu0 %849 }
 0x440   : > { %v2191_v31 = vld [vmem:[#allocation3] sm:$0xff] }
 0x441   : > { %v2194_v32 = vmax.f32 %v2191_v31, %v850_v30 }
 0x442   : > { %v521_v33 = vpop.permute.xlu0 %520 }
 0x443   : > { %v852_v34 = vsub.f32 %v2191_v31, %v2194_v32  ;;  %934 = vst.msk [vmem:[#allocation3] sm:$0xff] %vm869_vm6, %v2194_v32  ;;  %v523_v35 = vadd.f32 %v521_v33, %v2136_v43 }
 0x445   : > { %v524_v36 = vpack.c.bf16 %v523_v35, %v523_v35  ;;  %v853_v20 = vmul.f32 1.442695, %v852_v34 }
 0x446   : > { %v988_v37 = vpop.xlane.xlu1 %987 }
 0x447   : > { %741 = vrot.lane.b32.xlu0 %v524_v36, %s1946_s19  ;;  %605 = vrot.lane.b32.xlu1 %v524_v36, %s1947_s20  ;;  %s325_s19 = scalar_lea.vmem [#allocation8], %s1499_s23 }
 0x448   : > { %s1410_s20 = sshll.u32 %s325_s19, 4  ;;  %s2341_s20 = int_to_ptr.vmem [resolvable:$true] %s1410_s20 }
 0x449   : > { %p1856_p1 = scmp.lt.s32.totalorder %s2341_s20, %s1854_s26 }
 0x44a   : > { %v2201_v38 = vld [vmem:[#allocation3] sm:$0xff]  ;;  %v583_v42 = vpop.permute.xlu1 %582 }
 0x44b   : > { %v2204_v39 = vmax.f32 %v2201_v38, %v988_v37  ;;  %879 = vrot.lane.b32.xlu0 %v524_v36, %s1948_s22  ;;  %857 = vperm.xlu1 %1768, %v2194_v32   ;;  %v585_v43 = vsub.f32 %v2159_v59, %v583_v42  ;;  %v715_v59 = vmul.f32 1.442695, %v714_v29 }
 0x44d   : > { %v990_v40 = vsub.f32 %v2201_v38, %v2204_v39  ;;  %1072 = vst.msk [vmem:[#allocation3] sm:$0xff] %vm1007_vm7, %v2204_v39  ;;  %v586_v44 = vmul.f32 1.442695, %v585_v43  ;;  %v596_v38 = vld [vmem:[#allocation2] sm:$0xff] }
 0x44f   : > { %1769 = vset.pattern.permute.xlu1 %v1949_v41  ;;  %1799 = vpow2.f32 %v586_v44  ;;  %v991_v22 = vmul.f32 1.442695, %v990_v40 }
 0x450   : > { %995 = vperm.xlu1 %1769, %v2204_v39  }
 0x454   : > { %1017 = vrot.lane.b32.xlu1 %v524_v36, %s1950_s24 }
 0x455   : > { %1771 = vset.pattern.permute.xlu1 %v1943_v17 }
 0x459   : > { %v1800_v45 = vpop.eup %1799 }
 0x45a   : > { %v590_v46 = vsel %vm525_vm2, %v1800_v45, 0.0  ;;  %v603_v53 = vpack.c.bf16 %v1800_v45, %v1800_v45 }
 0x46a   : > { %591 = vadd.xlane.f32.xlu0 %v590_v46 }
 0x4b8   : > { %v720_v47 = vpop.permute.xlu0 %719 }
 0x4b9   : > { %v722_v48 = vsub.f32 %v2165_v3, %v720_v47  ;;  %v606_v49 = vpop.permute.xlu1 %605 }
 0x4ba   : > { %v612_v50 = vsel %vm610_vm8, %v606_v49, 0 }
 0x4bb   : > { %v723_v51 = vmul.f32 1.442695, %v722_v48  ;;  %1603 = vmatpush3.bf16.msra.mxu1 %v612_v50 }
 0x4bc   : > { %v742_v52 = vpop.permute.xlu0 %741  ;;  %1614 = vmatprep.subr.bf16.mxu1 %v1936_v13 }
 0x4bd   : > { %1801 = vpow2.f32 %v723_v51  ;;  %v747_v54 = vsel %vm610_vm8, %v742_v52, 0 }
 0x4be   : > { %1605 = vmatmul.mubr.msk.bf16.vlgmr.msra.gmra.mrb[12].mxu1 %vm525_vm2, %v603_v53  ;;  %1803 = vpow2.f32 %v715_v59 }
 0x4bf   : > { %1615 = vmatpush3.bf16.msra.mxu1 %v747_v54  ;;  %1616 = vmatprep.mubr.msk.bf16.mxu1 %vm1937_vm1, %v1936_v13 }
 0x4c0   : > { %1626 = vmatprep.subr.bf16.mxu1 %v1936_v13  ;;  %v880_v56 = vpop.permute.xlu0 %879 }
 0x4c1   : > { %v885_v60 = vsel %vm610_vm8, %v880_v56, 0 }
 0x4c7   : > { %v1802_v55 = vpop.eup %1801 }
 0x4c8   : > { %v727_v57 = vsel %vm525_vm2, %v1802_v55, 0.0  ;;  %v740_v58 = vpack.c.bf16 %v1802_v55, %v1802_v55  ;;  %v1804_v5 = vpop.eup %1803 }
 0x4c9   : > { %728 = vadd.xlane.f32.xlu1 %v727_v57 }
 0x4ca   : > { %v858_v61 = vpop.permute.xlu1 %857  ;;  %1617 = vmatmul.mubr.msk.bf16.vlgmr.msra.gmra.mrb[16].mxu1 %vm525_vm2, %v740_v58 }
 0x4cb   : > { %v860_v62 = vsub.f32 %v2169_v8, %v858_v61  ;;  %1627 = vmatpush3.bf16.msra.mxu1 %v885_v60  ;;  %1628 = vmatprep.mubr.msk.bf16.mxu1 %vm1937_vm1, %v1936_v13  ;;  %v1783_v61 = vld [vmem:[%s2390_s3] sm:$0xff]  }
 0x4cc   : > { %1638 = vmatprep.subr.bf16.mxu1 %v1936_v13  ;;  %1645 = vmatpush3.bf16.msra.mxu0 %v1783_v61  ;;  %v1794_v61 = vld [vmem:[%s2392_s5 + $0x38] sm:$0xff]  }
 0x4cd   : > { %v861_v63 = vmul.f32 1.442695, %v860_v62  ;;  %v1784_v62 = vld [vmem:[%s2390_s3 + $0x8] sm:$0xff]   ;;  %1646 = vmatprep.subr.bf16.mxu0 %v1936_v13 }
 0x4cf   : > { %1805 = vpow2.f32 %v861_v63  ;;  %v996_v1 = vpop.permute.xlu1 %995 }
 0x4d0   : > { %v998_v3 = vsub.f32 %v2173_v14, %v996_v1  ;;  %1647 = vmatpush3.bf16.msra.mxu0 %v1784_v62  ;;  %v1526_v62 = vld [vmem:[%s2393_s6] ss:$0 sm:$0xff] }
 0x4d1   : > { %1660 = vmatprep.subr.bf16.mxu0 %v1936_v13 }
 0x4d2   : > { %v999_v4 = vmul.f32 1.442695, %v998_v3 }
 0x4d3   : > { %v1018_v7 = vpop.permute.xlu1 %1017 }
 0x4d4   : > { %1807 = vpow2.f32 %v999_v4  ;;  %v1023_v10 = vsel %vm610_vm8, %v1018_v7, 0 }
 0x4d5   : > { %1809 = vpow2.f32 %v578_v15 }
 0x4d6   : > { %1811 = vpow2.f32 %v853_v20 }
 0x4d7   : > { %1813 = vpow2.f32 %v991_v22 }
 0x4d9   : > { %v1806_v6 = vpop.eup %1805 }
 0x4da   : > { %736 = vperm.xlu1 %1771, %v1804_v5   ;;  %v865_v8 = vsel %vm525_vm2, %v1806_v6, 0.0  ;;  %v878_v9 = vpack.c.bf16 %v1806_v6, %v1806_v6 }
 0x4db   : > { %866 = vadd.xlane.f32.xlu0 %v865_v8 }
 0x4dc   : > { %1629 = vmatmul.mubr.msk.bf16.vlgmr.msra.gmra.mrb[20].mxu1 %vm525_vm2, %v878_v9 }
 0x4dd   : > { %1639 = vmatpush3.bf16.msra.mxu1 %v1023_v10  ;;  %1640 = vmatprep.mubr.msk.bf16.mxu1 %vm1937_vm1, %v1936_v13 }
 0x4de   : > { %v1808_v11 = vpop.eup %1807  ;;  %1772 = vset.pattern.permute.xlu1 %v1945_v25  ;;  %1652 = vmatprep.subr.bf16.mxu1 %v1936_v13 }
 0x4df   : > { %v1003_v12 = vsel %vm525_vm2, %v1808_v11, 0.0  ;;  %v1016_v14 = vpack.c.bf16 %v1808_v11, %v1808_v11  ;;  %v1810_v16 = vpop.eup %1809 }
 0x4e0   : > { %1004 = vadd.xlane.f32.xlu0 %v1003_v12  ;;  %v589_v19 = vmul.f32 %v1810_v16, %v588_v18  ;;  %v1812_v30 = vpop.eup %1811 }
 0x4e1   : > { %v1814_v36 = vpop.eup %1813 }
 0x4e4   : > { %1641 = vmatmul.mubr.msk.bf16.vlgmr.msra.gmra.mrb[24].mxu1 %vm525_vm2, %v1016_v14 }
 0x4e5   : > { %1656 = vmatprep.mubr.msk.bf16.mxu1 %vm1937_vm1, %v1936_v13 }
 0x4f6   : > { %599 = vperm.xlu0 %1770, %v1810_v16  }
 0x4f7   : > { %v592_v21 = vpop.xlane.xlu0 %591 }
 0x4f8   : > { %v593_v23 = vadd.f32 %v592_v21, %v589_v19 }
 0x4fa   : > { %595 = vst.msk [vmem:[#allocation4] sm:$0xff] %vm594_vm4, %v593_v23  ;;  %1776 = vset.pattern.permute.xlu0 %v1945_v25 }
 0x501   : > { %v725_v26 = vld [vmem:[#allocation4] sm:$0xff] }
 0x502   : > { %v726_v27 = vmul.f32 %v1804_v5, %v725_v26 }
 0x556   : > { %v729_v28 = vpop.xlane.xlu1 %728 }
 0x557   : > { %v730_v29 = vadd.f32 %v729_v28, %v726_v27 }
 0x559   : > { %732 = vst.msk [vmem:[#allocation4] sm:$0xff] %vm731_vm5, %v730_v29 }
 0x560   : > { %v863_v24 = vld [vmem:[#allocation4] sm:$0xff] }
 0x561   : > { %v864_v33 = vmul.f32 %v1812_v30, %v863_v24 }
 0x568   : > { %v867_v25 = vpop.xlane.xlu0 %866 }
 0x569   : > { %v868_v35 = vadd.f32 %v867_v25, %v864_v33 }
 0x56b   : > { %870 = vst.msk [vmem:[#allocation4] sm:$0xff] %vm869_vm6, %v868_v35 }
 0x56d   : > { %v1005_v31 = vpop.xlane.xlu0 %1004 }
 0x572   : > { %v1001_v37 = vld [vmem:[#allocation4] sm:$0xff] }
 0x573   : > { %v1002_v42 = vmul.f32 %v1814_v36, %v1001_v37 }
 0x575   : > { %v1006_v32 = vadd.f32 %v1005_v31, %v1002_v42  ;;  %v600_v39 = vpop.permute.xlu0 %599 }
 0x576   : > { %v602_v40 = vmul.f32 %v600_v39, %v596_v38 }
 0x577   : > { %1008 = vst.msk [vmem:[#allocation4] sm:$0xff] %vm1007_vm7, %v1006_v32 }
 0x57e   : > { %v1093_v34 = vld [vmem:[#allocation4] sm:$0xff] }
 0x57f   : > { %1815 = vrcp.f32 %v1093_v34 }
 0x589   : > { %v1816_v43 = vpop.eup %1815 }
 0x58a   : > { %1098 = vperm.xlu0 %1776, %v1816_v43  }
 0x58e   : > { %1778 = vset.pattern.permute.xlu0 %v1949_v41 }
 0x591   : > { %v648_v44 = vpop.f32.mrb[12].mxu1 }
 0x592   : > { %v654_v45 = vadd.f32 %v648_v44, %v602_v40  ;;  %v1606_v46 = vpop.f32.mrb[13].mxu1  ;;  %v1785_v40 = vld [vmem:[%s2391_s4] sm:$0xff]  }
 0x593   : > { %v651_v47 = vpop.f32.mrb[14].mxu1  ;;  %1653 = vmatpush3.bf16.msra.mxu1 %v1785_v40  ;;  %v1787_v44 = vld [vmem:[%s2392_s5] sm:$0xff]   ;;  %v1789_v46 = vld [vmem:[%s2392_s5 + $0x10] sm:$0xff]  }
 0x594   : > { %655 = vst.msk [vmem:[#allocation2] sm:$0xff] %vm525_vm2, %v654_v45  ;;  %v1607_v48 = vpop.f32.mrb[15].mxu1  ;;  %1654 = vmatprep.subr.bf16.mxu1 %v1936_v13  ;;  %v1788_v45 = vld [vmem:[%s2392_s5 + $0x8] sm:$0xff]  }
 0x59d   : > { %v783_v49 = vpop.f32.mrb[16].mxu1 }
 0x59e   : > { %790 = vrot.lane.b32.xlu1 %v783_v49, %s1951_s25  ;;  %v1618_v50 = vpop.f32.mrb[17].mxu1  ;;  %s2339_s25 = scalar_lea.hbm %s2395_s8, %s1540_s21 }
 0x59f   : > { %v786_v51 = vpop.f32.mrb[18].mxu1 }
 0x5a0   : > { %v1619_v52 = vpop.f32.mrb[19].mxu1  ;;  %v1524_v51 = vld [vmem:[#allocation5 + $0x2] ss:$0 sm:$0xff] }
 0x5a2   : > { %874 = vperm.xlu1 %1772, %v1812_v30   ;;  %v1520_v30 = vld [vmem:[#allocation5 + $0x7] ss:$0 sm:$0xff] }
 0x5a6   : > { %1773 = vset.pattern.permute.xlu1 %v1949_v41 }
 0x5af   : > { %v921_v53 = vpop.f32.mrb[20].mxu1 }
 0x5b0   : > { %928 = vrot.lane.b32.xlu1 %v921_v53, %s1952_s11  ;;  %v1630_v54 = vpop.f32.mrb[21].mxu1  ;;  %v1525_v53 = vld [vmem:[#allocation5 + $0x3] ss:$0 sm:$0xff]  ;;  %s1396_s11 = scalar_lea.sflag [#allocation7], %s323_s16 }
 0x5b1   : > { %v924_v55 = vpop.f32.mrb[22].mxu1 }
 0x5b2   : > { %v1631_v56 = vpop.f32.mrb[23].mxu1 }
 0x5b4   : > { %1012 = vperm.xlu1 %1773, %v1814_v36  }
 0x5b7   : > { %v1059_v57 = vpop.f32.mrb[24].mxu1 }
 0x5b8   : > { %1066 = vrot.lane.b32.xlu1 %v1059_v57, %s1953_s12  ;;  %v1642_v58 = vpop.f32.mrb[25].mxu1  ;;  %v1790_v57 = vld [vmem:[%s2392_s5 + $0x18] sm:$0xff]   ;;  %s1849_s12 = scalar_lea.vmem %s2341_s20, 128 }
 0x5b9   : > { %v1062_v59 = vpop.f32.mrb[26].mxu1  ;;  %1774 = vset.pattern.permute.xlu1 %v1942_v2  ;;  %v737_v2 = vpop.permute.xlu1 %736  ;;  %v1791_v58 = vld [vmem:[%s2392_s5 + $0x20] sm:$0xff]   ;;  %p1850_p8 = scmp.ne.s32.totalorder %s2341_s20, %s1849_s12  ;;  %p1857_p3 = scmp.lt.s32.totalorder %s1855_s14, %s1849_s12 }
 0x5ba   : > { %v1643_v60 = vpop.f32.mrb[27].mxu1  ;;  %v1792_v59 = vld [vmem:[%s2392_s5 + $0x28] sm:$0xff]  }
 0x5bb   : > { %v1793_v60 = vld [vmem:[%s2392_s5 + $0x30] sm:$0xff]   ;;  %p1851_p11 = pnand %p1850_p8, %p2407_p10  ;;  %p1858_p5 = por %p1857_p3, %p1856_p1 }
 0x5bc   : > { %1078 = vperm.xlu1 %1774, %v1816_v43  }
 0x5bd   : > { %p1852_p13 = pneg %p1851_p11 }
 0x5bf   : > { %p1859_p6 = pnand %p1858_p5, %p1852_p13 }
 0x5c0   : > { %1775 = vset.pattern.permute.xlu1 %v1943_v17  ;;  %v733_v17 = vld [vmem:[#allocation2] sm:$0xff] }
 0x5c1   : > { %1088 = vperm.xlu1 %1775, %v1816_v43   ;;  %v739_v63 = vmul.f32 %v737_v2, %v733_v17 }
 0x5c5   : > { %1777 = vset.pattern.permute.xlu1 %v1949_v41 }
 0x5c6   : > { %1108 = vperm.xlu1 %1777, %v1816_v43  }
 0x609   : > { %v1099_v23 = vpop.permute.xlu0 %1098 }
 0x610   : > { %v791_v41 = vpop.permute.xlu1 %790 }
 0x611   : > { %v793_v1 = vadd.f32 %v791_v41, %v739_v63 }
 0x613   : > { %795 = vst.msk [vmem:[#allocation2] sm:$0xff] %vm794_vm9, %v793_v1 }
 0x61a   : > { %v871_v4 = vld [vmem:[#allocation2] sm:$0xff] }
 0x621   : > { %v875_v3 = vpop.permute.xlu1 %874 }
 0x622   : > { %v877_v5 = vmul.f32 %v875_v3, %v871_v4 }
 0x625   : > { %v929_v6 = vpop.permute.xlu1 %928 }
 0x626   : > { %v931_v7 = vadd.f32 %v929_v6, %v877_v5 }
 0x628   : > { %933 = vst.msk [vmem:[#allocation2] sm:$0xff] %vm932_vm10, %v931_v7 }
 0x62f   : > { %v1009_v9 = vld [vmem:[#allocation2] sm:$0xff] }
 0x633   : > { %v1013_v8 = vpop.permute.xlu1 %1012 }
 0x634   : > { %v1015_v10 = vmul.f32 %v1013_v8, %v1009_v9 }
 0x637   : > { %v1067_v11 = vpop.permute.xlu1 %1066 }
 0x638   : > { %v1069_v12 = vadd.f32 %v1067_v11, %v1015_v10 }
 0x63a   : > { %1071 = vst.msk [vmem:[#allocation2] sm:$0xff] %vm1070_vm11, %v1069_v12 }
 0x63b   : > { %v1079_v15 = vpop.permute.xlu1 %1078 }
 0x640   : > { %v1089_v19 = vpop.permute.xlu1 %1088 }
 0x641   : > { %v1075_v14 = vld [vmem:[#allocation2] sm:$0xff] }
 0x642   : > { %v1081_v16 = vmul.f32 %v1079_v15, %v1075_v14 }
 0x644   : > { %1082 = vst.msk [vmem:[#allocation2] sm:$0xff] %vm525_vm2, %v1081_v16  ;;  %v1538_v16 = vld [vmem:[#allocation5 + $0x8] ss:$0 sm:$0xff] }
 0x645   : > { %v1109_v29 = vpop.permute.xlu1 %1108 }
 0x64b   : > { %v1085_v18 = vld [vmem:[#allocation2] sm:$0xff] }
 0x64c   : > { %v1091_v21 = vmul.f32 %v1089_v19, %v1085_v18 }
 0x64e   : > { %1092 = vst.msk [vmem:[#allocation2] sm:$0xff] %vm794_vm9, %v1091_v21 }
 0x655   : > { %v1095_v26 = vld [vmem:[#allocation2] sm:$0xff] }
 0x656   : > { %v1101_v27 = vmul.f32 %v1099_v23, %v1095_v26 }
 0x658   : > { %1102 = vst.msk [vmem:[#allocation2] sm:$0xff] %vm932_vm10, %v1101_v27 }
 0x65f   : > { %v1105_v28 = vld [vmem:[#allocation2] sm:$0xff] }
 0x660   : > { %v1111_v20 = vmul.f32 %v1109_v29, %v1105_v28 }
 0x662   : > { %1112 = vst.msk [vmem:[#allocation2] sm:$0xff] %vm1070_vm11, %v1111_v20 }
 0x669   : > { %v1113_v22 = vld [vmem:[#allocation2] sm:$0xff] }
 0x66a   : > { %v1114_v24 = vpack.c.bf16 %v1113_v22, %v1113_v22  ;;  %1206 = vst.msk [vmem:[#allocation2] sm:$0xff] %vm336_vm0, %v1936_v13 }
 0x66c   : > { %1649 = vmatmul.mubr.msk.bf16.vlgmr.msra.gmra.mrb[12].mxu0 %vm336_vm0, %v1114_v24 }
 0x66d   : > { %1676 = vmatprep.mubr.msk.bf16.mxu0 %vm1937_vm1, %v1936_v13  ;;  %1661 = vmatpush3.bf16.msra.mxu0 %v1787_v44 }
 0x66e   : > { %1662 = vmatprep.subr.bf16.mxu0 %v1936_v13 }
 0x671   : > { %1663 = vmatpush3.bf16.msra.mxu0 %v1788_v45  ;;  %v1278_v8 = vld [vmem:[#allocation2] sm:$0xff] }
 0x672   : > { %1664 = vmatprep.subr.bf16.mxu0 %v1936_v13 }
 0x675   : > { %1665 = vmatpush3.bf16.msra.mxu0 %v1789_v46 }
 0x676   : > { %1666 = vmatprep.subr.bf16.mxu0 %v1936_v13 }
 0x679   : > { %1667 = vmatpush3.bf16.msra.mxu0 %v1790_v57 }
 0x67a   : > { %1668 = vmatprep.subr.bf16.mxu0 %v1936_v13 }
 0x67d   : > { %1669 = vmatpush3.bf16.msra.mxu0 %v1791_v58 }
 0x67e   : > { %1670 = vmatprep.subr.bf16.mxu0 %v1936_v13 }
 0x681   : > { %1671 = vmatpush3.bf16.msra.mxu0 %v1792_v59 }
 0x682   : > { %1672 = vmatprep.subr.bf16.mxu0 %v1936_v13 }
 0x685   : > { %1673 = vmatpush3.bf16.msra.mxu0 %v1793_v60 }
 0x686   : > { %1674 = vmatprep.subr.bf16.mxu0 %v1936_v13 }
 0x689   : > { %1675 = vmatpush3.bf16.msra.mxu0 %v1794_v61 }
 0x73f   : > { %v1173_v33 = vpop.f32.mrb[12].mxu0 }
 0x740   : > { %v1174_v25 = vadd.f32 %v1520_v30, %v1173_v33  ;;  %v1650_v35 = vpop.f32.mrb[13].mxu0 }
 0x741   : > { %v1176_v36 = vpop.f32.mrb[14].mxu0 }
 0x742   : > { %v2284_v37 = vadd.f32 %v1174_v25, %v2098_v0  ;;  %v1651_v42 = vpop.f32.mrb[15].mxu0  ;;  %v1786_v0 = vld [vmem:[%s2391_s4 + $0x8] sm:$0xff]  }
 0x743   : > { %1655 = vmatpush3.bf16.msra.mxu1 %v1786_v0 }
 0x744   : > { %v1182_v31 = vsel %vm336_vm0, %v2284_v37, 0.0 }
 0x745   : > { %1183 = vadd.xlane.f32.xlu1 %v1182_v31 }
 0x7d2   : > { %v1184_v32 = vpop.xlane.xlu1 %1183 }
 0x7d3   : > { %v1185_v34 = vmul.f32 0.03125, %v1184_v32 }
 0x7d5   : > { %v1186_v43 = vsub.f32 %v2284_v37, %v1185_v34 }
 0x7d7   : > { %v1187_v38 = vmul.f32 %v1186_v43, %v1186_v43 }
 0x7d9   : > { %v1188_v39 = vsel %vm336_vm0, %v1187_v38, 0.0 }
 0x7da   : > { %1189 = vadd.xlane.f32.xlu0 %v1188_v39 }
 0x867   : > { %v1190_v47 = vpop.xlane.xlu0 %1189 }
 0x868   : > { %v1191_v48 = vmul.f32 0.03125, %v1190_v47 }
 0x86a   : > { %v1192_v49 = vadd.f32 1e-05, %v1191_v48 }
 0x86c   : > { %1817 = vrsqrt.f32 %v1192_v49 }
 0x876   : > { %v1818_v50 = vpop.eup %1817 }
 0x877   : > { %v1194_v52 = vmul.f32 %v1818_v50, %v1186_v43 }
 0x879   : > { %v1199_v54 = vmul.f32 %v1524_v51, %v1194_v52 }
 0x87b   : > { %v1204_v55 = vadd.f32 %v1525_v53, %v1199_v54 }
 0x87d   : > { %v1205_v56 = vpack.c.bf16 %v1204_v55, %v1204_v55 }
 0x87f   : > { %1657 = vmatmul.mubr.msk.bf16.vlgmr.msra.gmra.mrb[28].mxu1 %vm336_vm0, %v1205_v56 }
 0x952   : > { %v1267_v2 = vpop.f32.mrb[28].mxu1 }
 0x953   : > { %v1268_v17 = vadd.f32 %v1526_v62, %v1267_v2  ;;  %v1658_v63 = vpop.f32.mrb[29].mxu1 }
 0x954   : > { %v1270_v41 = vpop.f32.mrb[30].mxu1 }
 0x955   : > { %v1274_v1 = vmul.f32 0.70710677, %v1268_v17  ;;  %v1659_v3 = vpop.f32.mrb[31].mxu1  ;;  %v1273_v5 = vmul.f32 0.5, %v1268_v17 }
 0x957   : > { %1819 = verf.f32 %v1274_v1 }
 0x961   : > { %v1820_v4 = vpop.eup %1819 }
 0x962   : > { %v1276_v13 = vadd.f32 1.0, %v1820_v4 }
 0x964   : > { %v1277_v6 = vmul.f32 %v1276_v13, %v1273_v5 }
 0x966   : > { %v1279_v7 = vpack.c.bf16 %v1277_v6, %v1277_v6 }
 0x968   : > { %1677 = vmatmul.mubr.bf16.vlgmr.msra.gmra.mrb[16].mxu0 %v1279_v7 }
 0xa3b   : > { %v1378_v9 = vpop.f32.mrb[16].mxu0 }
 0xa3c   : > { %v1384_v10 = vadd.f32 %v1378_v9, %v1278_v8  ;;  %v1678_v11 = vpop.f32.mrb[17].mxu0 }
 0xa3d   : > { %v1381_v12 = vpop.f32.mrb[18].mxu0 }
 0xa3e   : > { %1385 = vst.msk [vmem:[#allocation2] sm:$0xff] %vm336_vm0, %v1384_v10  ;;  %v1679_v14 = vpop.f32.mrb[19].mxu0 }
 0xa45   : > { %v1386_v15 = vld [vmem:[#allocation2] sm:$0xff] }
 0xa46   : > { %v1387_v18 = vadd.f32 %v1386_v15, %v2284_v37 }
 0xa48   : > { %v1393_v19 = vadd.f32 %v1538_v16, %v1387_v18 }
 0xa4a   : > { %1394 = vst.msk [vmem:[%s325_s19] sm:$0xff] %vm336_vm0, %v1393_v19 }
 0xa4b   : > { %1862 = shalt.err (!%p1859_p6)
}
 0xa4c   : > { %s1863_s16 = scalar_lea.hbm %s2339_s25, 128  ;;  %s1867_s19 = scalar_lea.hbm %s2395_s8, 256 }
 0xa4d   : > { %p1864_p7 = scmp.ne.s32.totalorder %s2339_s25, %s1863_s16  ;;  %p1868_p0 = scmp.lt.u32.totalorder %s2339_s25, %s2395_s8 }
 0xa4e   : > { %p1869_p2 = scmp.lt.u32.totalorder %s1867_s19, %s1863_s16  ;;  %p1871_p8 = scmp.lt.u32.totalorder %s1863_s16, %s2339_s25 }
 0xa4f   : > { %p1865_p9 = pnand %p1864_p7, %p2407_p10 }
 0xa50   : > { %p1870_p4 = por %p1869_p2, %p1868_p0 }
 0xa51   : > { %p1866_p12 = pneg %p1865_p9 }
 0xa52   : > { %p1872_p11 = por %p1871_p8, %p1870_p4 }
 0xa54   : > { %p1873_p13 = pnand %p1872_p11, %p1866_p12 }
 0xa56   : > { %1876 = shalt.err (!%p1873_p13)
}
 0xa57   : > { %1684 = dma.vmem_to_hbm [thread:$0]  (%p2407_p10), %s2341_s20, 128, %s2339_s25, %s1396_s11  }
 0xa58 PF: > { %p1696_p1 = scmp.ge.s32.totalorder %s1931_s10, 2  ;;  %s1422_s12 = sand.u32 1, %s1911_s27  }
 0xa59   : > { %p2408_p3 = scmp.ne.s32.totalorder %s2401_s17, 0  ;;  %s1423_s30 = scalar_lea.sflag [#allocation7], %s1422_s12 }
 0xa5b   : > { %p1691_p5 = pnand %p1696_p1, %p2408_p3 }
 0xa5d   : > { %1906 = dma.done.wait (!%p1691_p5), %s1423_s30, 128  }
 0xa5e   : > { %1908 = vsyncadd (!%p1691_p5), %s1423_s30, 4294967168  ;;  %s22_s10 = sadd.s32 1, %s1931_s10   ;;  %s2409_s27 = smov %s1915_s28 }
 0xa5f   : > { %p19_p6 = scmp.ge.s32.totalorder %s22_s10, 4   ;;  %s2410_s28 = smov %s1919_s29 }
 0xa60   : > { %s2411_s29 = smov %s2053_s18  ;;  %s2412_s30 = smov %s1927_s9 }
 0xa61   : > { %s2413_s9 = smov %s2415_s13  ;;  %21 = sbr.rel (!%p19_p6) target bundleno = 5 (0x5), region = 93 }
 0xa68   :  { %1428 = vsyncpa [#allocation6], 1 }
 0xa69   :  { %1430 = vsyncpa [#allocation6 + $0x1], 1 }
 0xa6a   :  { %1431 = vsyncpa [#allocation7], 1 }
 0xa6b   :  { %1433 = vsyncpa [#allocation7 + $0x1], 1 }

// kernel: tpu_custom_call.1
= control target key start
LH: loop header
LB: loop body
LE: loop exit
PB: predicated region body
PF: predicated region fallthrough
CT: control target
= control target key end

     0   :  { %13 = vsyncpa [#allocation6], 0  ;;  %s2387_s0 = inlined_call_operand.vmem [shape: f32[2,8,32], index: 0, kind: input, shape index: {}]   ;;  %s2388_s1 = inlined_call_operand.vmem [shape: bf16[32,32], index: 1, kind: input, shape index: {}]   ;;  %s2389_s2 = inlined_call_operand.vmem [shape: bf16[32,64], index: 2, kind: input, shape index: {}]   ;;  %s2390_s3 = inlined_call_operand.vmem [shape: bf16[32,32], index: 3, kind: input, shape index: {}]   ;;  %s2391_s4 = inlined_call_operand.vmem [shape: bf16[1,32,128], index: 4, kind: input, shape index: {}]   ;;  %s2392_s5 = inlined_call_operand.vmem [shape: bf16[1,128,32], index: 5, kind: input, shape index: {}]   ;;  %s2393_s6 = inlined_call_operand.vmem [shape: f32[1,1,128], index: 6, kind: input, shape index: {}]   ;;  %s2394_s7 = inlined_call_operand.hbm [shape: f32[9,32], index: 7, kind: input, shape index: {}]   ;;  %s2395_s8 = inlined_call_operand.hbm [shape: f32[2,8,32], index: 8, kind: output, shape index: {}]  }
   0x1   :  { %14 = vsyncpa [#allocation7], 0 }
   0x2   :  { %16 = vsyncpa [#allocation7 + $0x1], 0  ;;  %s2000_s27 = smov 0   ;;  %s2002_s28 = smov 0  }
   0x3   :  { %s2004_s29 = smov 0   ;;  %s2006_s30 = smov 0  }
   0x4   :  { %s2008_s9 = smov 0   ;;  %s2010_s10 = smov 0  }
   0x5 LB: > { %s1492_s11 = sadd.s32 4294967295, %s1931_s10   ;;  %s1493_s12 = sadd.s32 4294967294, %s1931_s10   ;;  %s1931_s10 = sphi %s2010_s10, %s22_s10   ;;  %s1927_s9 = sphi %s2008_s9, %s2413_s9   ;;  %s1923_s30 = sphi %s2006_s30, %s2412_s30   ;;  %s1919_s29 = sphi %s2004_s29, %s2411_s29   ;;  %s1915_s28 = sphi %s2002_s28, %s2410_s28   ;;  %s1911_s27 = sphi %s2000_s27, %s2409_s27  }
   0x6   : > { %s34_s13 = sadd.s32 1, %s1927_s9  ;;  %s216_s14 = sadd.s32 1, %s1919_s29 }
   0x7   : > { %p36_p0 = scmp.ge.s32.totalorder %s34_s13, 2  ;;  %p226_p1 = scmp.ne.s32.totalorder %s1919_s29, %s1915_s28 }
   0x8   : > { %p227_p2 = scmp.eq.s32.totalorder %s1492_s11, 1  ;;  %p232_p3 = scmp.ne.s32.totalorder %s1915_s28, %s1911_s27 }
   0x9   : > { %s2415_s13 = smov (%p36_p0, %s34_s13), 0  ;;  %p233_p5 = scmp.eq.s32.totalorder %s1493_s12, 1 }
   0xa   : > { %p2040_p4 = por %p227_p2, %p226_p1  ;;  %s211_s16 = ssub.s32 %s1927_s9, %s2415_s13 }
   0xb   : > { %p1494_p6 = scmp.ge.s32.totalorder %s1931_s10, 1  ;;  %p214_p7 = scmp.eq.s32.totalorder %s211_s16, 0 }
   0xc   : > { %s2400_s15 = scalar_select %p2040_p4, 1, 0 }
   0xd   : > { %p2047_p8 = por %p233_p5, %p232_p3  ;;  %p240_p9 = scmp.lt.s32.totalorder %s1931_s10, 3 }
   0xe   : > { %s2053_s18 = scalar_select %p214_p7, %s1919_s29, %s216_s14  }
   0xf   : > { %s2401_s17 = scalar_select %p2047_p8, 1, 0 }
  0x10   : > { %p2055_p10 = pnand %p1494_p6, %p240_p9  ;;  %p2059_p11 = scmp.eq.s32.totalorder %s1492_s11, 0 }
  0x11   : > { %s1933_s21 = smov [#allocation5]   ;;  %s1821_s26 = scalar_lea.hbm %s2394_s7, 256 }
  0x12   : > { %s2402_s19 = scalar_select %p2055_p10, 1, 0 }
  0x13   : > { %s2403_s20 = scalar_select %p2059_p11, 1, 0 }
  0x14   : > { %p1686_p12 = pneg %p2055_p10  ;;  %s270_s22 = sshll.u32 %s1933_s21, 4  ;;  %s271_s22 = int_to_ptr.vmem [resolvable:$true] %s270_s22 }
  0x15   : > { %p1822_p0 = scmp.ne.s32.totalorder %s2394_s7, %s1821_s26  ;;  %p1828_p5 = scmp.lt.u32.totalorder %s1821_s26, %s2394_s7 }
  0x16   : > { %p2067_p13 = pnand %p2059_p11, %p1686_p12 }
  0x18   : > { %p1823_p1 = pneg %p2067_p13 }
  0x1a   : > { %p1824_p2 = pnand %p1823_p1, %p1822_p0 }
  0x1c   : > { %p1825_p3 = pneg %p1824_p2 }
  0x1e   : > { %p1830_p6 = pnand %p1828_p5, %p1825_p3 }
  0x20   : > { %1833 = shalt.err (!%p1830_p6)
}
  0x21   : > { %s1834_s21 = scalar_lea.vmem %s271_s22, 256  ;;  %p1842_p8 = scmp.lt.s32.totalorder %s271_s22, %s271_s22 }
  0x22   : > { %p1835_p7 = scmp.ne.s32.totalorder %s271_s22, %s1834_s21  ;;  %p1843_p4 = scmp.lt.s32.totalorder %s1834_s21, %s1834_s21 }
  0x24   : > { %p1837_p9 = pnand %p1835_p7, %p1823_p1  ;;  %p1844_p11 = por %p1843_p4, %p1842_p8 }
  0x26   : > { %p1838_p12 = pneg %p1837_p9 }
  0x28   : > { %p1845_p10 = pnand %p1844_p11, %p1838_p12 }
  0x2a   : > { %1848 = shalt.err (!%p1845_p10)
}
  0x2b   : > { %s1934_s24 = smov 128   ;;  %s1935_s25 = smov 8  }
  0x2c   : > { %1689 = dma.hbm_to_vmem [thread:$0]  (!%p2067_p13), %s2394_s7, 256, %s271_s22, [#allocation6], %s1934_s24, %s1934_s24, %s1935_s25  }
  0x2d   : > { %p2405_p0 = scmp.ne.s32.totalorder %s2402_s19, 0 }
  0x2e   : > { %p2406_p2 = scmp.ne.s32.totalorder (!%p2405_p0), %s2403_s20, 0 }
  0x2f   : > { %293 = sbr.rel (%p2405_p0) target bundleno = 2648 (0xa58), region = 52 }
  0x36   : > { %1902 = dma.done.wait (%p2406_p2), [#allocation6], 256  }
  0x37   : > { %1904 = vsyncadd (%p2406_p2), [#allocation6], 4294967040  ;;  %p326_p4 = scmp.lt.s32.totalorder %s1923_s30, 1  ;;  %vm336_vm0 = vcmask 261120   ;;  %v1779_v12 = vld [vmem:[%s2388_s1] sm:$0xff]   ;;  %v1936_v13 = vmov 0.0  }
  0x38   : > { %1580 = vmatprep.subr.bf16.mxu1 %v1936_v13  ;;  %430 = vst.msk [vmem:[#allocation2] sm:$0xff] %vm336_vm0, %v1936_v13  ;;  %1608 = vmatprep.subr.bf16.mxu0 %v1936_v13  ;;  %v1780_v14 = vld [vmem:[%s2388_s1 + $0x8] sm:$0xff]   ;;  %vm1937_vm1 = vmmov 0   ;;  %v1501_v22 = vld [vmem:[#allocation5] ss:$0 sm:$0xff]  ;;  %v1781_v29 = vld [vmem:[%s2389_s2] sm:$0xff]  }
  0x39   : > { %s327_s26 = scalar_select %p326_p4, %s1923_s30, 1  ;;  %1581 = vmatpush3.bf16.msra.mxu1 %v1779_v12  ;;  %1584 = vmatprep.mubr.msk.bf16.mxu1 %vm1937_vm1, %v1936_v13  ;;  %v1502_v24 = vld [vmem:[#allocation5 + $0x1] ss:$0 sm:$0xff]  ;;  %v1782_v32 = vld [vmem:[%s2389_s2 + $0x8] sm:$0xff]   ;;  %v1503_v35 = vld [vmem:[#allocation5 + $0x4] ss:$0 sm:$0xff] }
  0x3a   : > { %1582 = vmatprep.subr.bf16.mxu1 %v1936_v13  ;;  %1610 = vmatprep.mubr.msk.bf16.mxu0 %vm1937_vm1, %v1936_v13  ;;  %v1510_v42 = vld [vmem:[#allocation5 + $0x5] ss:$0 sm:$0xff]  ;;  %vm525_vm2 = vcmask 64512   ;;  %s1939_s16 = smov 112   ;;  %s1940_s23 = smov 104   ;;  %vm427_vm3 = vcmask 31744  }
  0x3b   : > { %s1500_s14 = sshll.u32 %s327_s26, 3  ;;  %429 = vst.msk [vmem:[#allocation4] sm:$0xff] %vm427_vm3, %v1936_v13  ;;  %vm594_vm4 = vcmask 7168   ;;  %vm731_vm5 = vcmask 15368   ;;  %vm869_vm6 = vcmask 23568   ;;  %s1946_s19 = smov 88  }
  0x3c   : > { %s329_s21 = scalar_lea.vmem %s2387_s0, %s1500_s14  ;;  %s1938_s14 = smov 120   ;;  %vm1007_vm7 = vcmask 31768   ;;  %vm610_vm8 = vcmask 1043456   ;;  %vm794_vm9 = vcmask 130112   ;;  %vm932_vm10 = vcmask 195712  }
  0x3d   : > { %v2098_v0 = vld [vmem:[%s329_s21] sm:$0xff]  ;;  %1583 = vmatpush3.bf16.msra.mxu1 %v1780_v14  ;;  %s1944_s21 = smov 32   ;;  %s1947_s20 = smov 96   ;;  %vm1070_vm11 = vcmask 261312  }
  0x3e   : > { %v337_v1 = vsel %vm336_vm0, %v2098_v0, 0.0  ;;  %1588 = vmatprep.subr.bf16.mxu1 %v1936_v13  ;;  %s1948_s22 = smov 80   ;;  %s1950_s24 = smov 72  }
  0x3f   : > { %338 = vadd.xlane.f32.xlu0 %v337_v1  ;;  %s1951_s25 = smov 8   ;;  %s1952_s11 = smov 16  }
  0x40   : > { %s1953_s12 = smov 24   ;;  %p2407_p10 = scmp.ne.s32.totalorder %s2400_s15, 0 }
  0x43   : > { %435 = vadd.xlane.f32.xlu0 %v337_v1  ;;  %v1941_v1 = vmov -inf  }
  0x44   : > { %428 = vst.msk [vmem:[#allocation3] sm:$0xff] %vm427_vm3, %v1941_v1 }
  0xcc   : > { %v339_v2 = vpop.xlane.xlu0 %338 }
  0xcd   : > { %v341_v3 = vmul.f32 0.03125, %v339_v2  ;;  %v1942_v2 = vmov 0  }
  0xce   : > { %1766 = vset.pattern.permute.xlu1 %v1942_v2 }
  0xcf   : > { %v342_v4 = vsub.f32 %v2098_v0, %v341_v3 }
  0xd0   : > { %v436_v5 = vpop.xlane.xlu0 %435 }
  0xd1   : > { %v437_v6 = vmul.f32 0.03125, %v436_v5  ;;  %v343_v7 = vmul.f32 %v342_v4, %v342_v4 }
  0xd3   : > { %v438_v8 = vsub.f32 %v2098_v0, %v437_v6  ;;  %v344_v9 = vsel %vm336_vm0, %v343_v7, 0.0 }
  0xd4   : > { %345 = vadd.xlane.f32.xlu1 %v344_v9 }
  0xd5   : > { %v439_v10 = vmul.f32 %v438_v8, %v438_v8 }
  0xd7   : > { %v440_v11 = vsel %vm336_vm0, %v439_v10, 0.0 }
  0xd8   : > { %441 = vadd.xlane.f32.xlu1 %v440_v11 }
 0x161   : > { %v346_v15 = vpop.xlane.xlu1 %345 }
 0x162   : > { %v347_v16 = vmul.f32 0.03125, %v346_v15 }
 0x164   : > { %v348_v17 = vadd.f32 1e-05, %v347_v16 }
 0x165   : > { %v442_v18 = vpop.xlane.xlu1 %441 }
 0x166   : > { %1795 = vrsqrt.f32 %v348_v17  ;;  %v443_v19 = vmul.f32 0.03125, %v442_v18  ;;  %v1943_v17 = vmov 1  }
 0x167   : > { %1767 = vset.pattern.permute.xlu0 %v1943_v17 }
 0x168   : > { %v444_v20 = vadd.f32 1e-05, %v443_v19 }
 0x16a   : > { %1797 = vrsqrt.f32 %v444_v20  ;;  %v2178_v20 = vld [vmem:[#allocation3] sm:$0xff] }
 0x170   : > { %v1796_v21 = vpop.eup %1795 }
 0x171   : > { %v350_v23 = vmul.f32 %v1796_v21, %v342_v4 }
 0x173   : > { %v355_v25 = vmul.f32 %v1501_v22, %v350_v23  ;;  %v1511_v23 = vld [vmem:[#allocation5 + $0x6] ss:$0 sm:$0xff] }
 0x174   : > { %v1798_v26 = vpop.eup %1797 }
 0x175   : > { %v446_v27 = vmul.f32 %v1798_v26, %v438_v8  ;;  %v360_v28 = vadd.f32 %v1502_v24, %v355_v25  ;;  %v1945_v25 = vmov 2  }
 0x177   : > { %v361_v30 = vpack.c.bf16 %v360_v28, %v360_v28  ;;  %v447_v31 = vmul.f32 %v1501_v22, %v446_v27 }
 0x179   : > { %1585 = vmatmul.mubr.msk.bf16.vlgmr.msra.gmra.mrb[0].mxu1 %vm336_vm0, %v361_v30  ;;  %v448_v33 = vadd.f32 %v1502_v24, %v447_v31 }
 0x17a   : > { %1589 = vmatpush3.bf16.msra.mxu1 %v1781_v29  ;;  %1592 = vmatprep.mubr.msk.bf16.mxu1 %vm1937_vm1, %v1936_v13 }
 0x17b   : > { %1590 = vmatprep.subr.bf16.mxu1 %v1936_v13  ;;  %v449_v34 = vpack.c.bf16 %v448_v33, %v448_v33 }
 0x17e   : > { %1591 = vmatpush3.bf16.msra.mxu1 %v1782_v32 }
 0x17f   : > { %1596 = vmatprep.subr.bf16.mxu1 %v1936_v13 }
 0x181   : > { %1593 = vmatmul.mubr.msk.bf16.vlgmr.msra.gmra.mrb[4].mxu1 %vm336_vm0, %v449_v34 }
 0x182   : > { %1598 = vmatprep.mubr.msk.bf16.mxu1 %vm1937_vm1, %v1936_v13 }
 0x24c   : > { %v420_v36 = vpop.f32.mrb[0].mxu1 }
 0x24d   : > { %v421_v37 = vadd.f32 %v1503_v35, %v420_v36  ;;  %v1586_v38 = vpop.f32.mrb[1].mxu1 }
 0x24e   : > { %v423_v39 = vpop.f32.mrb[2].mxu1 }
 0x24f   : > { %v426_v40 = vpack.c.bf16 %v421_v37, %v421_v37  ;;  %v1587_v41 = vpop.f32.mrb[3].mxu1 }
 0x250   : > { %v1949_v41 = vmov 3  }
 0x251   : > { %658 = vrot.lane.b32.xlu1 %v426_v40, %s1938_s14 }
 0x254   : > { %v2136_v43 = vpop.f32.mrb[4].mxu1 }
 0x255   : > { %v513_v44 = vadd.f32 %v1510_v42, %v2136_v43  ;;  %v1594_v45 = vpop.f32.mrb[5].mxu1 }
 0x256   : > { %v506_v46 = vpop.f32.mrb[6].mxu1 }
 0x257   : > { %v514_v47 = vpack.c.bf16 %v513_v44, %v513_v44  ;;  %v1595_v48 = vpop.f32.mrb[7].mxu1 }
 0x259   : > { %799 = vrot.lane.b32.xlu1 %v514_v47, %s1939_s16  ;;  %661 = vrot.lane.b32.xlu0 %v514_v47, %s1938_s14  ;;  %v530_v49 = vsel %vm525_vm2, %v514_v47, 0 }
 0x25a   : > { %1597 = vmatpush3.bf16.xpose.msra.mxu1 %v530_v49 }
 0x25b   : > { %1602 = vmatprep.subr.bf16.mxu1 %v1936_v13 }
 0x25d   : > { %797 = vrot.lane.b32.xlu1 %v426_v40, %s1939_s16  ;;  %937 = vrot.lane.b32.xlu0 %v514_v47, %s1940_s23  ;;  %s323_s16 = sand.u32 1, %s1915_s28  }
 0x261   : > { %935 = vrot.lane.b32.xlu1 %v426_v40, %s1940_s23  ;;  %1599 = vmatmul.mubr.msk.bf16.vlgmr.msra.gmra.mrb[8].mxu1 %vm525_vm2, %v426_v40  ;;  %s1499_s23 = sshll.u32 %s323_s16, 3 }
 0x262   : > { %1604 = vmatprep.mubr.msk.bf16.mxu1 %vm1937_vm1, %v1936_v13 }
 0x2c3   : > { %v659_v52 = vpop.permute.xlu1 %658 }
 0x2cb   : > { %v662_v50 = vpop.permute.xlu0 %661  ;;  %v800_v53 = vpop.permute.xlu1 %799 }
 0x2cc   : > { %v667_v51 = vsel %vm525_vm2, %v662_v50, 0  ;;  %v805_v54 = vsel %vm525_vm2, %v800_v53, 0 }
 0x2cd   : > { %1609 = vmatpush3.bf16.xpose.msra.mxu0 %v667_v51 }
 0x2ce   : > { %1620 = vmatprep.subr.bf16.mxu0 %v1936_v13 }
 0x2cf   : > { %v938_v55 = vpop.permute.xlu0 %937  ;;  %v798_v56 = vpop.permute.xlu1 %797 }
 0x2d0   : > { %v943_v57 = vsel %vm525_vm2, %v938_v55, 0 }
 0x2d3   : > { %v936_v58 = vpop.permute.xlu1 %935 }
 0x2d4   : > { %1611 = vmatmul.mubr.msk.bf16.vlgmr.msra.gmra.mrb[0].mxu0 %vm525_vm2, %v659_v52 }
 0x2d5   : > { %1621 = vmatpush3.bf16.xpose.msra.mxu0 %v805_v54  ;;  %1622 = vmatprep.mubr.msk.bf16.mxu0 %vm1937_vm1, %v1936_v13 }
 0x2d6   : > { %1632 = vmatprep.subr.bf16.mxu0 %v1936_v13 }
 0x2dc   : > { %1623 = vmatmul.mubr.msk.bf16.vlgmr.msra.gmra.mrb[4].mxu0 %vm525_vm2, %v798_v56 }
 0x2dd   : > { %1633 = vmatpush3.bf16.xpose.msra.mxu0 %v943_v57  ;;  %1634 = vmatprep.mubr.msk.bf16.mxu0 %vm1937_vm1, %v1936_v13 }
 0x2de   : > { %1644 = vmatprep.subr.bf16.mxu0 %v1936_v13 }
 0x2e4   : > { %1635 = vmatmul.mubr.msk.bf16.vlgmr.msra.gmra.mrb[8].mxu0 %vm525_vm2, %v936_v58 }
 0x2e5   : > { %1648 = vmatprep.mubr.msk.bf16.mxu0 %vm1937_vm1, %v1936_v13 }
 0x334   : > { %v2159_v59 = vpop.f32.mrb[8].mxu1 }
 0x335   : > { %v1600_v60 = vpop.f32.mrb[9].mxu1  ;;  %v573_v61 = vsel %vm525_vm2, %v2159_v59, -inf }
 0x336   : > { %574 = vmax.xlane.f32.xlu0 %v573_v61  ;;  %v569_v62 = vpop.f32.mrb[10].mxu1 }
 0x337   : > { %v1601_v63 = vpop.f32.mrb[11].mxu1 }
 0x3a7   : > { %v2165_v3 = vpop.f32.mrb[0].mxu0 }
 0x3a8   : > { %v1612_v4 = vpop.f32.mrb[1].mxu0  ;;  %v710_v5 = vsel %vm525_vm2, %v2165_v3, -inf }
 0x3a9   : > { %711 = vmax.xlane.f32.xlu1 %v710_v5  ;;  %v706_v6 = vpop.f32.mrb[2].mxu0 }
 0x3aa   : > { %v1613_v7 = vpop.f32.mrb[3].mxu0 }
 0x3af   : > { %v2169_v8 = vpop.f32.mrb[4].mxu0 }
 0x3b0   : > { %v1624_v9 = vpop.f32.mrb[5].mxu0  ;;  %v848_v10 = vsel %vm525_vm2, %v2169_v8, -inf }
 0x3b1   : > { %v844_v11 = vpop.f32.mrb[6].mxu0  ;;  %849 = vmax.xlane.f32.xlu0 %v848_v10 }
 0x3b2   : > { %v1625_v12 = vpop.f32.mrb[7].mxu0 }
 0x3b7   : > { %v2173_v14 = vpop.f32.mrb[8].mxu0 }
 0x3b8   : > { %v1636_v15 = vpop.f32.mrb[9].mxu0  ;;  %v986_v16 = vsel %vm525_vm2, %v2173_v14, -inf }
 0x3b9   : > { %987 = vmax.xlane.f32.xlu1 %v986_v16  ;;  %v982_v18 = vpop.f32.mrb[10].mxu0 }
 0x3ba   : > { %v1637_v19 = vpop.f32.mrb[11].mxu0  ;;  %v588_v18 = vld [vmem:[#allocation4] sm:$0xff] }
 0x3c3   : > { %v575_v21 = vpop.xlane.xlu0 %574 }
 0x3c4   : > { %v2181_v22 = vmax.f32 %v2178_v20, %v575_v21 }
 0x3c6   : > { %v577_v24 = vsub.f32 %v2178_v20, %v2181_v22  ;;  %656 = vst.msk [vmem:[#allocation3] sm:$0xff] %vm594_vm4, %v2181_v22 }
 0x3c7   : > { %520 = vrot.lane.b32.xlu0 %v1511_v23, %s1944_s21  ;;  %s1540_s21 = sshll.u32 %s1923_s30, 7  ;;  %s1954_s30 = smov [#allocation8]  }
 0x3c8   : > { %v578_v15 = vmul.f32 1.442695, %v577_v24  ;;  %s1853_s26 = sshll.u32 %s1954_s30, 4  ;;  %s1854_s26 = int_to_ptr.vmem [resolvable:$false] %s1853_s26 }
 0x3c9   : > { %s1855_s14 = scalar_lea.vmem %s1854_s26, 256 }
 0x3ca   : > { %582 = vperm.xlu1 %1766, %v2181_v22  }
 0x3cd   : > { %v709_v27 = vld [vmem:[#allocation3] sm:$0xff] }
 0x3ce   : > { %1768 = vset.pattern.permute.xlu1 %v1945_v25 }
 0x436   : > { %v712_v26 = vpop.xlane.xlu1 %711 }
 0x437   : > { %v713_v28 = vmax.f32 %v709_v27, %v712_v26 }
 0x439   : > { %v714_v29 = vsub.f32 %v709_v27, %v713_v28  ;;  %796 = vst.msk [vmem:[#allocation3] sm:$0xff] %vm731_vm5, %v713_v28  ;;  %719 = vperm.xlu0 %1767, %v713_v28  }
 0x43d   : > { %1770 = vset.pattern.permute.xlu0 %v1942_v2 }
 0x43e   : > { %v850_v30 = vpop.xlane.xlu0 %849 }
 0x440   : > { %v2191_v31 = vld [vmem:[#allocation3] sm:$0xff] }
 0x441   : > { %v2194_v32 = vmax.f32 %v2191_v31, %v850_v30 }
 0x442   : > { %v521_v33 = vpop.permute.xlu0 %520 }
 0x443   : > { %v852_v34 = vsub.f32 %v2191_v31, %v2194_v32  ;;  %934 = vst.msk [vmem:[#allocation3] sm:$0xff] %vm869_vm6, %v2194_v32  ;;  %v523_v35 = vadd.f32 %v521_v33, %v2136_v43 }
 0x445   : > { %v524_v36 = vpack.c.bf16 %v523_v35, %v523_v35  ;;  %v853_v20 = vmul.f32 1.442695, %v852_v34 }
 0x446   : > { %v988_v37 = vpop.xlane.xlu1 %987 }
 0x447   : > { %741 = vrot.lane.b32.xlu0 %v524_v36, %s1946_s19  ;;  %605 = vrot.lane.b32.xlu1 %v524_v36, %s1947_s20  ;;  %s325_s19 = scalar_lea.vmem [#allocation8], %s1499_s23 }
 0x448   : > { %s1410_s20 = sshll.u32 %s325_s19, 4  ;;  %s2341_s20 = int_to_ptr.vmem [resolvable:$true] %s1410_s20 }
 0x449   : > { %p1856_p1 = scmp.lt.s32.totalorder %s2341_s20, %s1854_s26 }
 0x44a   : > { %v2201_v38 = vld [vmem:[#allocation3] sm:$0xff]  ;;  %v583_v42 = vpop.permute.xlu1 %582 }
 0x44b   : > { %v2204_v39 = vmax.f32 %v2201_v38, %v988_v37  ;;  %879 = vrot.lane.b32.xlu0 %v524_v36, %s1948_s22  ;;  %857 = vperm.xlu1 %1768, %v2194_v32   ;;  %v585_v43 = vsub.f32 %v2159_v59, %v583_v42  ;;  %v715_v59 = vmul.f32 1.442695, %v714_v29 }
 0x44d   : > { %v990_v40 = vsub.f32 %v2201_v38, %v2204_v39  ;;  %1072 = vst.msk [vmem:[#allocation3] sm:$0xff] %vm1007_vm7, %v2204_v39  ;;  %v586_v44 = vmul.f32 1.442695, %v585_v43  ;;  %v596_v38 = vld [vmem:[#allocation2] sm:$0xff] }
 0x44f   : > { %1769 = vset.pattern.permute.xlu1 %v1949_v41  ;;  %1799 = vpow2.f32 %v586_v44  ;;  %v991_v22 = vmul.f32 1.442695, %v990_v40 }
 0x450   : > { %995 = vperm.xlu1 %1769, %v2204_v39  }
 0x454   : > { %1017 = vrot.lane.b32.xlu1 %v524_v36, %s1950_s24 }
 0x455   : > { %1771 = vset.pattern.permute.xlu1 %v1943_v17 }
 0x459   : > { %v1800_v45 = vpop.eup %1799 }
 0x45a   : > { %v590_v46 = vsel %vm525_vm2, %v1800_v45, 0.0  ;;  %v603_v53 = vpack.c.bf16 %v1800_v45, %v1800_v45 }
 0x46a   : > { %591 = vadd.xlane.f32.xlu0 %v590_v46 }
 0x4b8   : > { %v720_v47 = vpop.permute.xlu0 %719 }
 0x4b9   : > { %v722_v48 = vsub.f32 %v2165_v3, %v720_v47  ;;  %v606_v49 = vpop.permute.xlu1 %605 }
 0x4ba   : > { %v612_v50 = vsel %vm610_vm8, %v606_v49, 0 }
 0x4bb   : > { %v723_v51 = vmul.f32 1.442695, %v722_v48  ;;  %1603 = vmatpush3.bf16.msra.mxu1 %v612_v50 }
 0x4bc   : > { %v742_v52 = vpop.permute.xlu0 %741  ;;  %1614 = vmatprep.subr.bf16.mxu1 %v1936_v13 }
 0x4bd   : > { %1801 = vpow2.f32 %v723_v51  ;;  %v747_v54 = vsel %vm610_vm8, %v742_v52, 0 }
 0x4be   : > { %1605 = vmatmul.mubr.msk.bf16.vlgmr.msra.gmra.mrb[12].mxu1 %vm525_vm2, %v603_v53  ;;  %1803 = vpow2.f32 %v715_v59 }
 0x4bf   : > { %1615 = vmatpush3.bf16.msra.mxu1 %v747_v54  ;;  %1616 = vmatprep.mubr.msk.bf16.mxu1 %vm1937_vm1, %v1936_v13 }
 0x4c0   : > { %1626 = vmatprep.subr.bf16.mxu1 %v1936_v13  ;;  %v880_v56 = vpop.permute.xlu0 %879 }
 0x4c1   : > { %v885_v60 = vsel %vm610_vm8, %v880_v56, 0 }
 0x4c7   : > { %v1802_v55 = vpop.eup %1801 }
 0x4c8   : > { %v727_v57 = vsel %vm525_vm2, %v1802_v55, 0.0  ;;  %v740_v58 = vpack.c.bf16 %v1802_v55, %v1802_v55  ;;  %v1804_v5 = vpop.eup %1803 }
 0x4c9   : > { %728 = vadd.xlane.f32.xlu1 %v727_v57 }
 0x4ca   : > { %v858_v61 = vpop.permute.xlu1 %857  ;;  %1617 = vmatmul.mubr.msk.bf16.vlgmr.msra.gmra.mrb[16].mxu1 %vm525_vm2, %v740_v58 }
 0x4cb   : > { %v860_v62 = vsub.f32 %v2169_v8, %v858_v61  ;;  %1627 = vmatpush3.bf16.msra.mxu1 %v885_v60  ;;  %1628 = vmatprep.mubr.msk.bf16.mxu1 %vm1937_vm1, %v1936_v13  ;;  %v1783_v61 = vld [vmem:[%s2390_s3] sm:$0xff]  }
 0x4cc   : > { %1638 = vmatprep.subr.bf16.mxu1 %v1936_v13  ;;  %1645 = vmatpush3.bf16.msra.mxu0 %v1783_v61  ;;  %v1794_v61 = vld [vmem:[%s2392_s5 + $0x38] sm:$0xff]  }
 0x4cd   : > { %v861_v63 = vmul.f32 1.442695, %v860_v62  ;;  %v1784_v62 = vld [vmem:[%s2390_s3 + $0x8] sm:$0xff]   ;;  %1646 = vmatprep.subr.bf16.mxu0 %v1936_v13 }
 0x4cf   : > { %1805 = vpow2.f32 %v861_v63  ;;  %v996_v1 = vpop.permute.xlu1 %995 }
 0x4d0   : > { %v998_v3 = vsub.f32 %v2173_v14, %v996_v1  ;;  %1647 = vmatpush3.bf16.msra.mxu0 %v1784_v62  ;;  %v1526_v62 = vld [vmem:[%s2393_s6] ss:$0 sm:$0xff] }
 0x4d1   : > { %1660 = vmatprep.subr.bf16.mxu0 %v1936_v13 }
 0x4d2   : > { %v999_v4 = vmul.f32 1.442695, %v998_v3 }
 0x4d3   : > { %v1018_v7 = vpop.permute.xlu1 %1017 }
 0x4d4   : > { %1807 = vpow2.f32 %v999_v4  ;;  %v1023_v10 = vsel %vm610_vm8, %v1018_v7, 0 }
 0x4d5   : > { %1809 = vpow2.f32 %v578_v15 }
 0x4d6   : > { %1811 = vpow2.f32 %v853_v20 }
 0x4d7   : > { %1813 = vpow2.f32 %v991_v22 }
 0x4d9   : > { %v1806_v6 = vpop.eup %1805 }
 0x4da   : > { %736 = vperm.xlu1 %1771, %v1804_v5   ;;  %v865_v8 = vsel %vm525_vm2, %v1806_v6, 0.0  ;;  %v878_v9 = vpack.c.bf16 %v1806_v6, %v1806_v6 }
 0x4db   : > { %866 = vadd.xlane.f32.xlu0 %v865_v8 }
 0x4dc   : > { %1629 = vmatmul.mubr.msk.bf16.vlgmr.msra.gmra.mrb[20].mxu1 %vm525_vm2, %v878_v9 }
 0x4dd   : > { %1639 = vmatpush3.bf16.msra.mxu1 %v1023_v10  ;;  %1640 = vmatprep.mubr.msk.bf16.mxu1 %vm1937_vm1, %v1936_v13 }
 0x4de   : > { %v1808_v11 = vpop.eup %1807  ;;  %1772 = vset.pattern.permute.xlu1 %v1945_v25  ;;  %1652 = vmatprep.subr.bf16.mxu1 %v1936_v13 }
 0x4df   : > { %v1003_v12 = vsel %vm525_vm2, %v1808_v11, 0.0  ;;  %v1016_v14 = vpack.c.bf16 %v1808_v11, %v1808_v11  ;;  %v1810_v16 = vpop.eup %1809 }
 0x4e0   : > { %1004 = vadd.xlane.f32.xlu0 %v1003_v12  ;;  %v589_v19 = vmul.f32 %v1810_v16, %v588_v18  ;;  %v1812_v30 = vpop.eup %1811 }
 0x4e1   : > { %v1814_v36 = vpop.eup %1813 }
 0x4e4   : > { %1641 = vmatmul.mubr.msk.bf16.vlgmr.msra.gmra.mrb[24].mxu1 %vm525_vm2, %v1016_v14 }
 0x4e5   : > { %1656 = vmatprep.mubr.msk.bf16.mxu1 %vm1937_vm1, %v1936_v13 }
 0x4f6   : > { %599 = vperm.xlu0 %1770, %v1810_v16  }
 0x4f7   : > { %v592_v21 = vpop.xlane.xlu0 %591 }
 0x4f8   : > { %v593_v23 = vadd.f32 %v592_v21, %v589_v19 }
 0x4fa   : > { %595 = vst.msk [vmem:[#allocation4] sm:$0xff] %vm594_vm4, %v593_v23  ;;  %1776 = vset.pattern.permute.xlu0 %v1945_v25 }
 0x501   : > { %v725_v26 = vld [vmem:[#allocation4] sm:$0xff] }
 0x502   : > { %v726_v27 = vmul.f32 %v1804_v5, %v725_v26 }
 0x556   : > { %v729_v28 = vpop.xlane.xlu1 %728 }
 0x557   : > { %v730_v29 = vadd.f32 %v729_v28, %v726_v27 }
 0x559   : > { %732 = vst.msk [vmem:[#allocation4] sm:$0xff] %vm731_vm5, %v730_v29 }
 0x560   : > { %v863_v24 = vld [vmem:[#allocation4] sm:$0xff] }
 0x561   : > { %v864_v33 = vmul.f32 %v1812_v30, %v863_v24 }
 0x568   : > { %v867_v25 = vpop.xlane.xlu0 %866 }
 0x569   : > { %v868_v35 = vadd.f32 %v867_v25, %v864_v33 }
 0x56b   : > { %870 = vst.msk [vmem:[#allocation4] sm:$0xff] %vm869_vm6, %v868_v35 }
 0x56d   : > { %v1005_v31 = vpop.xlane.xlu0 %1004 }
 0x572   : > { %v1001_v37 = vld [vmem:[#allocation4] sm:$0xff] }
 0x573   : > { %v1002_v42 = vmul.f32 %v1814_v36, %v1001_v37 }
 0x575   : > { %v1006_v32 = vadd.f32 %v1005_v31, %v1002_v42  ;;  %v600_v39 = vpop.permute.xlu0 %599 }
 0x576   : > { %v602_v40 = vmul.f32 %v600_v39, %v596_v38 }
 0x577   : > { %1008 = vst.msk [vmem:[#allocation4] sm:$0xff] %vm1007_vm7, %v1006_v32 }
 0x57e   : > { %v1093_v34 = vld [vmem:[#allocation4] sm:$0xff] }
 0x57f   : > { %1815 = vrcp.f32 %v1093_v34 }
 0x589   : > { %v1816_v43 = vpop.eup %1815 }
 0x58a   : > { %1098 = vperm.xlu0 %1776, %v1816_v43  }
 0x58e   : > { %1778 = vset.pattern.permute.xlu0 %v1949_v41 }
 0x591   : > { %v648_v44 = vpop.f32.mrb[12].mxu1 }
 0x592   : > { %v654_v45 = vadd.f32 %v648_v44, %v602_v40  ;;  %v1606_v46 = vpop.f32.mrb[13].mxu1  ;;  %v1785_v40 = vld [vmem:[%s2391_s4] sm:$0xff]  }
 0x593   : > { %v651_v47 = vpop.f32.mrb[14].mxu1  ;;  %1653 = vmatpush3.bf16.msra.mxu1 %v1785_v40  ;;  %v1787_v44 = vld [vmem:[%s2392_s5] sm:$0xff]   ;;  %v1789_v46 = vld [vmem:[%s2392_s5 + $0x10] sm:$0xff]  }
 0x594   : > { %655 = vst.msk [vmem:[#allocation2] sm:$0xff] %vm525_vm2, %v654_v45  ;;  %v1607_v48 = vpop.f32.mrb[15].mxu1  ;;  %1654 = vmatprep.subr.bf16.mxu1 %v1936_v13  ;;  %v1788_v45 = vld [vmem:[%s2392_s5 + $0x8] sm:$0xff]  }
 0x59d   : > { %v783_v49 = vpop.f32.mrb[16].mxu1 }
 0x59e   : > { %790 = vrot.lane.b32.xlu1 %v783_v49, %s1951_s25  ;;  %v1618_v50 = vpop.f32.mrb[17].mxu1  ;;  %s2339_s25 = scalar_lea.hbm %s2395_s8, %s1540_s21 }
 0x59f   : > { %v786_v51 = vpop.f32.mrb[18].mxu1 }
 0x5a0   : > { %v1619_v52 = vpop.f32.mrb[19].mxu1  ;;  %v1524_v51 = vld [vmem:[#allocation5 + $0x2] ss:$0 sm:$0xff] }
 0x5a2   : > { %874 = vperm.xlu1 %1772, %v1812_v30   ;;  %v1520_v30 = vld [vmem:[#allocation5 + $0x7] ss:$0 sm:$0xff] }
 0x5a6   : > { %1773 = vset.pattern.permute.xlu1 %v1949_v41 }
 0x5af   : > { %v921_v53 = vpop.f32.mrb[20].mxu1 }
 0x5b0   : > { %928 = vrot.lane.b32.xlu1 %v921_v53, %s1952_s11  ;;  %v1630_v54 = vpop.f32.mrb[21].mxu1  ;;  %v1525_v53 = vld [vmem:[#allocation5 + $0x3] ss:$0 sm:$0xff]  ;;  %s1396_s11 = scalar_lea.sflag [#allocation7], %s323_s16 }
 0x5b1   : > { %v924_v55 = vpop.f32.mrb[22].mxu1 }
 0x5b2   : > { %v1631_v56 = vpop.f32.mrb[23].mxu1 }
 0x5b4   : > { %1012 = vperm.xlu1 %1773, %v1814_v36  }
 0x5b7   : > { %v1059_v57 = vpop.f32.mrb[24].mxu1 }
 0x5b8   : > { %1066 = vrot.lane.b32.xlu1 %v1059_v57, %s1953_s12  ;;  %v1642_v58 = vpop.f32.mrb[25].mxu1  ;;  %v1790_v57 = vld [vmem:[%s2392_s5 + $0x18] sm:$0xff]   ;;  %s1849_s12 = scalar_lea.vmem %s2341_s20, 128 }
 0x5b9   : > { %v1062_v59 = vpop.f32.mrb[26].mxu1  ;;  %1774 = vset.pattern.permute.xlu1 %v1942_v2  ;;  %v737_v2 = vpop.permute.xlu1 %736  ;;  %v1791_v58 = vld [vmem:[%s2392_s5 + $0x20] sm:$0xff]   ;;  %p1850_p8 = scmp.ne.s32.totalorder %s2341_s20, %s1849_s12  ;;  %p1857_p3 = scmp.lt.s32.totalorder %s1855_s14, %s1849_s12 }
 0x5ba   : > { %v1643_v60 = vpop.f32.mrb[27].mxu1  ;;  %v1792_v59 = vld [vmem:[%s2392_s5 + $0x28] sm:$0xff]  }
 0x5bb   : > { %v1793_v60 = vld [vmem:[%s2392_s5 + $0x30] sm:$0xff]   ;;  %p1851_p11 = pnand %p1850_p8, %p2407_p10  ;;  %p1858_p5 = por %p1857_p3, %p1856_p1 }
 0x5bc   : > { %1078 = vperm.xlu1 %1774, %v1816_v43  }
 0x5bd   : > { %p1852_p13 = pneg %p1851_p11 }
 0x5bf   : > { %p1859_p6 = pnand %p1858_p5, %p1852_p13 }
 0x5c0   : > { %1775 = vset.pattern.permute.xlu1 %v1943_v17  ;;  %v733_v17 = vld [vmem:[#allocation2] sm:$0xff] }
 0x5c1   : > { %1088 = vperm.xlu1 %1775, %v1816_v43   ;;  %v739_v63 = vmul.f32 %v737_v2, %v733_v17 }
 0x5c5   : > { %1777 = vset.pattern.permute.xlu1 %v1949_v41 }
 0x5c6   : > { %1108 = vperm.xlu1 %1777, %v1816_v43  }
 0x609   : > { %v1099_v23 = vpop.permute.xlu0 %1098 }
 0x610   : > { %v791_v41 = vpop.permute.xlu1 %790 }
 0x611   : > { %v793_v1 = vadd.f32 %v791_v41, %v739_v63 }
 0x613   : > { %795 = vst.msk [vmem:[#allocation2] sm:$0xff] %vm794_vm9, %v793_v1 }
 0x61a   : > { %v871_v4 = vld [vmem:[#allocation2] sm:$0xff] }
 0x621   : > { %v875_v3 = vpop.permute.xlu1 %874 }
 0x622   : > { %v877_v5 = vmul.f32 %v875_v3, %v871_v4 }
 0x625   : > { %v929_v6 = vpop.permute.xlu1 %928 }
 0x626   : > { %v931_v7 = vadd.f32 %v929_v6, %v877_v5 }
 0x628   : > { %933 = vst.msk [vmem:[#allocation2] sm:$0xff] %vm932_vm10, %v931_v7 }
 0x62f   : > { %v1009_v9 = vld [vmem:[#allocation2] sm:$0xff] }
 0x633   : > { %v1013_v8 = vpop.permute.xlu1 %1012 }
 0x634   : > { %v1015_v10 = vmul.f32 %v1013_v8, %v1009_v9 }
 0x637   : > { %v1067_v11 = vpop.permute.xlu1 %1066 }
 0x638   : > { %v1069_v12 = vadd.f32 %v1067_v11, %v1015_v10 }
 0x63a   : > { %1071 = vst.msk [vmem:[#allocation2] sm:$0xff] %vm1070_vm11, %v1069_v12 }
 0x63b   : > { %v1079_v15 = vpop.permute.xlu1 %1078 }
 0x640   : > { %v1089_v19 = vpop.permute.xlu1 %1088 }
 0x641   : > { %v1075_v14 = vld [vmem:[#allocation2] sm:$0xff] }
 0x642   : > { %v1081_v16 = vmul.f32 %v1079_v15, %v1075_v14 }
 0x644   : > { %1082 = vst.msk [vmem:[#allocation2] sm:$0xff] %vm525_vm2, %v1081_v16  ;;  %v1538_v16 = vld [vmem:[#allocation5 + $0x8] ss:$0 sm:$0xff] }
 0x645   : > { %v1109_v29 = vpop.permute.xlu1 %1108 }
 0x64b   : > { %v1085_v18 = vld [vmem:[#allocation2] sm:$0xff] }
 0x64c   : > { %v1091_v21 = vmul.f32 %v1089_v19, %v1085_v18 }
 0x64e   : > { %1092 = vst.msk [vmem:[#allocation2] sm:$0xff] %vm794_vm9, %v1091_v21 }
 0x655   : > { %v1095_v26 = vld [vmem:[#allocation2] sm:$0xff] }
 0x656   : > { %v1101_v27 = vmul.f32 %v1099_v23, %v1095_v26 }
 0x658   : > { %1102 = vst.msk [vmem:[#allocation2] sm:$0xff] %vm932_vm10, %v1101_v27 }
 0x65f   : > { %v1105_v28 = vld [vmem:[#allocation2] sm:$0xff] }
 0x660   : > { %v1111_v20 = vmul.f32 %v1109_v29, %v1105_v28 }
 0x662   : > { %1112 = vst.msk [vmem:[#allocation2] sm:$0xff] %vm1070_vm11, %v1111_v20 }
 0x669   : > { %v1113_v22 = vld [vmem:[#allocation2] sm:$0xff] }
 0x66a   : > { %v1114_v24 = vpack.c.bf16 %v1113_v22, %v1113_v22  ;;  %1206 = vst.msk [vmem:[#allocation2] sm:$0xff] %vm336_vm0, %v1936_v13 }
 0x66c   : > { %1649 = vmatmul.mubr.msk.bf16.vlgmr.msra.gmra.mrb[12].mxu0 %vm336_vm0, %v1114_v24 }
 0x66d   : > { %1676 = vmatprep.mubr.msk.bf16.mxu0 %vm1937_vm1, %v1936_v13  ;;  %1661 = vmatpush3.bf16.msra.mxu0 %v1787_v44 }
 0x66e   : > { %1662 = vmatprep.subr.bf16.mxu0 %v1936_v13 }
 0x671   : > { %1663 = vmatpush3.bf16.msra.mxu0 %v1788_v45  ;;  %v1278_v8 = vld [vmem:[#allocation2] sm:$0xff] }
 0x672   : > { %1664 = vmatprep.subr.bf16.mxu0 %v1936_v13 }
 0x675   : > { %1665 = vmatpush3.bf16.msra.mxu0 %v1789_v46 }
 0x676   : > { %1666 = vmatprep.subr.bf16.mxu0 %v1936_v13 }
 0x679   : > { %1667 = vmatpush3.bf16.msra.mxu0 %v1790_v57 }
 0x67a   : > { %1668 = vmatprep.subr.bf16.mxu0 %v1936_v13 }
 0x67d   : > { %1669 = vmatpush3.bf16.msra.mxu0 %v1791_v58 }
 0x67e   : > { %1670 = vmatprep.subr.bf16.mxu0 %v1936_v13 }
 0x681   : > { %1671 = vmatpush3.bf16.msra.mxu0 %v1792_v59 }
 0x682   : > { %1672 = vmatprep.subr.bf16.mxu0 %v1936_v13 }
 0x685   : > { %1673 = vmatpush3.bf16.msra.mxu0 %v1793_v60 }
 0x686   : > { %1674 = vmatprep.subr.bf16.mxu0 %v1936_v13 }
 0x689   : > { %1675 = vmatpush3.bf16.msra.mxu0 %v1794_v61 }
 0x73f   : > { %v1173_v33 = vpop.f32.mrb[12].mxu0 }
 0x740   : > { %v1174_v25 = vadd.f32 %v1520_v30, %v1173_v33  ;;  %v1650_v35 = vpop.f32.mrb[13].mxu0 }
 0x741   : > { %v1176_v36 = vpop.f32.mrb[14].mxu0 }
 0x742   : > { %v2284_v37 = vadd.f32 %v1174_v25, %v2098_v0  ;;  %v1651_v42 = vpop.f32.mrb[15].mxu0  ;;  %v1786_v0 = vld [vmem:[%s2391_s4 + $0x8] sm:$0xff]  }
 0x743   : > { %1655 = vmatpush3.bf16.msra.mxu1 %v1786_v0 }
 0x744   : > { %v1182_v31 = vsel %vm336_vm0, %v2284_v37, 0.0 }
 0x745   : > { %1183 = vadd.xlane.f32.xlu1 %v1182_v31 }
 0x7d2   : > { %v1184_v32 = vpop.xlane.xlu1 %1183 }
 0x7d3   : > { %v1185_v34 = vmul.f32 0.03125, %v1184_v32 }
 0x7d5   : > { %v1186_v43 = vsub.f32 %v2284_v37, %v1185_v34 }
 0x7d7   : > { %v1187_v38 = vmul.f32 %v1186_v43, %v1186_v43 }
 0x7d9   : > { %v1188_v39 = vsel %vm336_vm0, %v1187_v38, 0.0 }
 0x7da   : > { %1189 = vadd.xlane.f32.xlu0 %v1188_v39 }
 0x867   : > { %v1190_v47 = vpop.xlane.xlu0 %1189 }
 0x868   : > { %v1191_v48 = vmul.f32 0.03125, %v1190_v47 }
 0x86a   : > { %v1192_v49 = vadd.f32 1e-05, %v1191_v48 }
 0x86c   : > { %1817 = vrsqrt.f32 %v1192_v49 }
 0x876   : > { %v1818_v50 = vpop.eup %1817 }
 0x877   : > { %v1194_v52 = vmul.f32 %v1818_v50, %v1186_v43 }
 0x879   : > { %v1199_v54 = vmul.f32 %v1524_v51, %v1194_v52 }
 0x87b   : > { %v1204_v55 = vadd.f32 %v1525_v53, %v1199_v54 }
 0x87d   : > { %v1205_v56 = vpack.c.bf16 %v1204_v55, %v1204_v55 }
 0x87f   : > { %1657 = vmatmul.mubr.msk.bf16.vlgmr.msra.gmra.mrb[28].mxu1 %vm336_vm0, %v1205_v56 }
 0x952   : > { %v1267_v2 = vpop.f32.mrb[28].mxu1 }
 0x953   : > { %v1268_v17 = vadd.f32 %v1526_v62, %v1267_v2  ;;  %v1658_v63 = vpop.f32.mrb[29].mxu1 }
 0x954   : > { %v1270_v41 = vpop.f32.mrb[30].mxu1 }
 0x955   : > { %v1274_v1 = vmul.f32 0.70710677, %v1268_v17  ;;  %v1659_v3 = vpop.f32.mrb[31].mxu1  ;;  %v1273_v5 = vmul.f32 0.5, %v1268_v17 }
 0x957   : > { %1819 = verf.f32 %v1274_v1 }
 0x961   : > { %v1820_v4 = vpop.eup %1819 }
 0x962   : > { %v1276_v13 = vadd.f32 1.0, %v1820_v4 }
 0x964   : > { %v1277_v6 = vmul.f32 %v1276_v13, %v1273_v5 }
 0x966   : > { %v1279_v7 = vpack.c.bf16 %v1277_v6, %v1277_v6 }
 0x968   : > { %1677 = vmatmul.mubr.bf16.vlgmr.msra.gmra.mrb[16].mxu0 %v1279_v7 }
 0xa3b   : > { %v1378_v9 = vpop.f32.mrb[16].mxu0 }
 0xa3c   : > { %v1384_v10 = vadd.f32 %v1378_v9, %v1278_v8  ;;  %v1678_v11 = vpop.f32.mrb[17].mxu0 }
 0xa3d   : > { %v1381_v12 = vpop.f32.mrb[18].mxu0 }
 0xa3e   : > { %1385 = vst.msk [vmem:[#allocation2] sm:$0xff] %vm336_vm0, %v1384_v10  ;;  %v1679_v14 = vpop.f32.mrb[19].mxu0 }
 0xa45   : > { %v1386_v15 = vld [vmem:[#allocation2] sm:$0xff] }
 0xa46   : > { %v1387_v18 = vadd.f32 %v1386_v15, %v2284_v37 }
 0xa48   : > { %v1393_v19 = vadd.f32 %v1538_v16, %v1387_v18 }
 0xa4a   : > { %1394 = vst.msk [vmem:[%s325_s19] sm:$0xff] %vm336_vm0, %v1393_v19 }
 0xa4b   : > { %1862 = shalt.err (!%p1859_p6)
}
 0xa4c   : > { %s1863_s16 = scalar_lea.hbm %s2339_s25, 128  ;;  %s1867_s19 = scalar_lea.hbm %s2395_s8, 256 }
 0xa4d   : > { %p1864_p7 = scmp.ne.s32.totalorder %s2339_s25, %s1863_s16  ;;  %p1868_p0 = scmp.lt.u32.totalorder %s2339_s25, %s2395_s8 }
 0xa4e   : > { %p1869_p2 = scmp.lt.u32.totalorder %s1867_s19, %s1863_s16  ;;  %p1871_p8 = scmp.lt.u32.totalorder %s1863_s16, %s2339_s25 }
 0xa4f   : > { %p1865_p9 = pnand %p1864_p7, %p2407_p10 }
 0xa50   : > { %p1870_p4 = por %p1869_p2, %p1868_p0 }
 0xa51   : > { %p1866_p12 = pneg %p1865_p9 }
 0xa52   : > { %p1872_p11 = por %p1871_p8, %p1870_p4 }
 0xa54   : > { %p1873_p13 = pnand %p1872_p11, %p1866_p12 }
 0xa56   : > { %1876 = shalt.err (!%p1873_p13)
}
 0xa57   : > { %1684 = dma.vmem_to_hbm [thread:$0]  (%p2407_p10), %s2341_s20, 128, %s2339_s25, %s1396_s11  }
 0xa58 PF: > { %p1696_p1 = scmp.ge.s32.totalorder %s1931_s10, 2  ;;  %s1422_s12 = sand.u32 1, %s1911_s27  }
 0xa59   : > { %p2408_p3 = scmp.ne.s32.totalorder %s2401_s17, 0  ;;  %s1423_s30 = scalar_lea.sflag [#allocation7], %s1422_s12 }
 0xa5b   : > { %p1691_p5 = pnand %p1696_p1, %p2408_p3 }
 0xa5d   : > { %1906 = dma.done.wait (!%p1691_p5), %s1423_s30, 128  }
 0xa5e   : > { %1908 = vsyncadd (!%p1691_p5), %s1423_s30, 4294967168  ;;  %s22_s10 = sadd.s32 1, %s1931_s10   ;;  %s2409_s27 = smov %s1915_s28 }
 0xa5f   : > { %p19_p6 = scmp.ge.s32.totalorder %s22_s10, 4   ;;  %s2410_s28 = smov %s1919_s29 }
 0xa60   : > { %s2411_s29 = smov %s2053_s18  ;;  %s2412_s30 = smov %s1927_s9 }
 0xa61   : > { %s2413_s9 = smov %s2415_s13  ;;  %21 = sbr.rel (!%p19_p6) target bundleno = 5 (0x5), region = 93 }
 0xa68   :  { %1428 = vsyncpa [#allocation6], 1 }
 0xa69   :  { %1430 = vsyncpa [#allocation6 + $0x1], 1 }
 0xa6a   :  { %1431 = vsyncpa [#allocation7], 1 }
 0xa6b   :  { %1433 = vsyncpa [#allocation7 + $0x1], 1 }

</bundles_post_ra>
